<compile_context>
chip_gen: v7x
topology: tpu7x:2x2x1
jax: 0.10.0
libtpu: 0.0.40
codegen_flags: <defaults>
</compile_context>

<pallas_src>
import math
from functools import partial

import jax
import jax.numpy as jnp
from jax import lax
from jax.experimental import pallas as pl
from jax.experimental.pallas import tpu as pltpu

_SQRT_HALF = 0.7071067811865476
_GELU_TANH_C = 0.7978845608028654  # sqrt(2/pi)

_VMEM_STEP_BUDGET = 24 * 1024 * 1024  # target per-grid-step VMEM footprint (bytes)


def _gelu(x, exact):
    if exact:
        return 0.5 * x * (1.0 + lax.erf(x * _SQRT_HALF))
    # tanh approximation: routes through the EUP slot (v6e/v7x) instead of the
    # long erf VPU polynomial.  Slightly different numerics than torch default.
    return 0.5 * x * (1.0 + jnp.tanh(_GELU_TANH_C * (x + 0.044715 * x * x * x)))


def _taps_bias_gelu(xp_ref, w_ref, b_ref, o_ref, *, TH, W, K, LPAD, exact_gelu):
    """Accumulate the K*K depthwise taps from the padded scratch, add bias, GELU.

    xp_ref : (TH + 2p, LPAD + W + p, TC)  zero-padded input tile (input dtype)
    w_ref  : (K*K, TC)                    depthwise weights, row index = di*K + dj
    b_ref  : (1, TC)
    o_ref  : (TH, W, TC)
    """
    p = (K - 1) // 2
    TC = o_ref.shape[-1]
    acc = jnp.broadcast_to(b_ref[0, :].astype(jnp.float32), (TH, W, TC))
    # dj outer / di inner: only K sublane-misaligned W-slices per tile; each
    # loaded plane is reused across the K (cheap, outer-dim) row offsets.
    for dj in range(K):
        c0 = LPAD - p + dj
        plane = xp_ref[:, c0:c0 + W, :].astype(jnp.float32)  # (TH+2p, W, TC)
        for di in range(K):
            wv = w_ref[di * K + dj, :].astype(jnp.float32)   # (TC,)
            acc = acc + plane[di:di + TH, :, :] * wv
    o_ref[...] = _gelu(acc, exact_gelu).astype(o_ref.dtype)


def _dwconv_kernel_simple(x_ref, w_ref, b_ref, o_ref, xp_ref,
                          *, H, W, K, LPAD, exact_gelu):
    """One (batch, channel-tile) per grid step; full H in one tile (no halo)."""
    p = (K - 1) // 2
    Hp = H + 2 * p
    TC = xp_ref.shape[-1]
    dt = xp_ref.dtype
    # Zero the pad borders (left / right columns, top / bottom row strips).
    if LPAD > 0:
        xp_ref[:, 0:LPAD, :] = jnp.zeros((Hp, LPAD, TC), dt)
    if p > 0:
        xp_ref[:, LPAD + W:LPAD + W + p, :] = jnp.zeros((Hp, p, TC), dt)
        xp_ref[0:p, LPAD:LPAD + W, :] = jnp.zeros((p, W, TC), dt)
        xp_ref[p + H:p + H + p, LPAD:LPAD + W, :] = jnp.zeros((p, W, TC), dt)
    # Interior copy: column offset LPAD is sublane-aligned (multiple of 8).
    xp_ref[p:p + H, LPAD:LPAD + W, :] = x_ref[...]
    _taps_bias_gelu(xp_ref, w_ref, b_ref, o_ref, TH=H, W=W, K=K, LPAD=LPAD,
                    exact_gelu=exact_gelu)


def _dwconv_kernel_rowtiled(x_ref, up_ref, dn_ref, w_ref, b_ref, o_ref, xp_ref,
                            *, TH, W, K, LPAD, exact_gelu):
    """One (batch, row-tile, channel-tile) per grid step; p-row halos from neighbours."""
    p = (K - 1) // 2
    THp = TH + 2 * p
    TC = xp_ref.shape[-1]
    dt = xp_ref.dtype
    r = pl.program_id(1)
    nr = pl.num_programs(1)

    # Zero the pad borders.
    xp_ref[:, 0:LPAD, :] = jnp.zeros((THp, LPAD, TC), dt)
    xp_ref[:, LPAD + W:LPAD + W + p, :] = jnp.zeros((THp, p, TC), dt)
    xp_ref[0:p, LPAD:LPAD + W, :] = jnp.zeros((p, W, TC), dt)
    xp_ref[p + TH:p + TH + p, LPAD:LPAD + W, :] = jnp.zeros((p, W, TC), dt)
    # Interior copy (sublane-aligned at column offset LPAD).
    xp_ref[p:p + TH, LPAD:LPAD + W, :] = x_ref[...]

    # Row halos from the neighbouring row tiles (skip at the image edges).
    @pl.when(r > 0)
    def _():
        xp_ref[0:p, LPAD:LPAD + W, :] = up_ref[...]

    @pl.when(r < nr - 1)
    def _():
        xp_ref[p + TH:p + TH + p, LPAD:LPAD + W, :] = dn_ref[...]

    _taps_bias_gelu(xp_ref, w_ref, b_ref, o_ref, TH=TH, W=W, K=K, LPAD=LPAD,
                    exact_gelu=exact_gelu)


def _pick_channel_tile(C):
    # Lane-dense 128-channel tiles when possible; otherwise take the full C
    # (allowed by the BlockSpec "equal to full dim" rule).
    return 128 if (C % 128 == 0) else C


def _estimate_step_vmem(TH, W, TC, K, LPAD, itemsize):
    p = (K - 1) // 2
    THp, Wscr = TH + 2 * p, LPAD + W + p
    blk = TH * W * TC
    est = 2 * 2 * blk * itemsize           # double-buffered input + output blocks
    est += 2 * 2 * p * W * TC * itemsize   # double-buffered halo blocks
    est += 2 * (K * K + 1) * TC * 4        # weights + bias
    est += THp * Wscr * TC * itemsize      # padded scratch
    est += (THp + TH) * W * TC * 4         # f32 plane + accumulator temporaries
    return est


def _pick_row_tile(H, W, TC, K, LPAD, itemsize):
    p = (K - 1) // 2
    if p == 0 or H % p != 0:
        return H
    cands = sorted((d for d in range(p, H + 1, p) if H % d == 0), reverse=True)
    for th in cands:
        if _estimate_step_vmem(th, W, TC, K, LPAD, itemsize) <= _VMEM_STEP_BUDGET:
            return th
    return cands[-1]


def depthwise_conv_gelu_nhwc(x_nhwc, weight_kkc, bias, kernel_size=5, *,
                             row_tile=None, channel_tile=None, exact_gelu=True):
    """x_nhwc: (B, H, W, C); weight_kkc: (K*K, C); bias: (C,) -> (B, H, W, C)."""
    B, H, W, C = x_nhwc.shape
    K = kernel_size
    p = (K - 1) // 2
    LPAD = ((p + 7) // 8) * 8 if p > 0 else 0  # sublane-aligned left pad in scratch
    itemsize = jnp.dtype(x_nhwc.dtype).itemsize

    TC = channel_tile if channel_tile is not None else _pick_channel_tile(C)
    assert C % TC == 0, "channel tile must divide C"
    nc = C // TC

    TH = row_tile if row_tile is not None else _pick_row_tile(H, W, TC, K, LPAD, itemsize)
    use_row_tiling = (p > 0 and 0 < TH < H and H % TH == 0 and TH % p == 0)
    if not use_row_tiling:
        TH = H
    nr = H // TH

    bias2d = bias.reshape(1, C)
    scratch = pltpu.VMEM((TH + 2 * p, LPAD + W + p, TC), x_nhwc.dtype)
    vmem_est = _estimate_step_vmem(TH, W, TC, K, LPAD, itemsize)
    vmem_limit = int(min(100 * 2**20, max(32 * 2**20, vmem_est + vmem_est // 4)))

    if nr > 1:
        rb = TH // p          # p-row blocks per row tile
        n_pblocks = H // p    # total p-row blocks along H
        kernel = partial(_dwconv_kernel_rowtiled, TH=TH, W=W, K=K, LPAD=LPAD,
                         exact_gelu=exact_gelu)
        grid = (B, nr, nc)
        in_specs = [
            pl.BlockSpec((None, TH, W, TC), lambda b, r, c: (b, r, 0, c)),
            pl.BlockSpec((None, p, W, TC),
                         lambda b, r, c: (b, jnp.maximum(r * rb - 1, 0), 0, c)),
            pl.BlockSpec((None, p, W, TC),
                         lambda b, r, c: (b, jnp.minimum((r + 1) * rb, n_pblocks - 1), 0, c)),
            pl.BlockSpec((K * K, TC), lambda b, r, c: (0, c)),
            pl.BlockSpec((1, TC), lambda b, r, c: (0, c)),
        ]
        out_spec = pl.BlockSpec((None, TH, W, TC), lambda b, r, c: (b, r, 0, c))
        operands = (x_nhwc, x_nhwc, x_nhwc, weight_kkc, bias2d)
    else:
        kernel = partial(_dwconv_kernel_simple, H=H, W=W, K=K, LPAD=LPAD,
                         exact_gelu=exact_gelu)
        grid = (B, nc)
        in_specs = [
            pl.BlockSpec((None, H, W, TC), lambda b, c: (b, 0, 0, c)),
            pl.BlockSpec((K * K, TC), lambda b, c: (0, c)),
            pl.BlockSpec((1, TC), lambda b, c: (0, c)),
        ]
        out_spec = pl.BlockSpec((None, H, W, TC), lambda b, c: (b, 0, 0, c))
        operands = (x_nhwc, weight_kkc, bias2d)

    return pl.pallas_call(
        kernel,
        out_shape=jax.ShapeDtypeStruct((B, H, W, C), x_nhwc.dtype),
        grid_spec=pltpu.PrefetchScalarGridSpec(
            num_scalar_prefetch=0,
            grid=grid,
            in_specs=in_specs,
            out_specs=out_spec,
            scratch_shapes=[scratch]),
        compiler_params=pltpu.CompilerParams(
            dimension_semantics=("parallel",) * len(grid),
            vmem_limit_bytes=vmem_limit),
    )(*operands)


def dwconv_forward(x, x_size, weight, bias, kernel_size=5, *,
                   row_tile=None, channel_tile=None, exact_gelu=True):
    """Mirrors dwconv.forward.

    x      : (B, N, C) tokens
    x_size : tuple (H, W) or int (= H*W)
    weight : (C, 1, K, K) PyTorch-style depthwise conv weight
    bias   : (C,)
    """
    B, N, C = x.shape
    K = kernel_size
    # (C, 1, K, K) -> (K*K, C) with row index di*K + dj.
    w_kkc = jnp.transpose(weight[:, 0, :, :], (1, 2, 0)).reshape(K * K, C)

    def run(tokens, H, W):
        nhwc = tokens.reshape(B, H, W, C)  # free reshape: NHWC == token layout
        out = depthwise_conv_gelu_nhwc(nhwc, w_kkc, bias, K, row_tile=row_tile,
                                       channel_tile=channel_tile,
                                       exact_gelu=exact_gelu)
        return out.reshape(B, H * W, C)

    if isinstance(x_size, tuple):
        H, W = x_size
        if N == H * W + 1:
            # TODO(synk): write the patch tokens at token offset 1 directly from the
            # pallas_call (needs an element-offset out BlockSpec) to drop this extra
            # output pass; Blocked out-specs cannot express the +1 token offset.
            cls_token = x[:, 0:1, :]
            patch = run(x[:, 1:, :], H, W)
            return jnp.concatenate([cls_token, patch], axis=1)
        return run(x, H, W)
    if N == x_size + 1:
        H = W = int(math.sqrt(x_size))
        cls_token = x[:, 0:1, :]
        patch = run(x[:, 1:, :], H, W)
        return jnp.concatenate([cls_token, patch], axis=1)
    H = W = int(math.sqrt(N))
    return run(x, H, W)


def _reference(x, x_size, weight, bias, kernel_size=5):
    """Pure-JAX reference using lax.conv_general_dilated (NCHW, groups=C)."""
    B, N, C = x.shape
    if isinstance(x_size, tuple):
        H, W = x_size
    else:
        H = W = int(math.sqrt(x_size if N == x_size + 1 else N))
    has_cls = (N == H * W + 1)
    tokens = x[:, 1:, :] if has_cls else x
    nchw = jnp.transpose(tokens, (0, 2, 1)).reshape(B, C, H, W)
    p = (kernel_size - 1) // 2
    y = lax.conv_general_dilated(
        nchw, weight, window_strides=(1, 1), padding=((p, p), (p, p)),
        dimension_numbers=("NCHW", "OIHW", "NCHW"), feature_group_count=C)
    y = y + bias.reshape(1, C, 1, 1)
    y = 0.5 * y * (1.0 + lax.erf(y * _SQRT_HALF))
    y = jnp.transpose(y.reshape(B, C, H * W), (0, 2, 1))
    if has_cls:
        y = jnp.concatenate([x[:, 0:1, :], y], axis=1)
    return y


if __name__ == "__main__":
    key = jax.random.PRNGKey(0)
    keys = jax.random.split(key, 8)

    def make_params(C, K, kw, kb):
        fan_in = 1 * K * K
        bound = 1.0 / math.sqrt(fan_in)
        weight = jax.random.uniform(kw, (C, 1, K, K), jnp.float32, -bound, bound)
        bias = jax.random.uniform(kb, (C,), jnp.float32, -bound, bound)
        return weight, bias

    # 1) Small demo shape, no cls token (N = H*W).
    B, C, H, W, K = 2, 4, 16, 16, 5
    weight, bias = make_params(C, K, keys[1], keys[2])
    x = jax.random.normal(keys[0], (B, H * W, C), jnp.float32)
    out = jax.block_until_ready(dwconv_forward(x, (H, W), weight, bias, K))
    ref = _reference(x, (H, W), weight, bias, K)
    assert out.shape == (B, H * W, C)
    assert float(jnp.max(jnp.abs(out - ref))) < 1e-4

    # 2) cls-token branch (N = H*W + 1).
    x_cls = jax.random.normal(keys[3], (B, H * W + 1, C), jnp.float32)
    out_cls = jax.block_until_ready(dwconv_forward(x_cls, (H, W), weight, bias, K))
    ref_cls = _reference(x_cls, (H, W), weight, bias, K)
    assert out_cls.shape == (B, H * W + 1, C)
    assert float(jnp.max(jnp.abs(out_cls - ref_cls))) < 1e-4

    # 3) Exercise row + channel tiling (halo kernel, lane-dense 128-channel tiles).
    B3, C3, H3, W3 = 1, 256, 16, 16
    w3, b3 = make_params(C3, K, keys[5], keys[6])
    x3 = jax.random.normal(keys[4], (B3, H3 * W3, C3), jnp.float32)
    out3 = jax.block_until_ready(
        dwconv_forward(x3, (H3, W3), w3, b3, K, row_tile=8))
    ref3 = _reference(x3, (H3, W3), w3, b3, K)
    assert out3.shape == (B3, H3 * W3, C3)
    assert float(jnp.max(jnp.abs(out3 - ref3))) < 1e-4

    print("KERNEL_OK")
</pallas_src>

<mosaic_0001>
module attributes {stable_mosaic.version = 11 : i64} {
  func.func @_dwconv_kernel_simple(%arg0: i32, %arg1: i32, %arg2: memref<1x16x16x4xf32, #tpu.memory_space<vmem>>, %arg3: memref<25x4xf32, #tpu.memory_space<vmem>>, %arg4: memref<1x4xf32, #tpu.memory_space<vmem>>, %arg5: memref<1x16x16x4xf32, #tpu.memory_space<vmem>>, %arg6: memref<20x26x4xf32, #tpu.memory_space<vmem>>) attributes {dimension_semantics = [#tpu.dimension_semantics<parallel>, #tpu.dimension_semantics<parallel>], iteration_bounds = array<i64: 2, 1>, scalar_prefetch = 0 : i64, scratch_operands = 1 : i64, tpu.core_type = #tpu.core_type<tc>, window_params = [{transform_indices = @transform_0, window_bounds = array<i64: 1, 16, 16, 4>}, {transform_indices = @transform_1, window_bounds = array<i64: 25, 4>}, {transform_indices = @transform_2, window_bounds = array<i64: 1, 4>}, {transform_indices = @transform_3, window_bounds = array<i64: 1, 16, 16, 4>}]} {
    %cst = arith.constant 0.000000e+00 : f32
    %0 = vector.broadcast %cst : f32 to vector<20x8x4xf32>
    %c0 = arith.constant 0 : index
    %c0_0 = arith.constant 0 : index
    %c0_1 = arith.constant 0 : index
    %1 = vector.load %arg6[%c0, %c0_0, %c0_1] : memref<20x26x4xf32, #tpu.memory_space<vmem>>, vector<20x8x4xf32>
    tpu.vector_store %arg6[%c0, %c0_0, %c0_1], %0 {strides = array<i32>} : memref<20x26x4xf32, #tpu.memory_space<vmem>>, vector<20x8x4xf32>,
    %cst_2 = arith.constant 0.000000e+00 : f32
    %2 = vector.broadcast %cst_2 : f32 to vector<20x2x4xf32>
    %c0_3 = arith.constant 0 : index
    %c24 = arith.constant 24 : index
    %c0_4 = arith.constant 0 : index
    %3 = vector.load %arg6[%c0_3, %c24, %c0_4] : memref<20x26x4xf32, #tpu.memory_space<vmem>>, vector<20x2x4xf32>
    tpu.vector_store %arg6[%c0_3, %c24, %c0_4], %2 {strides = array<i32>} : memref<20x26x4xf32, #tpu.memory_space<vmem>>, vector<20x2x4xf32>,
    %cst_5 = arith.constant 0.000000e+00 : f32
    %4 = vector.broadcast %cst_5 : f32 to vector<2x16x4xf32>
    %c0_6 = arith.constant 0 : index
    %c8 = arith.constant 8 : index
    %c0_7 = arith.constant 0 : index
    %5 = vector.load %arg6[%c0_6, %c8, %c0_7] : memref<20x26x4xf32, #tpu.memory_space<vmem>>, vector<2x16x4xf32>
    tpu.vector_store %arg6[%c0_6, %c8, %c0_7], %4 {strides = array<i32>} : memref<20x26x4xf32, #tpu.memory_space<vmem>>, vector<2x16x4xf32>,
    %cst_8 = arith.constant 0.000000e+00 : f32
    %6 = vector.broadcast %cst_8 : f32 to vector<2x16x4xf32>
    %c18 = arith.constant 18 : index
    %c8_9 = arith.constant 8 : index
    %c0_10 = arith.constant 0 : index
    %7 = vector.load %arg6[%c18, %c8_9, %c0_10] : memref<20x26x4xf32, #tpu.memory_space<vmem>>, vector<2x16x4xf32>
    tpu.vector_store %arg6[%c18, %c8_9, %c0_10], %6 {strides = array<i32>} : memref<20x26x4xf32, #tpu.memory_space<vmem>>, vector<2x16x4xf32>,
    %c0_11 = arith.constant 0 : index
    %c0_12 = arith.constant 0 : index
    %c0_13 = arith.constant 0 : index
    %c0_14 = arith.constant 0 : index
    %8 = vector.load %arg2[%c0_11, %c0_12, %c0_13, %c0_14] : memref<1x16x16x4xf32, #tpu.memory_space<vmem>>, vector<1x16x16x4xf32>
    %9 = vector.shape_cast %8 : vector<1x16x16x4xf32> to vector<16x16x4xf32>
    %c2 = arith.constant 2 : index
    %c8_15 = arith.constant 8 : index
    %c0_16 = arith.constant 0 : index
    %10 = vector.load %arg6[%c2, %c8_15, %c0_16] : memref<20x26x4xf32, #tpu.memory_space<vmem>>, vector<16x16x4xf32>
    tpu.vector_store %arg6[%c2, %c8_15, %c0_16], %9 {strides = array<i32>} : memref<20x26x4xf32, #tpu.memory_space<vmem>>, vector<16x16x4xf32>,
    %c0_17 = arith.constant 0 : index
    %c0_18 = arith.constant 0 : index
    %11 = vector.load %arg4[%c0_17, %c0_18] : memref<1x4xf32, #tpu.memory_space<vmem>>, vector<1x4xf32>
    %12 = vector.shape_cast %11 : vector<1x4xf32> to vector<4xf32>
    %13 = vector.shape_cast %12 : vector<4xf32> to vector<1x1x4xf32>
    %14 = vector.broadcast %13 : vector<1x1x4xf32> to vector<16x16x4xf32>
    %c0_19 = arith.constant 0 : index
    %c6 = arith.constant 6 : index
    %c0_20 = arith.constant 0 : index
    %15 = vector.load %arg6[%c0_19, %c6, %c0_20] : memref<20x26x4xf32, #tpu.memory_space<vmem>>, vector<20x16x4xf32>
    %c0_21 = arith.constant 0 : index
    %c0_22 = arith.constant 0 : index
    %16 = vector.load %arg3[%c0_21, %c0_22] : memref<25x4xf32, #tpu.memory_space<vmem>>, vector<1x4xf32>
    %17 = vector.shape_cast %16 : vector<1x4xf32> to vector<4xf32>
    %18 = vector.extract_strided_slice %15 {offsets = [0, 0, 0], sizes = [16, 16, 4], strides = [1, 1, 1]} : vector<20x16x4xf32> to vector<16x16x4xf32>
    %19 = vector.shape_cast %17 : vector<4xf32> to vector<1x1x4xf32>
    %20 = vector.broadcast %19 : vector<1x1x4xf32> to vector<16x16x4xf32>
    %21 = arith.mulf %18, %20 : vector<16x16x4xf32>
    %22 = arith.addf %14, %21 : vector<16x16x4xf32>
    %c5 = arith.constant 5 : index
    %c0_23 = arith.constant 0 : index
    %23 = vector.load %arg3[%c5, %c0_23] : memref<25x4xf32, #tpu.memory_space<vmem>>, vector<1x4xf32>
    %24 = vector.shape_cast %23 : vector<1x4xf32> to vector<4xf32>
    %25 = vector.extract_strided_slice %15 {offsets = [1, 0, 0], sizes = [16, 16, 4], strides = [1, 1, 1]} : vector<20x16x4xf32> to vector<16x16x4xf32>
    %26 = vector.shape_cast %24 : vector<4xf32> to vector<1x1x4xf32>
    %27 = vector.broadcast %26 : vector<1x1x4xf32> to vector<16x16x4xf32>
    %28 = arith.mulf %25, %27 : vector<16x16x4xf32>
    %29 = arith.addf %22, %28 : vector<16x16x4xf32>
    %c10 = arith.constant 10 : index
    %c0_24 = arith.constant 0 : index
    %30 = vector.load %arg3[%c10, %c0_24] : memref<25x4xf32, #tpu.memory_space<vmem>>, vector<1x4xf32>
    %31 = vector.shape_cast %30 : vector<1x4xf32> to vector<4xf32>
    %32 = vector.extract_strided_slice %15 {offsets = [2, 0, 0], sizes = [16, 16, 4], strides = [1, 1, 1]} : vector<20x16x4xf32> to vector<16x16x4xf32>
    %33 = vector.shape_cast %31 : vector<4xf32> to vector<1x1x4xf32>
    %34 = vector.broadcast %33 : vector<1x1x4xf32> to vector<16x16x4xf32>
    %35 = arith.mulf %32, %34 : vector<16x16x4xf32>
    %36 = arith.addf %29, %35 : vector<16x16x4xf32>
    %c15 = arith.constant 15 : index
    %c0_25 = arith.constant 0 : index
    %37 = vector.load %arg3[%c15, %c0_25] : memref<25x4xf32, #tpu.memory_space<vmem>>, vector<1x4xf32>
    %38 = vector.shape_cast %37 : vector<1x4xf32> to vector<4xf32>
    %39 = vector.extract_strided_slice %15 {offsets = [3, 0, 0], sizes = [16, 16, 4], strides = [1, 1, 1]} : vector<20x16x4xf32> to vector<16x16x4xf32>
    %40 = vector.shape_cast %38 : vector<4xf32> to vector<1x1x4xf32>
    %41 = vector.broadcast %40 : vector<1x1x4xf32> to vector<16x16x4xf32>
    %42 = arith.mulf %39, %41 : vector<16x16x4xf32>
    %43 = arith.addf %36, %42 : vector<16x16x4xf32>
    %c20 = arith.constant 20 : index
    %c0_26 = arith.constant 0 : index
    %44 = vector.load %arg3[%c20, %c0_26] : memref<25x4xf32, #tpu.memory_space<vmem>>, vector<1x4xf32>
    %45 = vector.shape_cast %44 : vector<1x4xf32> to vector<4xf32>
    %46 = vector.extract_strided_slice %15 {offsets = [4, 0, 0], sizes = [16, 16, 4], strides = [1, 1, 1]} : vector<20x16x4xf32> to vector<16x16x4xf32>
    %47 = vector.shape_cast %45 : vector<4xf32> to vector<1x1x4xf32>
    %48 = vector.broadcast %47 : vector<1x1x4xf32> to vector<16x16x4xf32>
    %49 = arith.mulf %46, %48 : vector<16x16x4xf32>
    %50 = arith.addf %43, %49 : vector<16x16x4xf32>
    %c0_27 = arith.constant 0 : index
    %c7 = arith.constant 7 : index
    %c0_28 = arith.constant 0 : index
    %51 = vector.load %arg6[%c0_27, %c7, %c0_28] : memref<20x26x4xf32, #tpu.memory_space<vmem>>, vector<20x16x4xf32>
    %c1 = arith.constant 1 : index
    %c0_29 = arith.constant 0 : index
    %52 = vector.load %arg3[%c1, %c0_29] : memref<25x4xf32, #tpu.memory_space<vmem>>, vector<1x4xf32>
    %53 = vector.shape_cast %52 : vector<1x4xf32> to vector<4xf32>
    %54 = vector.extract_strided_slice %51 {offsets = [0, 0, 0], sizes = [16, 16, 4], strides = [1, 1, 1]} : vector<20x16x4xf32> to vector<16x16x4xf32>
    %55 = vector.shape_cast %53 : vector<4xf32> to vector<1x1x4xf32>
    %56 = vector.broadcast %55 : vector<1x1x4xf32> to vector<16x16x4xf32>
    %57 = arith.mulf %54, %56 : vector<16x16x4xf32>
    %58 = arith.addf %50, %57 : vector<16x16x4xf32>
    %c6_30 = arith.constant 6 : index
    %c0_31 = arith.constant 0 : index
    %59 = vector.load %arg3[%c6_30, %c0_31] : memref<25x4xf32, #tpu.memory_space<vmem>>, vector<1x4xf32>
    %60 = vector.shape_cast %59 : vector<1x4xf32> to vector<4xf32>
    %61 = vector.extract_strided_slice %51 {offsets = [1, 0, 0], sizes = [16, 16, 4], strides = [1, 1, 1]} : vector<20x16x4xf32> to vector<16x16x4xf32>
    %62 = vector.shape_cast %60 : vector<4xf32> to vector<1x1x4xf32>
    %63 = vector.broadcast %62 : vector<1x1x4xf32> to vector<16x16x4xf32>
    %64 = arith.mulf %61, %63 : vector<16x16x4xf32>
    %65 = arith.addf %58, %64 : vector<16x16x4xf32>
    %c11 = arith.constant 11 : index
    %c0_32 = arith.constant 0 : index
    %66 = vector.load %arg3[%c11, %c0_32] : memref<25x4xf32, #tpu.memory_space<vmem>>, vector<1x4xf32>
    %67 = vector.shape_cast %66 : vector<1x4xf32> to vector<4xf32>
    %68 = vector.extract_strided_slice %51 {offsets = [2, 0, 0], sizes = [16, 16, 4], strides = [1, 1, 1]} : vector<20x16x4xf32> to vector<16x16x4xf32>
    %69 = vector.shape_cast %67 : vector<4xf32> to vector<1x1x4xf32>
    %70 = vector.broadcast %69 : vector<1x1x4xf32> to vector<16x16x4xf32>
    %71 = arith.mulf %68, %70 : vector<16x16x4xf32>
    %72 = arith.addf %65, %71 : vector<16x16x4xf32>
    %c16 = arith.constant 16 : index
    %c0_33 = arith.constant 0 : index
    %73 = vector.load %arg3[%c16, %c0_33] : memref<25x4xf32, #tpu.memory_space<vmem>>, vector<1x4xf32>
    %74 = vector.shape_cast %73 : vector<1x4xf32> to vector<4xf32>
    %75 = vector.extract_strided_slice %51 {offsets = [3, 0, 0], sizes = [16, 16, 4], strides = [1, 1, 1]} : vector<20x16x4xf32> to vector<16x16x4xf32>
    %76 = vector.shape_cast %74 : vector<4xf32> to vector<1x1x4xf32>
    %77 = vector.broadcast %76 : vector<1x1x4xf32> to vector<16x16x4xf32>
    %78 = arith.mulf %75, %77 : vector<16x16x4xf32>
    %79 = arith.addf %72, %78 : vector<16x16x4xf32>
    %c21 = arith.constant 21 : index
    %c0_34 = arith.constant 0 : index
    %80 = vector.load %arg3[%c21, %c0_34] : memref<25x4xf32, #tpu.memory_space<vmem>>, vector<1x4xf32>
    %81 = vector.shape_cast %80 : vector<1x4xf32> to vector<4xf32>
    %82 = vector.extract_strided_slice %51 {offsets = [4, 0, 0], sizes = [16, 16, 4], strides = [1, 1, 1]} : vector<20x16x4xf32> to vector<16x16x4xf32>
    %83 = vector.shape_cast %81 : vector<4xf32> to vector<1x1x4xf32>
    %84 = vector.broadcast %83 : vector<1x1x4xf32> to vector<16x16x4xf32>
    %85 = arith.mulf %82, %84 : vector<16x16x4xf32>
    %86 = arith.addf %79, %85 : vector<16x16x4xf32>
    %c0_35 = arith.constant 0 : index
    %c8_36 = arith.constant 8 : index
    %c0_37 = arith.constant 0 : index
    %87 = vector.load %arg6[%c0_35, %c8_36, %c0_37] : memref<20x26x4xf32, #tpu.memory_space<vmem>>, vector<20x16x4xf32>
    %c2_38 = arith.constant 2 : index
    %c0_39 = arith.constant 0 : index
    %88 = vector.load %arg3[%c2_38, %c0_39] : memref<25x4xf32, #tpu.memory_space<vmem>>, vector<1x4xf32>
    %89 = vector.shape_cast %88 : vector<1x4xf32> to vector<4xf32>
    %90 = vector.extract_strided_slice %87 {offsets = [0, 0, 0], sizes = [16, 16, 4], strides = [1, 1, 1]} : vector<20x16x4xf32> to vector<16x16x4xf32>
    %91 = vector.shape_cast %89 : vector<4xf32> to vector<1x1x4xf32>
    %92 = vector.broadcast %91 : vector<1x1x4xf32> to vector<16x16x4xf32>
    %93 = arith.mulf %90, %92 : vector<16x16x4xf32>
    %94 = arith.addf %86, %93 : vector<16x16x4xf32>
    %c7_40 = arith.constant 7 : index
    %c0_41 = arith.constant 0 : index
    %95 = vector.load %arg3[%c7_40, %c0_41] : memref<25x4xf32, #tpu.memory_space<vmem>>, vector<1x4xf32>
    %96 = vector.shape_cast %95 : vector<1x4xf32> to vector<4xf32>
    %97 = vector.extract_strided_slice %87 {offsets = [1, 0, 0], sizes = [16, 16, 4], strides = [1, 1, 1]} : vector<20x16x4xf32> to vector<16x16x4xf32>
    %98 = vector.shape_cast %96 : vector<4xf32> to vector<1x1x4xf32>
    %99 = vector.broadcast %98 : vector<1x1x4xf32> to vector<16x16x4xf32>
    %100 = arith.mulf %97, %99 : vector<16x16x4xf32>
    %101 = arith.addf %94, %100 : vector<16x16x4xf32>
    %c12 = arith.constant 12 : index
    %c0_42 = arith.constant 0 : index
    %102 = vector.load %arg3[%c12, %c0_42] : memref<25x4xf32, #tpu.memory_space<vmem>>, vector<1x4xf32>
    %103 = vector.shape_cast %102 : vector<1x4xf32> to vector<4xf32>
    %104 = vector.extract_strided_slice %87 {offsets = [2, 0, 0], sizes = [16, 16, 4], strides = [1, 1, 1]} : vector<20x16x4xf32> to vector<16x16x4xf32>
    %105 = vector.shape_cast %103 : vector<4xf32> to vector<1x1x4xf32>
    %106 = vector.broadcast %105 : vector<1x1x4xf32> to vector<16x16x4xf32>
    %107 = arith.mulf %104, %106 : vector<16x16x4xf32>
    %108 = arith.addf %101, %107 : vector<16x16x4xf32>
    %c17 = arith.constant 17 : index
    %c0_43 = arith.constant 0 : index
    %109 = vector.load %arg3[%c17, %c0_43] : memref<25x4xf32, #tpu.memory_space<vmem>>, vector<1x4xf32>
    %110 = vector.shape_cast %109 : vector<1x4xf32> to vector<4xf32>
    %111 = vector.extract_strided_slice %87 {offsets = [3, 0, 0], sizes = [16, 16, 4], strides = [1, 1, 1]} : vector<20x16x4xf32> to vector<16x16x4xf32>
    %112 = vector.shape_cast %110 : vector<4xf32> to vector<1x1x4xf32>
    %113 = vector.broadcast %112 : vector<1x1x4xf32> to vector<16x16x4xf32>
    %114 = arith.mulf %111, %113 : vector<16x16x4xf32>
    %115 = arith.addf %108, %114 : vector<16x16x4xf32>
    %c22 = arith.constant 22 : index
    %c0_44 = arith.constant 0 : index
    %116 = vector.load %arg3[%c22, %c0_44] : memref<25x4xf32, #tpu.memory_space<vmem>>, vector<1x4xf32>
    %117 = vector.shape_cast %116 : vector<1x4xf32> to vector<4xf32>
    %118 = vector.extract_strided_slice %87 {offsets = [4, 0, 0], sizes = [16, 16, 4], strides = [1, 1, 1]} : vector<20x16x4xf32> to vector<16x16x4xf32>
    %119 = vector.shape_cast %117 : vector<4xf32> to vector<1x1x4xf32>
    %120 = vector.broadcast %119 : vector<1x1x4xf32> to vector<16x16x4xf32>
    %121 = arith.mulf %118, %120 : vector<16x16x4xf32>
    %122 = arith.addf %115, %121 : vector<16x16x4xf32>
    %c0_45 = arith.constant 0 : index
    %c9 = arith.constant 9 : index
    %c0_46 = arith.constant 0 : index
    %123 = vector.load %arg6[%c0_45, %c9, %c0_46] : memref<20x26x4xf32, #tpu.memory_space<vmem>>, vector<20x16x4xf32>
    %c3 = arith.constant 3 : index
    %c0_47 = arith.constant 0 : index
    %124 = vector.load %arg3[%c3, %c0_47] : memref<25x4xf32, #tpu.memory_space<vmem>>, vector<1x4xf32>
    %125 = vector.shape_cast %124 : vector<1x4xf32> to vector<4xf32>
    %126 = vector.extract_strided_slice %123 {offsets = [0, 0, 0], sizes = [16, 16, 4], strides = [1, 1, 1]} : vector<20x16x4xf32> to vector<16x16x4xf32>
    %127 = vector.shape_cast %125 : vector<4xf32> to vector<1x1x4xf32>
    %128 = vector.broadcast %127 : vector<1x1x4xf32> to vector<16x16x4xf32>
    %129 = arith.mulf %126, %128 : vector<16x16x4xf32>
    %130 = arith.addf %122, %129 : vector<16x16x4xf32>
    %c8_48 = arith.constant 8 : index
    %c0_49 = arith.constant 0 : index
    %131 = vector.load %arg3[%c8_48, %c0_49] : memref<25x4xf32, #tpu.memory_space<vmem>>, vector<1x4xf32>
    %132 = vector.shape_cast %131 : vector<1x4xf32> to vector<4xf32>
    %133 = vector.extract_strided_slice %123 {offsets = [1, 0, 0], sizes = [16, 16, 4], strides = [1, 1, 1]} : vector<20x16x4xf32> to vector<16x16x4xf32>
    %134 = vector.shape_cast %132 : vector<4xf32> to vector<1x1x4xf32>
    %135 = vector.broadcast %134 : vector<1x1x4xf32> to vector<16x16x4xf32>
    %136 = arith.mulf %133, %135 : vector<16x16x4xf32>
    %137 = arith.addf %130, %136 : vector<16x16x4xf32>
    %c13 = arith.constant 13 : index
    %c0_50 = arith.constant 0 : index
    %138 = vector.load %arg3[%c13, %c0_50] : memref<25x4xf32, #tpu.memory_space<vmem>>, vector<1x4xf32>
    %139 = vector.shape_cast %138 : vector<1x4xf32> to vector<4xf32>
    %140 = vector.extract_strided_slice %123 {offsets = [2, 0, 0], sizes = [16, 16, 4], strides = [1, 1, 1]} : vector<20x16x4xf32> to vector<16x16x4xf32>
    %141 = vector.shape_cast %139 : vector<4xf32> to vector<1x1x4xf32>
    %142 = vector.broadcast %141 : vector<1x1x4xf32> to vector<16x16x4xf32>
    %143 = arith.mulf %140, %142 : vector<16x16x4xf32>
    %144 = arith.addf %137, %143 : vector<16x16x4xf32>
    %c18_51 = arith.constant 18 : index
    %c0_52 = arith.constant 0 : index
    %145 = vector.load %arg3[%c18_51, %c0_52] : memref<25x4xf32, #tpu.memory_space<vmem>>, vector<1x4xf32>
    %146 = vector.shape_cast %145 : vector<1x4xf32> to vector<4xf32>
    %147 = vector.extract_strided_slice %123 {offsets = [3, 0, 0], sizes = [16, 16, 4], strides = [1, 1, 1]} : vector<20x16x4xf32> to vector<16x16x4xf32>
    %148 = vector.shape_cast %146 : vector<4xf32> to vector<1x1x4xf32>
    %149 = vector.broadcast %148 : vector<1x1x4xf32> to vector<16x16x4xf32>
    %150 = arith.mulf %147, %149 : vector<16x16x4xf32>
    %151 = arith.addf %144, %150 : vector<16x16x4xf32>
    %c23 = arith.constant 23 : index
    %c0_53 = arith.constant 0 : index
    %152 = vector.load %arg3[%c23, %c0_53] : memref<25x4xf32, #tpu.memory_space<vmem>>, vector<1x4xf32>
    %153 = vector.shape_cast %152 : vector<1x4xf32> to vector<4xf32>
    %154 = vector.extract_strided_slice %123 {offsets = [4, 0, 0], sizes = [16, 16, 4], strides = [1, 1, 1]} : vector<20x16x4xf32> to vector<16x16x4xf32>
    %155 = vector.shape_cast %153 : vector<4xf32> to vector<1x1x4xf32>
    %156 = vector.broadcast %155 : vector<1x1x4xf32> to vector<16x16x4xf32>
    %157 = arith.mulf %154, %156 : vector<16x16x4xf32>
    %158 = arith.addf %151, %157 : vector<16x16x4xf32>
    %c0_54 = arith.constant 0 : index
    %c10_55 = arith.constant 10 : index
    %c0_56 = arith.constant 0 : index
    %159 = vector.load %arg6[%c0_54, %c10_55, %c0_56] : memref<20x26x4xf32, #tpu.memory_space<vmem>>, vector<20x16x4xf32>
    %c4 = arith.constant 4 : index
    %c0_57 = arith.constant 0 : index
    %160 = vector.load %arg3[%c4, %c0_57] : memref<25x4xf32, #tpu.memory_space<vmem>>, vector<1x4xf32>
    %161 = vector.shape_cast %160 : vector<1x4xf32> to vector<4xf32>
    %162 = vector.extract_strided_slice %159 {offsets = [0, 0, 0], sizes = [16, 16, 4], strides = [1, 1, 1]} : vector<20x16x4xf32> to vector<16x16x4xf32>
    %163 = vector.shape_cast %161 : vector<4xf32> to vector<1x1x4xf32>
    %164 = vector.broadcast %163 : vector<1x1x4xf32> to vector<16x16x4xf32>
    %165 = arith.mulf %162, %164 : vector<16x16x4xf32>
    %166 = arith.addf %158, %165 : vector<16x16x4xf32>
    %c9_58 = arith.constant 9 : index
    %c0_59 = arith.constant 0 : index
    %167 = vector.load %arg3[%c9_58, %c0_59] : memref<25x4xf32, #tpu.memory_space<vmem>>, vector<1x4xf32>
    %168 = vector.shape_cast %167 : vector<1x4xf32> to vector<4xf32>
    %169 = vector.extract_strided_slice %159 {offsets = [1, 0, 0], sizes = [16, 16, 4], strides = [1, 1, 1]} : vector<20x16x4xf32> to vector<16x16x4xf32>
    %170 = vector.shape_cast %168 : vector<4xf32> to vector<1x1x4xf32>
    %171 = vector.broadcast %170 : vector<1x1x4xf32> to vector<16x16x4xf32>
    %172 = arith.mulf %169, %171 : vector<16x16x4xf32>
    %173 = arith.addf %166, %172 : vector<16x16x4xf32>
    %c14 = arith.constant 14 : index
    %c0_60 = arith.constant 0 : index
    %174 = vector.load %arg3[%c14, %c0_60] : memref<25x4xf32, #tpu.memory_space<vmem>>, vector<1x4xf32>
    %175 = vector.shape_cast %174 : vector<1x4xf32> to vector<4xf32>
    %176 = vector.extract_strided_slice %159 {offsets = [2, 0, 0], sizes = [16, 16, 4], strides = [1, 1, 1]} : vector<20x16x4xf32> to vector<16x16x4xf32>
    %177 = vector.shape_cast %175 : vector<4xf32> to vector<1x1x4xf32>
    %178 = vector.broadcast %177 : vector<1x1x4xf32> to vector<16x16x4xf32>
    %179 = arith.mulf %176, %178 : vector<16x16x4xf32>
    %180 = arith.addf %173, %179 : vector<16x16x4xf32>
    %c19 = arith.constant 19 : index
    %c0_61 = arith.constant 0 : index
    %181 = vector.load %arg3[%c19, %c0_61] : memref<25x4xf32, #tpu.memory_space<vmem>>, vector<1x4xf32>
    %182 = vector.shape_cast %181 : vector<1x4xf32> to vector<4xf32>
    %183 = vector.extract_strided_slice %159 {offsets = [3, 0, 0], sizes = [16, 16, 4], strides = [1, 1, 1]} : vector<20x16x4xf32> to vector<16x16x4xf32>
    %184 = vector.shape_cast %182 : vector<4xf32> to vector<1x1x4xf32>
    %185 = vector.broadcast %184 : vector<1x1x4xf32> to vector<16x16x4xf32>
    %186 = arith.mulf %183, %185 : vector<16x16x4xf32>
    %187 = arith.addf %180, %186 : vector<16x16x4xf32>
    %c24_62 = arith.constant 24 : index
    %c0_63 = arith.constant 0 : index
    %188 = vector.load %arg3[%c24_62, %c0_63] : memref<25x4xf32, #tpu.memory_space<vmem>>, vector<1x4xf32>
    %189 = vector.shape_cast %188 : vector<1x4xf32> to vector<4xf32>
    %190 = vector.extract_strided_slice %159 {offsets = [4, 0, 0], sizes = [16, 16, 4], strides = [1, 1, 1]} : vector<20x16x4xf32> to vector<16x16x4xf32>
    %191 = vector.shape_cast %189 : vector<4xf32> to vector<1x1x4xf32>
    %192 = vector.broadcast %191 : vector<1x1x4xf32> to vector<16x16x4xf32>
    %193 = arith.mulf %190, %192 : vector<16x16x4xf32>
    %194 = arith.addf %187, %193 : vector<16x16x4xf32>
    %cst_64 = arith.constant 5.000000e-01 : f32
    %195 = vector.broadcast %cst_64 : f32 to vector<16x16x4xf32>
    %196 = arith.mulf %195, %194 : vector<16x16x4xf32>
    %cst_65 = arith.constant 0.707106769 : f32
    %197 = vector.broadcast %cst_65 : f32 to vector<16x16x4xf32>
    %198 = arith.mulf %194, %197 : vector<16x16x4xf32>
    %199 = math.erf %198 : vector<16x16x4xf32>
    %cst_66 = arith.constant 1.000000e+00 : f32
    %200 = vector.broadcast %cst_66 : f32 to vector<16x16x4xf32>
    %201 = arith.addf %200, %199 : vector<16x16x4xf32>
    %202 = arith.mulf %196, %201 : vector<16x16x4xf32>
    %c0_67 = arith.constant 0 : index
    %c0_68 = arith.constant 0 : index
    %c0_69 = arith.constant 0 : index
    %c0_70 = arith.constant 0 : index
    %203 = vector.load %arg5[%c0_67, %c0_68, %c0_69, %c0_70] : memref<1x16x16x4xf32, #tpu.memory_space<vmem>>, vector<1x16x16x4xf32>
    %204 = vector.shape_cast %203 : vector<1x16x16x4xf32> to vector<16x16x4xf32>
    %205 = vector.shape_cast %202 : vector<16x16x4xf32> to vector<1x16x16x4xf32>
    tpu.vector_store %arg5[%c0_67, %c0_68, %c0_69, %c0_70], %205 {strides = array<i32>} : memref<1x16x16x4xf32, #tpu.memory_space<vmem>>, vector<1x16x16x4xf32>,
    return
  }
  func.func @transform_0(%arg0: i32, %arg1: i32) -> (i32, i32, i32, i32) {
    %c0_i32 = arith.constant 0 : i32
    %c0_i32_0 = arith.constant 0 : i32
    %c0_i32_1 = arith.constant 0 : i32
    return %arg0, %c0_i32, %c0_i32_0, %arg1 : i32, i32, i32, i32
  }
  func.func @transform_1(%arg0: i32, %arg1: i32) -> (i32, i32) {
    %c0_i32 = arith.constant 0 : i32
    %c0_i32_0 = arith.constant 0 : i32
    return %c0_i32, %arg1 : i32, i32
  }
  func.func @transform_2(%arg0: i32, %arg1: i32) -> (i32, i32) {
    %c0_i32 = arith.constant 0 : i32
    %c0_i32_0 = arith.constant 0 : i32
    return %c0_i32, %arg1 : i32, i32
  }
  func.func @transform_3(%arg0: i32, %arg1: i32) -> (i32, i32, i32, i32) {
    %c0_i32 = arith.constant 0 : i32
    %c0_i32_0 = arith.constant 0 : i32
    %c0_i32_1 = arith.constant 0 : i32
    return %arg0, %c0_i32, %c0_i32_0, %arg1 : i32, i32, i32, i32
  }
}

</mosaic_0001>

<bundles_post_ra>
// kernel: tpu_custom_call.1
= control target key start
LH: loop header
LB: loop body
LE: loop exit
PB: predicated region body
PF: predicated region fallthrough
CT: control target
= control target key end

     0   :  { %s2831_s12 = smov 0   ;;  %s2833_s13 = smov 0   ;;  %s5742_s0 = inlined_call_operand.vmem [shape: f32[2,16,16,4], index: 0, kind: input, shape index: {}]   ;;  %s5743_s1 = inlined_call_operand.vmem [shape: f32[25,4], index: 1, kind: input, shape index: {}]   ;;  %s5744_s2 = inlined_call_operand.vmem [shape: f32[1,4], index: 2, kind: input, shape index: {}]   ;;  %s5745_s3 = inlined_call_operand.vmem [shape: f32[2,16,16,4], index: 3, kind: output, shape index: {}]  }
   0x1   :  { %s2835_s14 = smov 0  }
   0x2 LB: > { %s25_s15 = sadd.s32 1, %s2804_s13  ;;  %p2590_p0 = scmp.ge.s32.totalorder %s2808_s14, 1  ;;  %s2808_s14 = sphi %s2835_s14, %s13_s14   ;;  %s2804_s13 = sphi %s2833_s13, %s6217_s13   ;;  %s2800_s12 = sphi %s2831_s12, %s6216_s12  }
   0x3   : > { %p27_p1 = scmp.ge.s32.totalorder %s25_s15, 2  ;;  %p173_p2 = scmp.lt.s32.totalorder %s2808_s14, 3 }
   0x5   : > { %s6219_s15 = smov (%p27_p1, %s25_s15), 0  ;;  %p174_p3 = pnand %p2590_p0, %p173_p2 }
   0x7   : > { %177 = sbr.rel (%p174_p3) target bundleno = 528 (0x210), region = 32 }
   0xe   : > { %vm233_vm0 = vcmask 31744   ;;  %v2810_v0 = vmov 0.0   ;;  %vm254_vm1 = vcmask 25600   ;;  %p210_p4 = scmp.lt.s32.totalorder %s2800_s12, 1  ;;  %v2909_v3 = vld [vmem:[%s5743_s1] ss:$0 sm:$0xff] }
   0xf   : > { %234 = vst.msk [vmem:[#allocation2] sm:$0xff] %vm233_vm0, %v2810_v0  ;;  %235 = vst.msk [vmem:[#allocation2 + $0x20] sm:$0xff] %vm233_vm0, %v2810_v0  ;;  %v2921_v4 = vld [vmem:[%s5744_s2] ss:$0 sm:$0xff]  ;;  %v2926_v5 = vld [vmem:[%s5743_s1 + $0x5] ss:$0 sm:$0xff] }
  0x10   : > { %236 = vst.msk [vmem:[#allocation2 + $0x40] sm:$0xff] %vm233_vm0, %v2810_v0  ;;  %237 = vst.msk [vmem:[#allocation2 + $0x60] sm:$0xff] %vm233_vm0, %v2810_v0  ;;  %s6221_s12 = smov (!%p210_p4, %s2800_s12), 1  ;;  %v2942_v18 = vld [vmem:[%s5743_s1 + $0x1] ss:$0 sm:$0xff] }
  0x11   : > { %238 = vst.msk [vmem:[#allocation2 + $0x80] sm:$0xff] %vm233_vm0, %v2810_v0  ;;  %239 = vst.msk [vmem:[#allocation2 + $0xa0] sm:$0xff] %vm233_vm0, %v2810_v0  ;;  %s2623_s16 = sshll.u32 %s6221_s12, 8  ;;  %v2955_v26 = vld [vmem:[%s5743_s1 + $0xf] ss:$0 sm:$0xff] }
  0x12   : > { %240 = vst.msk [vmem:[#allocation2 + $0xc0] sm:$0xff] %vm233_vm0, %v2810_v0  ;;  %241 = vst.msk [vmem:[#allocation2 + $0xe0] sm:$0xff] %vm233_vm0, %v2810_v0  ;;  %s2916_s21 = scalar_lea.vmem %s5742_s0, %s2623_s16  ;;  %v2970_v34 = vld [vmem:[%s5743_s1 + $0x6] ss:$0 sm:$0xff]  ;;  %v2975_v37 = vld [vmem:[%s5743_s1 + $0x2] ss:$0 sm:$0xff]  ;;  %s4419_s9 = scalar_lea.vmem %s5745_s3, %s2623_s16 }
  0x13   : > { %242 = vst.msk [vmem:[#allocation2 + $0x100] sm:$0xff] %vm233_vm0, %v2810_v0  ;;  %243 = vst.msk [vmem:[#allocation2 + $0x120] sm:$0xff] %vm233_vm0, %v2810_v0  ;;  %v284_v10 = vld [vmem:[%s2916_s21] sm:$0xff]  ;;  %v285_v13 = vld [vmem:[%s2916_s21 + $0x8] sm:$0xff] }
  0x14   : > { %244 = vst.msk [vmem:[#allocation2 + $0x140] sm:$0xff] %vm233_vm0, %v2810_v0  ;;  %245 = vst.msk [vmem:[#allocation2 + $0x160] sm:$0xff] %vm233_vm0, %v2810_v0  ;;  %v286_v14 = vld [vmem:[%s2916_s21 + $0x10] sm:$0xff]  ;;  %v287_v15 = vld [vmem:[%s2916_s21 + $0x18] sm:$0xff] }
  0x15   : > { %246 = vst.msk [vmem:[#allocation2 + $0x180] sm:$0xff] %vm233_vm0, %v2810_v0  ;;  %247 = vst.msk [vmem:[#allocation2 + $0x1a0] sm:$0xff] %vm233_vm0, %v2810_v0  ;;  %v288_v19 = vld [vmem:[%s2916_s21 + $0x20] sm:$0xff]  ;;  %v289_v20 = vld [vmem:[%s2916_s21 + $0x28] sm:$0xff] }
  0x16   : > { %248 = vst.msk [vmem:[#allocation2 + $0x1c0] sm:$0xff] %vm233_vm0, %v2810_v0  ;;  %249 = vst.msk [vmem:[#allocation2 + $0x1e0] sm:$0xff] %vm233_vm0, %v2810_v0  ;;  %v290_v21 = vld [vmem:[%s2916_s21 + $0x30] sm:$0xff]  ;;  %v291_v27 = vld [vmem:[%s2916_s21 + $0x38] sm:$0xff] }
  0x17   : > { %250 = vst.msk [vmem:[#allocation2 + $0x200] sm:$0xff] %vm233_vm0, %v2810_v0  ;;  %251 = vst.msk [vmem:[#allocation2 + $0x220] sm:$0xff] %vm233_vm0, %v2810_v0  ;;  %v292_v28 = vld [vmem:[%s2916_s21 + $0x40] sm:$0xff]  ;;  %v293_v29 = vld [vmem:[%s2916_s21 + $0x48] sm:$0xff] }
  0x18   : > { %252 = vst.msk [vmem:[#allocation2 + $0x240] sm:$0xff] %vm233_vm0, %v2810_v0  ;;  %253 = vst.msk [vmem:[#allocation2 + $0x260] sm:$0xff] %vm233_vm0, %v2810_v0  ;;  %v294_v38 = vld [vmem:[%s2916_s21 + $0x50] sm:$0xff]  ;;  %v295_v39 = vld [vmem:[%s2916_s21 + $0x58] sm:$0xff] }
  0x19   : > { %275 = vst.msk [vmem:[#allocation2 + $0x8] sm:$0xff] %vm233_vm0, %v2810_v0  ;;  %276 = vst.msk [vmem:[#allocation2 + $0x10] sm:$0xff] %vm233_vm0, %v2810_v0  ;;  %v296_v40 = vld [vmem:[%s2916_s21 + $0x60] sm:$0xff]  ;;  %v297_v45 = vld [vmem:[%s2916_s21 + $0x68] sm:$0xff] }
  0x1a   : > { %277 = vst.msk [vmem:[#allocation2 + $0x28] sm:$0xff] %vm233_vm0, %v2810_v0  ;;  %278 = vst.msk [vmem:[#allocation2 + $0x30] sm:$0xff] %vm233_vm0, %v2810_v0  ;;  %v298_v46 = vld [vmem:[%s2916_s21 + $0x70] sm:$0xff]  ;;  %v299_v47 = vld [vmem:[%s2916_s21 + $0x78] sm:$0xff] }
  0x1b   : > { %280 = vst.msk [vmem:[#allocation2 + $0x248] sm:$0xff] %vm233_vm0, %v2810_v0  ;;  %281 = vst.msk [vmem:[#allocation2 + $0x250] sm:$0xff] %vm233_vm0, %v2810_v0  ;;  %v300_v50 = vld [vmem:[%s2916_s21 + $0x80] sm:$0xff]  ;;  %v301_v51 = vld [vmem:[%s2916_s21 + $0x88] sm:$0xff] }
  0x1c   : > { %282 = vst.msk [vmem:[#allocation2 + $0x268] sm:$0xff] %vm233_vm0, %v2810_v0  ;;  %283 = vst.msk [vmem:[#allocation2 + $0x270] sm:$0xff] %vm233_vm0, %v2810_v0  ;;  %v302_v52 = vld [vmem:[%s2916_s21 + $0x90] sm:$0xff]  ;;  %v303_v57 = vld [vmem:[%s2916_s21 + $0x98] sm:$0xff] }
  0x1d   : > { %255 = vst.msk [vmem:[#allocation2 + $0x18] sm:$0x3] %vm254_vm1, %v2810_v0  ;;  %256 = vst.msk [vmem:[#allocation2 + $0x38] sm:$0x3] %vm254_vm1, %v2810_v0  ;;  %v304_v58 = vld [vmem:[%s2916_s21 + $0xa0] sm:$0xff]  ;;  %v305_v59 = vld [vmem:[%s2916_s21 + $0xa8] sm:$0xff] }
  0x1e   : > { %257 = vst.msk [vmem:[#allocation2 + $0x58] sm:$0x3] %vm254_vm1, %v2810_v0  ;;  %258 = vst.msk [vmem:[#allocation2 + $0x78] sm:$0x3] %vm254_vm1, %v2810_v0 }
  0x1f   : > { %259 = vst.msk [vmem:[#allocation2 + $0x98] sm:$0x3] %vm254_vm1, %v2810_v0  ;;  %260 = vst.msk [vmem:[#allocation2 + $0xb8] sm:$0x3] %vm254_vm1, %v2810_v0 }
  0x20   : > { %261 = vst.msk [vmem:[#allocation2 + $0xd8] sm:$0x3] %vm254_vm1, %v2810_v0  ;;  %262 = vst.msk [vmem:[#allocation2 + $0xf8] sm:$0x3] %vm254_vm1, %v2810_v0  ;;  %v356_v1 = vld [vmem:[#allocation2 + $0x6] sm:$0xff]  ;;  %v357_v2 = vld [vmem:[#allocation2 + $0xe] sm:$0xff] }
  0x21   : > { %263 = vst.msk [vmem:[#allocation2 + $0x118] sm:$0x3] %vm254_vm1, %v2810_v0  ;;  %264 = vst.msk [vmem:[#allocation2 + $0x138] sm:$0x3] %vm254_vm1, %v2810_v0  ;;  %v358_v6 = vld [vmem:[#allocation2 + $0x26] sm:$0xff]  ;;  %v359_v7 = vld [vmem:[#allocation2 + $0x2e] sm:$0xff]  ;;  %v401_v8 = vmul.f32 %v2909_v3, %v356_v1  ;;  %v402_v9 = vmul.f32 %v2909_v3, %v357_v2 }
  0x22   : > { %265 = vst.msk [vmem:[#allocation2 + $0x158] sm:$0x3] %vm254_vm1, %v2810_v0  ;;  %266 = vst.msk [vmem:[#allocation2 + $0x178] sm:$0x3] %vm254_vm1, %v2810_v0  ;;  %v2931_v11 = vld [vmem:[#allocation2 + $0x246] sm:$0xff]  ;;  %v2933_v12 = vld [vmem:[#allocation2 + $0x24e] sm:$0xff]  ;;  %v403_v22 = vmul.f32 %v2909_v3, %v358_v6  ;;  %v404_v23 = vmul.f32 %v2909_v3, %v359_v7  ;;  %v470_v32 = vmul.f32 %v2926_v5, %v358_v6 }
  0x23   : > { %267 = vst.msk [vmem:[#allocation2 + $0x198] sm:$0x3] %vm254_vm1, %v2810_v0  ;;  %268 = vst.msk [vmem:[#allocation2 + $0x1b8] sm:$0x3] %vm254_vm1, %v2810_v0  ;;  %v741_v16 = vld [vmem:[#allocation2 + $0x7] sm:$0xff]  ;;  %v742_v17 = vld [vmem:[#allocation2 + $0xf] sm:$0xff]  ;;  %v433_v30 = vadd.f32 %v2921_v4, %v401_v8  ;;  %v434_v31 = vadd.f32 %v2921_v4, %v402_v9  ;;  %v471_v33 = vmul.f32 %v2926_v5, %v359_v7 }
  0x24   : > { %269 = vst.msk [vmem:[#allocation2 + $0x1d8] sm:$0x3] %vm254_vm1, %v2810_v0  ;;  %270 = vst.msk [vmem:[#allocation2 + $0x1f8] sm:$0x3] %vm254_vm1, %v2810_v0  ;;  %v743_v24 = vld [vmem:[#allocation2 + $0x27] sm:$0xff]  ;;  %v744_v25 = vld [vmem:[#allocation2 + $0x2f] sm:$0xff]  ;;  %v2995_v48 = vmul.f32 %v2955_v26, %v2931_v11  ;;  %v2999_v49 = vmul.f32 %v2955_v26, %v2933_v12  ;;  %v3008_v53 = vadd.f32 %v2921_v4, %v403_v22 }
  0x25   : > { %271 = vst.msk [vmem:[#allocation2 + $0x218] sm:$0x3] %vm254_vm1, %v2810_v0  ;;  %272 = vst.msk [vmem:[#allocation2 + $0x238] sm:$0x3] %vm254_vm1, %v2810_v0  ;;  %v1126_v35 = vld [vmem:[#allocation2 + $0x8] sm:$0xff]  ;;  %v1127_v36 = vld [vmem:[#allocation2 + $0x10] sm:$0xff]  ;;  %v3011_v54 = vadd.f32 %v2921_v4, %v404_v23  ;;  %v3014_v55 = vmul.f32 %v2942_v18, %v741_v16  ;;  %v3017_v56 = vmul.f32 %v2942_v18, %v742_v17 }
  0x26   : > { %273 = vst.msk [vmem:[#allocation2 + $0x258] sm:$0x3] %vm254_vm1, %v2810_v0  ;;  %274 = vst.msk [vmem:[#allocation2 + $0x278] sm:$0x3] %vm254_vm1, %v2810_v0  ;;  %v2983_v41 = vld [vmem:[#allocation2 + $0x247] sm:$0xff]  ;;  %v2985_v42 = vld [vmem:[#allocation2 + $0x24f] sm:$0xff]  ;;  %v502_v60 = vadd.f32 %v470_v32, %v433_v30  ;;  %v3025_v61 = vadd.f32 %v471_v33, %v434_v31  ;;  %v3028_v62 = vmul.f32 %v2942_v18, %v743_v24 }
  0x27   : > { %317 = vst.msk [vmem:[#allocation2 + $0x48] sm:$0xff] %vm233_vm0, %v284_v10  ;;  %318 = vst.msk [vmem:[#allocation2 + $0x50] sm:$0xff] %vm233_vm0, %v285_v13  ;;  %v1128_v43 = vld [vmem:[#allocation2 + $0x28] sm:$0xff]  ;;  %v1129_v44 = vld [vmem:[#allocation2 + $0x30] sm:$0xff]  ;;  %v3031_v63 = vmul.f32 %v2942_v18, %v744_v25  ;;  %v3047_v6 = vmul.f32 %v2970_v34, %v743_v24  ;;  %v3050_v7 = vmul.f32 %v2970_v34, %v744_v25 }
  0x28   : > { %319 = vst.msk [vmem:[#allocation2 + $0x68] sm:$0xff] %vm233_vm0, %v286_v14  ;;  %320 = vst.msk [vmem:[#allocation2 + $0x70] sm:$0xff] %vm233_vm0, %v287_v15  ;;  %v3036_v0 = vld [vmem:[%s5743_s1 + $0x7] ss:$0 sm:$0xff]  ;;  %v3041_v1 = vld [vmem:[%s5743_s1 + $0xa] ss:$0 sm:$0xff]  ;;  %v3053_v8 = vmul.f32 %v2975_v37, %v1126_v35  ;;  %v3056_v9 = vmul.f32 %v2975_v37, %v1127_v36  ;;  %v3064_v16 = vmul.f32 %v2975_v37, %v1128_v43 }
  0x29   : > { %321 = vst.msk [vmem:[#allocation2 + $0x88] sm:$0xff] %vm233_vm0, %v288_v19  ;;  %322 = vst.msk [vmem:[#allocation2 + $0x90] sm:$0xff] %vm233_vm0, %v289_v20  ;;  %v394_v2 = vld [vmem:[#allocation2 + $0x266] sm:$0xff]  ;;  %v3061_v13 = vld [vmem:[%s5743_s1 + $0x10] ss:$0 sm:$0xff]  ;;  %v3067_v17 = vmul.f32 %v2975_v37, %v1129_v44  ;;  %v3083_v23 = vmul.f32 %v3036_v0, %v1128_v43  ;;  %v3086_v24 = vmul.f32 %v3036_v0, %v1129_v44 }
  0x2a   : > { %323 = vst.msk [vmem:[#allocation2 + $0xa8] sm:$0xff] %vm233_vm0, %v290_v21  ;;  %324 = vst.msk [vmem:[#allocation2 + $0xb0] sm:$0xff] %vm233_vm0, %v291_v27  ;;  %v395_v14 = vld [vmem:[#allocation2 + $0x26e] sm:$0xff]  ;;  %v3071_v19 = vmul.f32 %v3061_v13, %v2983_v41  ;;  %v3075_v20 = vmul.f32 %v3061_v13, %v2985_v42  ;;  %v3102_v33 = vld [vmem:[%s5743_s1 + $0xb] ss:$0 sm:$0xff] }
  0x2b   : > { %325 = vst.msk [vmem:[#allocation2 + $0xc8] sm:$0xff] %vm233_vm0, %v292_v28  ;;  %326 = vst.msk [vmem:[#allocation2 + $0xd0] sm:$0xff] %vm233_vm0, %v293_v29  ;;  %v779_v15 = vld [vmem:[#allocation2 + $0x267] sm:$0xff]  ;;  %v3080_v21 = vld [vmem:[%s5743_s1 + $0x14] ss:$0 sm:$0xff] }
  0x2c   : > { %327 = vst.msk [vmem:[#allocation2 + $0xe8] sm:$0xff] %vm233_vm0, %v294_v38  ;;  %328 = vst.msk [vmem:[#allocation2 + $0xf0] sm:$0xff] %vm233_vm0, %v295_v39  ;;  %v780_v22 = vld [vmem:[#allocation2 + $0x26f] sm:$0xff]  ;;  %v3090_v28 = vmul.f32 %v3080_v21, %v2931_v11  ;;  %v3094_v29 = vmul.f32 %v3080_v21, %v2933_v12  ;;  %v3110_v12 = vmul.f32 %v3080_v21, %v394_v2 }
  0x2d   : > { %329 = vst.msk [vmem:[#allocation2 + $0x108] sm:$0xff] %vm233_vm0, %v296_v40  ;;  %330 = vst.msk [vmem:[#allocation2 + $0x110] sm:$0xff] %vm233_vm0, %v297_v45  ;;  %v3107_v11 = vld [vmem:[%s5743_s1 + $0x15] ss:$0 sm:$0xff]  ;;  %v3113_v36 = vmul.f32 %v3080_v21, %v395_v14  ;;  %v2608_v45 = vld [vmem:[%s5743_s1 + $0xc] ss:$0 sm:$0xff] }
  0x2e   : > { %331 = vst.msk [vmem:[#allocation2 + $0x128] sm:$0xff] %vm233_vm0, %v298_v46  ;;  %332 = vst.msk [vmem:[#allocation2 + $0x130] sm:$0xff] %vm233_vm0, %v299_v47  ;;  %v360_v10 = vld [vmem:[#allocation2 + $0x46] sm:$0xff]  ;;  %v361_v27 = vld [vmem:[#allocation2 + $0x4e] sm:$0xff]  ;;  %v3117_v38 = vmul.f32 %v3107_v11, %v2983_v41  ;;  %v3121_v39 = vmul.f32 %v3107_v11, %v2985_v42  ;;  %v3124_v40 = vmul.f32 %v3107_v11, %v779_v15 }
  0x2f   : > { %333 = vst.msk [vmem:[#allocation2 + $0x148] sm:$0xff] %vm233_vm0, %v300_v50  ;;  %334 = vst.msk [vmem:[#allocation2 + $0x150] sm:$0xff] %vm233_vm0, %v301_v51  ;;  %v745_v25 = vld [vmem:[#allocation2 + $0x47] sm:$0xff]  ;;  %v405_v30 = vmul.f32 %v2909_v3, %v360_v10  ;;  %v472_v31 = vmul.f32 %v2926_v5, %v360_v10  ;;  %v539_v32 = vmul.f32 %v3041_v1, %v360_v10  ;;  %v746_v46 = vld [vmem:[#allocation2 + $0x4f] sm:$0xff] }
  0x30   : > { %335 = vst.msk [vmem:[#allocation2 + $0x168] sm:$0xff] %vm233_vm0, %v302_v52  ;;  %336 = vst.msk [vmem:[#allocation2 + $0x170] sm:$0xff] %vm233_vm0, %v303_v57  ;;  %v1130_v35 = vld [vmem:[#allocation2 + $0x48] sm:$0xff]  ;;  %v3127_v43 = vmul.f32 %v2942_v18, %v745_v25  ;;  %v3130_v44 = vmul.f32 %v2970_v34, %v745_v25  ;;  %v406_v41 = vmul.f32 %v2909_v3, %v361_v27 }
  0x31   : > { %337 = vst.msk [vmem:[#allocation2 + $0x188] sm:$0xff] %vm233_vm0, %v304_v58  ;;  %338 = vst.msk [vmem:[#allocation2 + $0x190] sm:$0xff] %vm233_vm0, %v305_v59  ;;  %v362_v47 = vld [vmem:[#allocation2 + $0x66] sm:$0xff]  ;;  %v3137_v42 = vmul.f32 %v3107_v11, %v780_v22  ;;  %v3140_v50 = vmul.f32 %v3102_v33, %v745_v25  ;;  %v3143_v51 = vmul.f32 %v2975_v37, %v1130_v35  ;;  %v1131_v58 = vld [vmem:[#allocation2 + $0x50] sm:$0xff] }
  0x32   : > { %5806 = vst [vmem:[#allocation3_spill] sm:$0xff] %v3053_v8  ;;  %5807 = vst [vmem:[#allocation4_spill] sm:$0xff] %v3056_v9  ;;  %v473_v52 = vmul.f32 %v2926_v5, %v361_v27  ;;  %v540_v57 = vmul.f32 %v3041_v1, %v361_v27  ;;  %v437_v59 = vadd.f32 %v2921_v4, %v405_v30  ;;  %v747_v27 = vld [vmem:[#allocation2 + $0x67] sm:$0xff]  ;;  %v307_v8 = vld [vmem:[%s2916_s21 + $0xb8] sm:$0xff] }
  0x33   : > { %5808 = vst [vmem:[#allocation5_spill] sm:$0xff] %v3064_v16  ;;  %5809 = vst [vmem:[#allocation6_spill] sm:$0xff] %v3067_v17  ;;  %v504_v2 = vadd.f32 %v472_v31, %v3008_v53  ;;  %v571_v10 = vadd.f32 %v539_v32, %v502_v60  ;;  %v3150_v14 = vmul.f32 %v3036_v0, %v1130_v35 }
  0x34   : > { %5810 = vst [vmem:[#allocation7_spill] sm:$0xff] %v3071_v19  ;;  %5811 = vst [vmem:[#allocation8_spill] sm:$0xff] %v3075_v20  ;;  %v3152_v15 = vmul.f32 %v2608_v45, %v1130_v35  ;;  %v3155_v22 = vmul.f32 %v2942_v18, %v746_v46  ;;  %v3158_v25 = vmul.f32 %v2970_v34, %v746_v46 }
  0x35   : > { %5812 = vst [vmem:[#allocation9_spill] sm:$0xff] %v3083_v23  ;;  %5813 = vst [vmem:[#allocation10_spill] sm:$0xff] %v3086_v24  ;;  %v438_v30 = vadd.f32 %v2921_v4, %v406_v41  ;;  %v3163_v53 = vmul.f32 %v3102_v33, %v746_v46  ;;  %v3166_v60 = vmul.f32 %v2975_v37, %v1131_v58  ;;  %v306_v23 = vld [vmem:[%s2916_s21 + $0xb0] sm:$0xff] }
  0x36   : > { %5814 = vst [vmem:[#allocation11_spill] sm:$0xff] %v3117_v38  ;;  %5815 = vst [vmem:[#allocation12_spill] sm:$0xff] %v3121_v39  ;;  %v3169_v31 = vmul.f32 %v3036_v0, %v1131_v58  ;;  %v505_v32 = vadd.f32 %v473_v52, %v3011_v54  ;;  %v572_v35 = vadd.f32 %v540_v57, %v3025_v61  ;;  %v748_v52 = vld [vmem:[#allocation2 + $0x6f] sm:$0xff]  ;;  %v364_v57 = vld [vmem:[#allocation2 + $0x86] sm:$0xff] }
  0x37   : > { %5816 = vst [vmem:[#allocation13_spill] sm:$0xff] %v3124_v40  ;;  %5817 = vst [vmem:[#allocation14_spill] sm:$0xff] %v3137_v42  ;;  %v407_v42 = vmul.f32 %v2909_v3, %v362_v47  ;;  %v363_v40 = vld [vmem:[#allocation2 + $0x6e] sm:$0xff]  ;;  %v3173_v20 = vmul.f32 %v2608_v45, %v1131_v58  ;;  %v474_v39 = vmul.f32 %v2926_v5, %v362_v47 }
  0x38   : > { %5818 = vst [vmem:[#allocation15_spill] sm:$0xff] %v3140_v50  ;;  %5819 = vst [vmem:[#allocation16_spill] sm:$0xff] %v3143_v51  ;;  %v1132_v51 = vld [vmem:[#allocation2 + $0x68] sm:$0xff]  ;;  %v541_v41 = vmul.f32 %v3041_v1, %v362_v47  ;;  %v608_v46 = vmul.f32 %v2955_v26, %v362_v47  ;;  %v3179_v17 = vmul.f32 %v2942_v18, %v747_v27 }
  0x39   : > { %5820 = vst [vmem:[#allocation17_spill] sm:$0xff] %v3150_v14  ;;  %5821 = vst [vmem:[#allocation18_spill] sm:$0xff] %v3152_v15  ;;  %v3184_v54 = vmul.f32 %v2970_v34, %v747_v27  ;;  %v3187_v61 = vmul.f32 %v3102_v33, %v747_v27  ;;  %v3190_v45 = vmul.f32 %v3061_v13, %v747_v27 }
  0x3a   : > { %5822 = vst [vmem:[#allocation19_spill] sm:$0xff] %v3163_v53  ;;  %5823 = vst [vmem:[#allocation20_spill] sm:$0xff] %v3166_v60  ;;  %v408_v60 = vmul.f32 %v2909_v3, %v363_v40  ;;  %v506_v58 = vadd.f32 %v474_v39, %v437_v59  ;;  %v573_v47 = vadd.f32 %v541_v41, %v504_v2  ;;  %v749_v41 = vld [vmem:[#allocation2 + $0x87] sm:$0xff] }
  0x3b   : > { %5824 = vst [vmem:[#allocation21_spill] sm:$0xff] %v3169_v31  ;;  %5825 = vst [vmem:[#allocation22_spill] sm:$0xff] %v3173_v20  ;;  %v439_v31 = vadd.f32 %v2921_v4, %v407_v42  ;;  %v640_v14 = vadd.f32 %v608_v46, %v571_v10  ;;  %v3193_v16 = vmul.f32 %v2975_v37, %v1132_v51  ;;  %v365_v46 = vld [vmem:[#allocation2 + $0x8e] sm:$0xff] }
  0x3c   : > { %5826 = vst [vmem:[#allocation23_spill] sm:$0xff] %v3187_v61  ;;  %5827 = vst [vmem:[#allocation24_spill] sm:$0xff] %v3190_v45  ;;  %v3196_v20 = vmul.f32 %v3036_v0, %v1132_v51  ;;  %v475_v42 = vmul.f32 %v2926_v5, %v363_v40  ;;  %v542_v24 = vmul.f32 %v3041_v1, %v363_v40  ;;  %v1133_v61 = vld [vmem:[#allocation2 + $0x70] sm:$0xff] }
  0x3d   : > { %5828 = vst [vmem:[#allocation25_spill] sm:$0xff] %v3193_v16  ;;  %v609_v9 = vmul.f32 %v2955_v26, %v363_v40  ;;  %v440_v27 = vadd.f32 %v2921_v4, %v408_v60  ;;  %v3203_v38 = vmul.f32 %v2942_v18, %v748_v52  ;;  %v3206_v39 = vmul.f32 %v2970_v34, %v748_v52 }
  0x3e   : > { %5829 = vst [vmem:[#allocation26_spill] sm:$0xff] %v3196_v20  ;;  %v677_v59 = vmul.f32 %v3080_v21, %v364_v57  ;;  %v507_v2 = vadd.f32 %v475_v42, %v438_v30  ;;  %v3210_v51 = vmul.f32 %v3102_v33, %v748_v52  ;;  %v3213_v10 = vmul.f32 %v3061_v13, %v748_v52 }
  0x3f   : > { %v409_v40 = vmul.f32 %v2909_v3, %v364_v57  ;;  %v574_v60 = vadd.f32 %v542_v24, %v505_v32  ;;  %v641_v16 = vadd.f32 %v609_v9, %v572_v35  ;;  %v3217_v20 = vmul.f32 %v2975_v37, %v1133_v61  ;;  %339 = vst.msk [vmem:[#allocation2 + $0x1a8] sm:$0xff] %vm233_vm0, %v306_v23  ;;  %v313_v23 = vld [vmem:[%s2916_s21 + $0xe8] sm:$0xff] }
  0x40   : > { %5830 = vst [vmem:[#allocation27_spill] sm:$0xff] %v3210_v51  ;;  %5831 = vst [vmem:[#allocation28_spill] sm:$0xff] %v3213_v10  ;;  %v709_v19 = vadd.f32 %v677_v59, %v640_v14  ;;  %v3220_v53 = vmul.f32 %v3036_v0, %v1133_v61  ;;  %v476_v30 = vmul.f32 %v2926_v5, %v364_v57  ;;  %v1134_v0 = vld [vmem:[#allocation2 + $0x88] sm:$0xff] }
  0x41   : > { %5832 = vst [vmem:[#allocation29_spill] sm:$0xff] %v3217_v20  ;;  %v543_v42 = vmul.f32 %v3041_v1, %v364_v57  ;;  %v610_v52 = vmul.f32 %v2955_v26, %v364_v57  ;;  %v3226_v51 = vmul.f32 %v2942_v18, %v749_v41  ;;  %v3229_v9 = vmul.f32 %v2970_v34, %v749_v41  ;;  %v750_v59 = vld [vmem:[#allocation2 + $0x8f] sm:$0xff]  ;;  %v366_v20 = vld [vmem:[#allocation2 + $0xa6] sm:$0xff] }
  0x42   : > { %5833 = vst [vmem:[#allocation30_spill] sm:$0xff] %v3220_v53  ;;  %v3232_v24 = vmul.f32 %v3102_v33, %v749_v41  ;;  %v678_v14 = vmul.f32 %v3080_v21, %v365_v46  ;;  %v441_v32 = vadd.f32 %v2921_v4, %v409_v40  ;;  %v508_v35 = vadd.f32 %v476_v30, %v439_v31  ;;  %v308_v40 = vld [vmem:[%s2916_s21 + $0xc0] sm:$0xff] }
  0x43   : > { %v3236_v61 = vadd.f32 %v543_v42, %v506_v58  ;;  %v410_v57 = vmul.f32 %v2909_v3, %v365_v46  ;;  %v642_v53 = vadd.f32 %v610_v52, %v573_v47  ;;  %v818_v10 = vadd.f32 %v3014_v55, %v709_v19  ;;  %340 = vst.msk [vmem:[#allocation2 + $0x1b0] sm:$0xff] %vm233_vm0, %v307_v8  ;;  %v309_v55 = vld [vmem:[%s2916_s21 + $0xc8] sm:$0xff]  ;;  %v311_v19 = vld [vmem:[%s2916_s21 + $0xd8] sm:$0xff]  ;;  %v312_v8 = vld [vmem:[%s2916_s21 + $0xe0] sm:$0xff] }
  0x44   : > { %5834 = vst [vmem:[#allocation31_spill] sm:$0xff] %v3232_v24  ;;  %v3241_v24 = vmul.f32 %v3061_v13, %v749_v41  ;;  %v710_v15 = vadd.f32 %v678_v14, %v641_v16  ;;  %v3247_v31 = vmul.f32 %v3107_v11, %v749_v41  ;;  %v3250_v58 = vmul.f32 %v2975_v37, %v1134_v0  ;;  %v310_v16 = vld [vmem:[%s2916_s21 + $0xd0] sm:$0xff] }
  0x45   : > { %v477_v30 = vmul.f32 %v2926_v5, %v365_v46  ;;  %v544_v47 = vmul.f32 %v3041_v1, %v365_v46  ;;  %341 = vst.msk [vmem:[#allocation2 + $0x1c8] sm:$0xff] %vm233_vm0, %v308_v40  ;;  %v611_v41 = vmul.f32 %v2955_v26, %v365_v46  ;;  %v3262_v42 = vmul.f32 %v2942_v18, %v750_v59  ;;  %v314_v14 = vld [vmem:[%s2916_s21 + $0xf0] sm:$0xff] }
  0x46   : > { %5835 = vst [vmem:[#allocation32_spill] sm:$0xff] %v3241_v24  ;;  %5836 = vst [vmem:[#allocation33_spill] sm:$0xff] %v3247_v31  ;;  %v411_v52 = vmul.f32 %v2909_v3, %v366_v20  ;;  %v679_v0 = vmul.f32 %v3080_v21, %v366_v20  ;;  %v442_v40 = vadd.f32 %v2921_v4, %v410_v57  ;;  %v1135_v31 = vld [vmem:[#allocation2 + $0x90] sm:$0xff] }
  0x47   : > { %5837 = vst [vmem:[#allocation34_spill] sm:$0xff] %v3250_v58  ;;  %342 = vst.msk [vmem:[#allocation2 + $0x1d0] sm:$0xff] %vm233_vm0, %v309_v55  ;;  %v509_v46 = vadd.f32 %v477_v30, %v440_v27  ;;  %v576_v58 = vadd.f32 %v544_v47, %v507_v2  ;;  %v3274_v24 = vmul.f32 %v2970_v34, %v750_v59  ;;  %v315_v55 = vld [vmem:[%s2916_s21 + $0xf8] sm:$0xff]  ;;  %v751_v27 = vld [vmem:[#allocation2 + $0xa7] sm:$0xff] }
  0x48   : > { %343 = vst.msk [vmem:[#allocation2 + $0x1e8] sm:$0xff] %vm233_vm0, %v310_v16  ;;  %344 = vst.msk [vmem:[#allocation2 + $0x1f0] sm:$0xff] %vm233_vm0, %v311_v19  ;;  %v3281_v16 = vadd.f32 %v3047_v6, %v818_v10  ;;  %v643_v19 = vadd.f32 %v611_v41, %v574_v60  ;;  %v819_v45 = vadd.f32 %v3017_v56, %v710_v15  ;;  %v367_v2 = vld [vmem:[#allocation2 + $0xae] sm:$0xff] }
  0x49   : > { %345 = vst.msk [vmem:[#allocation2 + $0x208] sm:$0xff] %vm233_vm0, %v312_v8  ;;  %346 = vst.msk [vmem:[#allocation2 + $0x210] sm:$0xff] %vm233_vm0, %v313_v23  ;;  %v711_v57 = vadd.f32 %v679_v0, %v642_v53  ;;  %v3286_v30 = vmul.f32 %v3102_v33, %v750_v59  ;;  %v3289_v47 = vmul.f32 %v3061_v13, %v750_v59 }
  0x4a   : > { %347 = vst.msk [vmem:[#allocation2 + $0x228] sm:$0xff] %vm233_vm0, %v314_v14  ;;  %5838 = vst [vmem:[#allocation35_spill] sm:$0xff] %v3281_v16  ;;  %v3292_v8 = vmul.f32 %v3107_v11, %v750_v59  ;;  %v478_v6 = vmul.f32 %v2926_v5, %v366_v20  ;;  %v3296_v10 = vmul.f32 %v2975_v37, %v1135_v31  ;;  %v1136_v59 = vld [vmem:[#allocation2 + $0xa8] sm:$0xff] }
  0x4b   : > { %348 = vst.msk [vmem:[#allocation2 + $0x230] sm:$0xff] %vm233_vm0, %v315_v55  ;;  %5839 = vst [vmem:[#allocation36_spill] sm:$0xff] %v3286_v30  ;;  %v443_v56 = vadd.f32 %v2921_v4, %v411_v52  ;;  %v545_v15 = vmul.f32 %v3041_v1, %v366_v20  ;;  %v612_v53 = vmul.f32 %v2955_v26, %v366_v20  ;;  %v368_v20 = vld [vmem:[#allocation2 + $0xc6] sm:$0xff] }
  0x4c   : > { %5840 = vst [vmem:[#allocation37_spill] sm:$0xff] %v3289_v47  ;;  %5841 = vst [vmem:[#allocation38_spill] sm:$0xff] %v3292_v8  ;;  %v510_v60 = vadd.f32 %v478_v6, %v441_v32  ;;  %v3302_v41 = vmul.f32 %v2942_v18, %v751_v27  ;;  %v3305_v0 = vmul.f32 %v2970_v34, %v751_v27 }
  0x4d   : > { %5842 = vst [vmem:[#allocation39_spill] sm:$0xff] %v3296_v10  ;;  %v680_v23 = vmul.f32 %v3080_v21, %v367_v2  ;;  %v3309_v14 = vadd.f32 %v3050_v7, %v819_v45  ;;  %v577_v31 = vadd.f32 %v545_v15, %v508_v35  ;;  %v820_v52 = vadd.f32 %v3028_v62, %v711_v57  ;;  %v752_v10 = vld [vmem:[#allocation2 + $0xaf] sm:$0xff] }
  0x4e   : > { %v412_v55 = vmul.f32 %v2909_v3, %v367_v2  ;;  %v644_v32 = vadd.f32 %v612_v53, %v3236_v61  ;;  %v3315_v6 = vmul.f32 %v3102_v33, %v751_v27  ;;  %v3318_v30 = vmul.f32 %v3061_v13, %v751_v27 }
  0x4f   : > { %5843 = vst [vmem:[#allocation40_spill] sm:$0xff] %v3309_v14  ;;  %v712_v47 = vadd.f32 %v680_v23, %v643_v19  ;;  %v3321_v8 = vmul.f32 %v3107_v11, %v751_v27  ;;  %v3324_v7 = vmul.f32 %v2975_v37, %v1136_v59  ;;  %v479_v62 = vmul.f32 %v2926_v5, %v367_v2  ;;  %v1137_v23 = vld [vmem:[#allocation2 + $0xb0] sm:$0xff] }
  0x50   : > { %5844 = vst [vmem:[#allocation41_spill] sm:$0xff] %v3315_v6  ;;  %5845 = vst [vmem:[#allocation42_spill] sm:$0xff] %v3318_v30  ;;  %v546_v45 = vmul.f32 %v3041_v1, %v367_v2  ;;  %v613_v35 = vmul.f32 %v2955_v26, %v367_v2  ;;  %v3330_v61 = vmul.f32 %v2942_v18, %v752_v10  ;;  %v369_v14 = vld [vmem:[#allocation2 + $0xce] sm:$0xff] }
  0x51   : > { %5846 = vst [vmem:[#allocation43_spill] sm:$0xff] %v3321_v8  ;;  %5847 = vst [vmem:[#allocation44_spill] sm:$0xff] %v3324_v7  ;;  %v413_v57 = vmul.f32 %v2909_v3, %v368_v20  ;;  %v681_v15 = vmul.f32 %v3080_v21, %v368_v20  ;;  %v3335_v19 = vadd.f32 %v3130_v44, %v820_v52  ;;  %v753_v8 = vld [vmem:[#allocation2 + $0xc7] sm:$0xff] }
  0x52   : > { %v444_v27 = vadd.f32 %v2921_v4, %v412_v55  ;;  %v511_v53 = vadd.f32 %v479_v62, %v442_v40  ;;  %v3339_v59 = vmul.f32 %v2970_v34, %v752_v10  ;;  %v578_v7 = vadd.f32 %v546_v45, %v509_v46 }
  0x53   : > { %5848 = vst [vmem:[#allocation45_spill] sm:$0xff] %v3335_v19  ;;  %v645_v6 = vadd.f32 %v613_v35, %v576_v58  ;;  %v821_v2 = vadd.f32 %v3031_v63, %v712_v47  ;;  %v713_v30 = vadd.f32 %v681_v15, %v644_v32  ;;  %v3343_v50 = vmul.f32 %v3102_v33, %v752_v10 }
  0x54   : > { %v3346_v44 = vmul.f32 %v3061_v13, %v752_v10  ;;  %v3349_v52 = vmul.f32 %v3107_v11, %v752_v10  ;;  %v480_v40 = vmul.f32 %v2926_v5, %v368_v20  ;;  %v3353_v55 = vmul.f32 %v2975_v37, %v1137_v23  ;;  %v1138_v10 = vld [vmem:[#allocation2 + $0xc8] sm:$0xff] }
  0x55   : > { %5849 = vst [vmem:[#allocation46_spill] sm:$0xff] %v3343_v50  ;;  %v445_v58 = vadd.f32 %v2921_v4, %v413_v57  ;;  %v547_v63 = vmul.f32 %v3041_v1, %v368_v20  ;;  %v614_v46 = vmul.f32 %v2955_v26, %v368_v20  ;;  %v3359_v32 = vmul.f32 %v2942_v18, %v753_v8  ;;  %v370_v20 = vld [vmem:[#allocation2 + $0xe6] sm:$0xff] }
  0x56   : > { %5850 = vst [vmem:[#allocation47_spill] sm:$0xff] %v3346_v44  ;;  %5851 = vst [vmem:[#allocation48_spill] sm:$0xff] %v3349_v52  ;;  %v512_v47 = vadd.f32 %v480_v40, %v443_v56  ;;  %v3362_v62 = vmul.f32 %v2970_v34, %v753_v8  ;;  %v682_v45 = vmul.f32 %v3080_v21, %v369_v14 }
  0x57   : > { %5852 = vst [vmem:[#allocation49_spill] sm:$0xff] %v3353_v55  ;;  %v3366_v35 = vadd.f32 %v3158_v25, %v821_v2  ;;  %v579_v15 = vadd.f32 %v547_v63, %v510_v60  ;;  %v822_v57 = vadd.f32 %v3127_v43, %v713_v30  ;;  %v414_v23 = vmul.f32 %v2909_v3, %v369_v14  ;;  %v754_v55 = vld [vmem:[#allocation2 + $0xcf] sm:$0xff] }
  0x58   : > { %v646_v56 = vadd.f32 %v614_v46, %v577_v31  ;;  %v3371_v40 = vmul.f32 %v3102_v33, %v753_v8  ;;  %v3374_v50 = vmul.f32 %v3061_v13, %v753_v8  ;;  %v714_v44 = vadd.f32 %v682_v45, %v645_v6  ;;  %v1139_v45 = vld [vmem:[#allocation2 + $0xd0] sm:$0xff] }
  0x59   : > { %5853 = vst [vmem:[#allocation50_spill] sm:$0xff] %v3366_v35  ;;  %v3377_v52 = vmul.f32 %v3107_v11, %v753_v8  ;;  %v3380_v25 = vmul.f32 %v2975_v37, %v1138_v10  ;;  %v481_v43 = vmul.f32 %v2926_v5, %v369_v14  ;;  %v548_v30 = vmul.f32 %v3041_v1, %v369_v14  ;;  %v371_v35 = vld [vmem:[#allocation2 + $0xee] sm:$0xff] }
  0x5a   : > { %5854 = vst [vmem:[#allocation51_spill] sm:$0xff] %v3371_v40  ;;  %5855 = vst [vmem:[#allocation52_spill] sm:$0xff] %v3374_v50  ;;  %v615_v60 = vmul.f32 %v2955_v26, %v369_v14  ;;  %v3386_v31 = vmul.f32 %v2942_v18, %v754_v55  ;;  %v415_v2 = vmul.f32 %v2909_v3, %v370_v20 }
  0x5b   : > { %5856 = vst [vmem:[#allocation53_spill] sm:$0xff] %v3377_v52  ;;  %5857 = vst [vmem:[#allocation54_spill] sm:$0xff] %v3380_v25  ;;  %v683_v63 = vmul.f32 %v3080_v21, %v370_v20  ;;  %v3391_v6 = vadd.f32 %v3184_v54, %v822_v57  ;;  %v446_v8 = vadd.f32 %v2921_v4, %v414_v23  ;;  %v755_v52 = vld [vmem:[#allocation2 + $0xe7] sm:$0xff] }
  0x5c   : > { %v513_v46 = vadd.f32 %v481_v43, %v444_v27  ;;  %v3395_v10 = vmul.f32 %v2970_v34, %v754_v55  ;;  %v580_v25 = vadd.f32 %v548_v30, %v511_v53  ;;  %v647_v40 = vadd.f32 %v615_v60, %v578_v7 }
  0x5d   : > { %5858 = vst [vmem:[#allocation55_spill] sm:$0xff] %v3391_v6  ;;  %v823_v14 = vadd.f32 %v3155_v22, %v714_v44  ;;  %v715_v50 = vadd.f32 %v683_v63, %v646_v56  ;;  %v3399_v19 = vmul.f32 %v3102_v33, %v754_v55  ;;  %v3402_v54 = vmul.f32 %v3061_v13, %v754_v55 }
  0x5e   : > { %v3405_v57 = vmul.f32 %v3107_v11, %v754_v55  ;;  %v482_v27 = vmul.f32 %v2926_v5, %v370_v20  ;;  %v3409_v23 = vmul.f32 %v2975_v37, %v1139_v45  ;;  %v447_v7 = vadd.f32 %v2921_v4, %v415_v2  ;;  %v1140_v55 = vld [vmem:[#allocation2 + $0xe8] sm:$0xff] }
  0x5f   : > { %5859 = vst [vmem:[#allocation56_spill] sm:$0xff] %v3399_v19  ;;  %5860 = vst [vmem:[#allocation57_spill] sm:$0xff] %v3402_v54  ;;  %v549_v22 = vmul.f32 %v3041_v1, %v370_v20  ;;  %v616_v53 = vmul.f32 %v2955_v26, %v370_v20  ;;  %v3415_v56 = vmul.f32 %v2942_v18, %v755_v52  ;;  %v372_v20 = vld [vmem:[#allocation2 + $0x106] sm:$0xff] }
  0x60   : > { %5861 = vst [vmem:[#allocation58_spill] sm:$0xff] %v3405_v57  ;;  %5862 = vst [vmem:[#allocation59_spill] sm:$0xff] %v3409_v23  ;;  %v514_v44 = vadd.f32 %v482_v27, %v445_v58  ;;  %v3418_v43 = vmul.f32 %v2970_v34, %v755_v52  ;;  %v684_v30 = vmul.f32 %v3080_v21, %v371_v35  ;;  %v756_v23 = vld [vmem:[#allocation2 + $0xef] sm:$0xff] }
  0x61   : > { %v3422_v60 = vadd.f32 %v3206_v39, %v823_v14  ;;  %v581_v63 = vadd.f32 %v549_v22, %v512_v47  ;;  %v824_v2 = vadd.f32 %v3179_v17, %v715_v50  ;;  %v416_v45 = vmul.f32 %v2909_v3, %v371_v35 }
  0x62   : > { %v648_v58 = vadd.f32 %v616_v53, %v579_v15  ;;  %v3427_v27 = vmul.f32 %v3102_v33, %v755_v52  ;;  %v3430_v19 = vmul.f32 %v3061_v13, %v755_v52  ;;  %v716_v54 = vadd.f32 %v684_v30, %v647_v40  ;;  %v1141_v30 = vld [vmem:[#allocation2 + $0xf0] sm:$0xff] }
  0x63   : > { %5863 = vst [vmem:[#allocation60_spill] sm:$0xff] %v3422_v60  ;;  %v3433_v57 = vmul.f32 %v3107_v11, %v755_v52  ;;  %v3436_v39 = vmul.f32 %v2975_v37, %v1140_v55  ;;  %v483_v17 = vmul.f32 %v2926_v5, %v371_v35  ;;  %v550_v50 = vmul.f32 %v3041_v1, %v371_v35  ;;  %v373_v60 = vld [vmem:[#allocation2 + $0x10e] sm:$0xff] }
  0x64   : > { %5864 = vst [vmem:[#allocation61_spill] sm:$0xff] %v3427_v27  ;;  %5865 = vst [vmem:[#allocation62_spill] sm:$0xff] %v3430_v19  ;;  %v617_v47 = vmul.f32 %v2955_v26, %v371_v35  ;;  %v3442_v15 = vmul.f32 %v2942_v18, %v756_v23  ;;  %v417_v14 = vmul.f32 %v2909_v3, %v372_v20 }
  0x65   : > { %5866 = vst [vmem:[#allocation63_spill] sm:$0xff] %v3433_v57  ;;  %5867 = vst [vmem:[#allocation64_spill] sm:$0xff] %v3436_v39  ;;  %v685_v22 = vmul.f32 %v3080_v21, %v372_v20  ;;  %v3447_v40 = vadd.f32 %v3229_v9, %v824_v2  ;;  %v448_v52 = vadd.f32 %v2921_v4, %v416_v45  ;;  %v757_v57 = vld [vmem:[#allocation2 + $0x107] sm:$0xff] }
  0x66   : > { %v515_v53 = vadd.f32 %v483_v17, %v446_v8  ;;  %v3451_v55 = vmul.f32 %v2970_v34, %v756_v23  ;;  %v582_v39 = vadd.f32 %v550_v50, %v513_v46  ;;  %v649_v27 = vadd.f32 %v617_v47, %v580_v25 }
  0x67   : > { %5868 = vst [vmem:[#allocation65_spill] sm:$0xff] %v3447_v40  ;;  %v825_v35 = vadd.f32 %v3203_v38, %v716_v54  ;;  %v717_v19 = vadd.f32 %v685_v22, %v648_v58  ;;  %v3455_v6 = vmul.f32 %v3102_v33, %v756_v23  ;;  %v3458_v9 = vmul.f32 %v3061_v13, %v756_v23 }
  0x68   : > { %v3461_v2 = vmul.f32 %v3107_v11, %v756_v23  ;;  %v484_v8 = vmul.f32 %v2926_v5, %v372_v20  ;;  %v3465_v45 = vmul.f32 %v2975_v37, %v1141_v30  ;;  %v449_v25 = vadd.f32 %v2921_v4, %v417_v14  ;;  %v1142_v23 = vld [vmem:[#allocation2 + $0x108] sm:$0xff] }
  0x69   : > { %5869 = vst [vmem:[#allocation66_spill] sm:$0xff] %v3455_v6  ;;  %5870 = vst [vmem:[#allocation67_spill] sm:$0xff] %v3458_v9  ;;  %v551_v38 = vmul.f32 %v3041_v1, %v372_v20  ;;  %v618_v46 = vmul.f32 %v2955_v26, %v372_v20  ;;  %v3471_v58 = vmul.f32 %v2942_v18, %v757_v57  ;;  %v374_v20 = vld [vmem:[#allocation2 + $0x126] sm:$0xff] }
  0x6a   : > { %5871 = vst [vmem:[#allocation68_spill] sm:$0xff] %v3461_v2  ;;  %5872 = vst [vmem:[#allocation69_spill] sm:$0xff] %v3465_v45  ;;  %v516_v54 = vadd.f32 %v484_v8, %v447_v7  ;;  %v3474_v17 = vmul.f32 %v2970_v34, %v757_v57  ;;  %v686_v50 = vmul.f32 %v3080_v21, %v373_v60  ;;  %v758_v45 = vld [vmem:[#allocation2 + $0x10f] sm:$0xff] }
  0x6b   : > { %v3478_v47 = vadd.f32 %v3274_v24, %v825_v35  ;;  %v583_v22 = vadd.f32 %v551_v38, %v514_v44  ;;  %v826_v14 = vadd.f32 %v3226_v51, %v717_v19  ;;  %v418_v30 = vmul.f32 %v2909_v3, %v373_v60 }
  0x6c   : > { %v650_v7 = vadd.f32 %v618_v46, %v581_v63  ;;  %v3483_v8 = vmul.f32 %v3102_v33, %v757_v57  ;;  %v3486_v6 = vmul.f32 %v3061_v13, %v757_v57  ;;  %v718_v9 = vadd.f32 %v686_v50, %v649_v27 }
  0x6d   : > { %5873 = vst [vmem:[#allocation70_spill] sm:$0xff] %v3478_v47  ;;  %v3489_v2 = vmul.f32 %v3107_v11, %v757_v57  ;;  %v3492_v24 = vmul.f32 %v2975_v37, %v1142_v23  ;;  %v485_v51 = vmul.f32 %v2926_v5, %v373_v60  ;;  %v552_v19 = vmul.f32 %v3041_v1, %v373_v60  ;;  %v1143_v23 = vld [vmem:[#allocation2 + $0x110] sm:$0xff]  ;;  %v759_v47 = vld [vmem:[#allocation2 + $0x127] sm:$0xff] }
  0x6e   : > { %5874 = vst [vmem:[#allocation71_spill] sm:$0xff] %v3483_v8  ;;  %5875 = vst [vmem:[#allocation72_spill] sm:$0xff] %v3486_v6  ;;  %v619_v44 = vmul.f32 %v2955_v26, %v373_v60  ;;  %v3498_v63 = vmul.f32 %v2942_v18, %v758_v45  ;;  %v3501_v35 = vmul.f32 %v2970_v34, %v758_v45 }
  0x6f   : > { %5876 = vst [vmem:[#allocation73_spill] sm:$0xff] %v3489_v2  ;;  %5877 = vst [vmem:[#allocation74_spill] sm:$0xff] %v3492_v24  ;;  %v687_v27 = vmul.f32 %v3080_v21, %v374_v20  ;;  %v3505_v57 = vadd.f32 %v3305_v0, %v826_v14  ;;  %v450_v38 = vadd.f32 %v2921_v4, %v418_v30  ;;  %v375_v24 = vld [vmem:[#allocation2 + $0x12e] sm:$0xff] }
  0x70   : > { %v517_v46 = vadd.f32 %v485_v51, %v448_v52  ;;  %v419_v50 = vmul.f32 %v2909_v3, %v374_v20  ;;  %v584_v8 = vadd.f32 %v552_v19, %v515_v53  ;;  %v651_v60 = vadd.f32 %v619_v44, %v582_v39  ;;  %v1144_v51 = vld [vmem:[#allocation2 + $0x128] sm:$0xff] }
  0x71   : > { %5878 = vst [vmem:[#allocation75_spill] sm:$0xff] %v3505_v57  ;;  %v827_v6 = vadd.f32 %v3262_v42, %v718_v9  ;;  %v719_v2 = vadd.f32 %v687_v27, %v650_v7  ;;  %v3511_v40 = vmul.f32 %v3102_v33, %v758_v45  ;;  %v3514_v16 = vmul.f32 %v3061_v13, %v758_v45  ;;  %v376_v19 = vld [vmem:[#allocation2 + $0x146] sm:$0xff] }
  0x72   : > { %v3517_v0 = vmul.f32 %v3107_v11, %v758_v45  ;;  %v486_v52 = vmul.f32 %v2926_v5, %v374_v20  ;;  %v3521_v14 = vmul.f32 %v2975_v37, %v1143_v23  ;;  %v553_v39 = vmul.f32 %v3041_v1, %v374_v20 }
  0x73   : > { %5879 = vst [vmem:[#allocation76_spill] sm:$0xff] %v3511_v40  ;;  %5880 = vst [vmem:[#allocation77_spill] sm:$0xff] %v3514_v16  ;;  %v620_v42 = vmul.f32 %v2955_v26, %v374_v20  ;;  %v688_v53 = vmul.f32 %v3080_v21, %v375_v24  ;;  %v451_v9 = vadd.f32 %v2921_v4, %v419_v50 }
  0x74   : > { %5881 = vst [vmem:[#allocation78_spill] sm:$0xff] %v3517_v0  ;;  %5882 = vst [vmem:[#allocation79_spill] sm:$0xff] %v3521_v14  ;;  %v518_v30 = vadd.f32 %v486_v52, %v449_v25  ;;  %v3528_v7 = vmul.f32 %v2942_v18, %v759_v47  ;;  %v3531_v45 = vmul.f32 %v2970_v34, %v759_v47  ;;  %v760_v14 = vld [vmem:[#allocation2 + $0x12f] sm:$0xff] }
  0x75   : > { %v3534_v44 = vadd.f32 %v3339_v59, %v827_v6  ;;  %v652_v27 = vadd.f32 %v620_v42, %v583_v22  ;;  %v828_v23 = vadd.f32 %v3302_v41, %v719_v2  ;;  %v720_v20 = vadd.f32 %v688_v53, %v651_v60  ;;  %v1145_v42 = vld [vmem:[#allocation2 + $0x130] sm:$0xff] }
  0x76   : > { %v585_v40 = vadd.f32 %v553_v39, %v516_v54  ;;  %v3538_v50 = vmul.f32 %v3102_v33, %v759_v47  ;;  %v3541_v25 = vmul.f32 %v3061_v13, %v759_v47  ;;  %v420_v52 = vmul.f32 %v2909_v3, %v375_v24 }
  0x77   : > { %5883 = vst [vmem:[#allocation80_spill] sm:$0xff] %v3534_v44  ;;  %v3545_v16 = vmul.f32 %v3107_v11, %v759_v47  ;;  %v3548_v59 = vmul.f32 %v2975_v37, %v1144_v51  ;;  %v829_v6 = vadd.f32 %v3330_v61, %v720_v20  ;;  %v689_v41 = vmul.f32 %v3080_v21, %v376_v19  ;;  %v377_v51 = vld [vmem:[#allocation2 + $0x14e] sm:$0xff] }
  0x78   : > { %5884 = vst [vmem:[#allocation81_spill] sm:$0xff] %v3538_v50  ;;  %5885 = vst [vmem:[#allocation82_spill] sm:$0xff] %v3541_v25  ;;  %v487_v2 = vmul.f32 %v2926_v5, %v375_v24  ;;  %v554_v54 = vmul.f32 %v3041_v1, %v375_v24  ;;  %v621_v22 = vmul.f32 %v2955_v26, %v375_v24  ;;  %v761_v24 = vld [vmem:[#allocation2 + $0x147] sm:$0xff] }
  0x79   : > { %5886 = vst [vmem:[#allocation83_spill] sm:$0xff] %v3545_v16  ;;  %5887 = vst [vmem:[#allocation84_spill] sm:$0xff] %v3548_v59  ;;  %v3556_v60 = vmul.f32 %v2942_v18, %v760_v14  ;;  %v3559_v39 = vadd.f32 %v3362_v62, %v828_v23  ;;  %v3562_v47 = vmul.f32 %v2970_v34, %v760_v14 }
  0x7a   : > { %v421_v61 = vmul.f32 %v2909_v3, %v376_v19  ;;  %v721_v53 = vadd.f32 %v689_v41, %v652_v27  ;;  %v452_v20 = vadd.f32 %v2921_v4, %v420_v52  ;;  %v519_v59 = vadd.f32 %v487_v2, %v450_v38 }
  0x7b   : > { %5888 = vst [vmem:[#allocation85_spill] sm:$0xff] %v3559_v39  ;;  %v586_v50 = vadd.f32 %v554_v54, %v517_v46  ;;  %v653_v25 = vadd.f32 %v621_v22, %v584_v8  ;;  %v3567_v16 = vmul.f32 %v3102_v33, %v760_v14  ;;  %v3570_v62 = vmul.f32 %v3061_v13, %v760_v14  ;;  %v1146_v54 = vld [vmem:[#allocation2 + $0x148] sm:$0xff] }
  0x7c   : > { %v488_v23 = vmul.f32 %v2926_v5, %v376_v19  ;;  %v830_v39 = vadd.f32 %v3359_v32, %v721_v53  ;;  %v3575_v0 = vmul.f32 %v3107_v11, %v760_v14  ;;  %v3578_v27 = vmul.f32 %v2975_v37, %v1145_v42  ;;  %v378_v32 = vld [vmem:[#allocation2 + $0x166] sm:$0xff] }
  0x7d   : > { %5889 = vst [vmem:[#allocation86_spill] sm:$0xff] %v3567_v16  ;;  %5890 = vst [vmem:[#allocation87_spill] sm:$0xff] %v3570_v62  ;;  %v622_v38 = vmul.f32 %v2955_v26, %v376_v19  ;;  %v690_v8 = vmul.f32 %v3080_v21, %v377_v51  ;;  %v453_v46 = vadd.f32 %v2921_v4, %v421_v61 }
  0x7e   : > { %5891 = vst [vmem:[#allocation88_spill] sm:$0xff] %v3575_v0  ;;  %5892 = vst [vmem:[#allocation89_spill] sm:$0xff] %v3578_v27  ;;  %v520_v52 = vadd.f32 %v488_v23, %v451_v9  ;;  %v555_v41 = vmul.f32 %v3041_v1, %v376_v19  ;;  %v3585_v2 = vmul.f32 %v2942_v18, %v761_v24  ;;  %v762_v27 = vld [vmem:[#allocation2 + $0x14f] sm:$0xff] }
  0x7f   : > { %v3588_v14 = vadd.f32 %v3395_v10, %v829_v6  ;;  %v654_v22 = vadd.f32 %v622_v38, %v585_v40  ;;  %v3591_v42 = vmul.f32 %v2970_v34, %v761_v24  ;;  %v722_v53 = vadd.f32 %v690_v8, %v653_v25 }
  0x80   : > { %v587_v16 = vadd.f32 %v555_v41, %v518_v30  ;;  %v3594_v61 = vmul.f32 %v3102_v33, %v761_v24  ;;  %v3597_v9 = vmul.f32 %v3061_v13, %v761_v24  ;;  %v422_v19 = vmul.f32 %v2909_v3, %v377_v51 }
  0x81   : > { %5893 = vst [vmem:[#allocation90_spill] sm:$0xff] %v3588_v14  ;;  %v3601_v23 = vmul.f32 %v3107_v11, %v761_v24  ;;  %v3604_v10 = vmul.f32 %v2975_v37, %v1146_v54  ;;  %v831_v40 = vadd.f32 %v3386_v31, %v722_v53  ;;  %v691_v25 = vmul.f32 %v3080_v21, %v378_v32  ;;  %v1147_v54 = vld [vmem:[#allocation2 + $0x150] sm:$0xff] }
  0x82   : > { %5894 = vst [vmem:[#allocation91_spill] sm:$0xff] %v3594_v61  ;;  %5895 = vst [vmem:[#allocation92_spill] sm:$0xff] %v3597_v9  ;;  %v489_v30 = vmul.f32 %v2926_v5, %v377_v51  ;;  %v556_v6 = vmul.f32 %v3041_v1, %v377_v51  ;;  %v623_v38 = vmul.f32 %v2955_v26, %v377_v51  ;;  %v763_v51 = vld [vmem:[#allocation2 + $0x167] sm:$0xff] }
  0x83   : > { %5896 = vst [vmem:[#allocation93_spill] sm:$0xff] %v3601_v23  ;;  %5897 = vst [vmem:[#allocation94_spill] sm:$0xff] %v3604_v10  ;;  %v3612_v8 = vmul.f32 %v2942_v18, %v762_v27  ;;  %v3615_v41 = vadd.f32 %v3418_v43, %v830_v39  ;;  %v3618_v24 = vmul.f32 %v2970_v34, %v762_v27  ;;  %v379_v10 = vld [vmem:[#allocation2 + $0x16e] sm:$0xff] }
  0x84   : > { %v423_v31 = vmul.f32 %v2909_v3, %v378_v32  ;;  %v723_v53 = vadd.f32 %v691_v25, %v654_v22  ;;  %v454_v61 = vadd.f32 %v2921_v4, %v422_v19  ;;  %v521_v9 = vadd.f32 %v489_v30, %v452_v20 }
  0x85   : > { %5898 = vst [vmem:[#allocation95_spill] sm:$0xff] %v3615_v41  ;;  %v588_v62 = vadd.f32 %v556_v6, %v519_v59  ;;  %v655_v23 = vadd.f32 %v623_v38, %v586_v50  ;;  %v3623_v0 = vmul.f32 %v3102_v33, %v762_v27  ;;  %v3626_v43 = vmul.f32 %v3061_v13, %v762_v27 }
  0x86   : > { %v490_v39 = vmul.f32 %v2926_v5, %v378_v32  ;;  %v832_v41 = vadd.f32 %v3415_v56, %v723_v53  ;;  %v3631_v3 = vmul.f32 %v3107_v11, %v762_v27  ;;  %v3634_v22 = vmul.f32 %v2975_v37, %v1147_v54  ;;  %v1148_v5 = vld [vmem:[#allocation2 + $0x168] sm:$0xff] }
  0x87   : > { %5899 = vst [vmem:[#allocation96_spill] sm:$0xff] %v3623_v0  ;;  %5900 = vst [vmem:[#allocation97_spill] sm:$0xff] %v3626_v43  ;;  %v624_v59 = vmul.f32 %v2955_v26, %v378_v32  ;;  %v692_v50 = vmul.f32 %v3080_v21, %v379_v10  ;;  %v455_v20 = vadd.f32 %v2921_v4, %v423_v31  ;;  %v380_v56 = vld [vmem:[#allocation2 + $0x186] sm:$0xff]  ;;  %v764_v53 = vld [vmem:[#allocation2 + $0x16f] sm:$0xff] }
  0x88   : > { %5901 = vst [vmem:[#allocation98_spill] sm:$0xff] %v3631_v3  ;;  %5902 = vst [vmem:[#allocation99_spill] sm:$0xff] %v3634_v22  ;;  %v522_v19 = vadd.f32 %v490_v39, %v453_v46  ;;  %v557_v25 = vmul.f32 %v3041_v1, %v378_v32  ;;  %v3641_v30 = vmul.f32 %v2942_v18, %v763_v51  ;;  %v3658_v32 = vld [vmem:[%s5743_s1] ss:$0 sm:$0xff]  ;;  %v3672_v31 = vld [vmem:[%s5743_s1 + $0x5] ss:$0 sm:$0xff] }
  0x89   : > { %v3644_v27 = vadd.f32 %v3451_v55, %v831_v40  ;;  %v656_v6 = vadd.f32 %v624_v59, %v587_v16  ;;  %v3647_v38 = vmul.f32 %v2970_v34, %v763_v51  ;;  %v724_v54 = vadd.f32 %v692_v50, %v655_v23  ;;  %v3690_v0 = vld [vmem:[%s5744_s2] ss:$0 sm:$0xff] }
  0x8a   : > { %v589_v22 = vadd.f32 %v557_v25, %v520_v52  ;;  %v3650_v4 = vmul.f32 %v3102_v33, %v763_v51  ;;  %v3653_v46 = vmul.f32 %v3061_v13, %v763_v51  ;;  %v424_v55 = vmul.f32 %v3658_v32, %v379_v10 }
  0x8b   : > { %5903 = vst [vmem:[#allocation100_spill] sm:$0xff] %v3644_v27  ;;  %v3662_v16 = vmul.f32 %v3107_v11, %v763_v51  ;;  %v3665_v23 = vmul.f32 %v2975_v37, %v1148_v5  ;;  %v833_v52 = vadd.f32 %v3442_v15, %v724_v54  ;;  %v693_v40 = vmul.f32 %v3080_v21, %v380_v56  ;;  %v1149_v5 = vld [vmem:[#allocation2 + $0x170] sm:$0xff] }
  0x8c   : > { %5904 = vst [vmem:[#allocation101_spill] sm:$0xff] %v3650_v4  ;;  %5905 = vst [vmem:[#allocation102_spill] sm:$0xff] %v3653_v46  ;;  %v491_v39 = vmul.f32 %v3672_v31, %v379_v10  ;;  %v558_v59 = vmul.f32 %v3041_v1, %v379_v10  ;;  %v625_v50 = vmul.f32 %v2955_v26, %v379_v10  ;;  %v381_v4 = vld [vmem:[#allocation2 + $0x18e] sm:$0xff] }
  0x8d   : > { %5906 = vst [vmem:[#allocation103_spill] sm:$0xff] %v3662_v16  ;;  %5907 = vst [vmem:[#allocation104_spill] sm:$0xff] %v3665_v23  ;;  %v3678_v51 = vmul.f32 %v2942_v18, %v764_v53  ;;  %v3681_v25 = vadd.f32 %v3474_v17, %v832_v41  ;;  %v3684_v15 = vmul.f32 %v2970_v34, %v764_v53  ;;  %v765_v17 = vld [vmem:[#allocation2 + $0x187] sm:$0xff] }
  0x8e   : > { %v425_v54 = vmul.f32 %v3658_v32, %v380_v56  ;;  %v725_v23 = vadd.f32 %v693_v40, %v656_v6  ;;  %v456_v26 = vadd.f32 %v3690_v0, %v424_v55  ;;  %v523_v18 = vadd.f32 %v491_v39, %v454_v61 }
  0x8f   : > { %5908 = vst [vmem:[#allocation105_spill] sm:$0xff] %v3681_v25  ;;  %v590_v10 = vadd.f32 %v558_v59, %v521_v9  ;;  %v657_v46 = vadd.f32 %v625_v50, %v588_v62  ;;  %v3694_v41 = vmul.f32 %v3102_v33, %v764_v53  ;;  %v3697_v43 = vmul.f32 %v3061_v13, %v764_v53  ;;  %v3710_v62 = vld [vmem:[%s5743_s1 + $0xf] ss:$0 sm:$0xff]  ;;  %v382_v59 = vld [vmem:[#allocation2 + $0x1a6] sm:$0xff] }
  0x90   : > { %v492_v6 = vmul.f32 %v3672_v31, %v380_v56  ;;  %v834_v40 = vadd.f32 %v3471_v58, %v725_v23  ;;  %v3702_v16 = vmul.f32 %v3107_v11, %v764_v53  ;;  %v3705_v25 = vmul.f32 %v2975_v37, %v1149_v5  ;;  %v3719_v53 = vld [vmem:[%s5743_s1 + $0x1] ss:$0 sm:$0xff]  ;;  %v1150_v23 = vld [vmem:[#allocation2 + $0x188] sm:$0xff] }
  0x91   : > { %5909 = vst [vmem:[#allocation106_spill] sm:$0xff] %v3694_v41  ;;  %5910 = vst [vmem:[#allocation107_spill] sm:$0xff] %v3697_v43  ;;  %v626_v61 = vmul.f32 %v3710_v62, %v380_v56  ;;  %v694_v9 = vmul.f32 %v3080_v21, %v381_v4  ;;  %v457_v55 = vadd.f32 %v3690_v0, %v425_v54  ;;  %v766_v54 = vld [vmem:[#allocation2 + $0x18f] sm:$0xff] }
  0x92   : > { %5911 = vst [vmem:[#allocation108_spill] sm:$0xff] %v3702_v16  ;;  %5912 = vst [vmem:[#allocation109_spill] sm:$0xff] %v3705_v25  ;;  %v524_v39 = vadd.f32 %v492_v6, %v455_v20  ;;  %v559_v58 = vmul.f32 %v3041_v1, %v380_v56  ;;  %v3722_v37 = vmul.f32 %v3719_v53, %v765_v17 }
  0x93   : > { %v3725_v50 = vadd.f32 %v3501_v35, %v833_v52  ;;  %v658_v5 = vadd.f32 %v626_v61, %v589_v22  ;;  %v3728_v25 = vmul.f32 %v2970_v34, %v765_v17  ;;  %v726_v20 = vadd.f32 %v694_v9, %v657_v46  ;;  %v3743_v35 = vld [vmem:[%s5743_s1 + $0x2] ss:$0 sm:$0xff] }
  0x94   : > { %v591_v56 = vadd.f32 %v559_v58, %v522_v19  ;;  %v3731_v6 = vmul.f32 %v3102_v33, %v765_v17  ;;  %v3734_v41 = vmul.f32 %v3061_v13, %v765_v17  ;;  %v426_v43 = vmul.f32 %v3658_v32, %v381_v4  ;;  %v3762_v58 = vld [vmem:[%s5743_s1 + $0x6] ss:$0 sm:$0xff] }
  0x95   : > { %5913 = vst [vmem:[#allocation110_spill] sm:$0xff] %v3725_v50  ;;  %v3738_v16 = vmul.f32 %v3107_v11, %v765_v17  ;;  %v3746_v34 = vmul.f32 %v3743_v35, %v1150_v23  ;;  %v835_v22 = vadd.f32 %v3498_v63, %v726_v20  ;;  %v695_v19 = vmul.f32 %v3080_v21, %v382_v59  ;;  %v1151_v23 = vld [vmem:[#allocation2 + $0x190] sm:$0xff] }
  0x96   : > { %5914 = vst [vmem:[#allocation111_spill] sm:$0xff] %v3731_v6  ;;  %5915 = vst [vmem:[#allocation112_spill] sm:$0xff] %v3734_v41  ;;  %v493_v46 = vmul.f32 %v3672_v31, %v381_v4  ;;  %v560_v52 = vmul.f32 %v3041_v1, %v381_v4  ;;  %v627_v61 = vmul.f32 %v3710_v62, %v381_v4  ;;  %v383_v6 = vld [vmem:[#allocation2 + $0x1ae] sm:$0xff] }
  0x97   : > { %5916 = vst [vmem:[#allocation113_spill] sm:$0xff] %v3738_v16  ;;  %5917 = vst [vmem:[#allocation114_spill] sm:$0xff] %v3746_v34  ;;  %v3754_v17 = vmul.f32 %v3719_v53, %v766_v54  ;;  %v3757_v9 = vadd.f32 %v3531_v45, %v834_v40  ;;  %v3765_v63 = vmul.f32 %v3762_v58, %v766_v54  ;;  %v767_v45 = vld [vmem:[#allocation2 + $0x1a7] sm:$0xff] }
  0x98   : > { %v427_v20 = vmul.f32 %v3658_v32, %v382_v59  ;;  %v727_v34 = vadd.f32 %v695_v19, %v658_v5  ;;  %v458_v4 = vadd.f32 %v3690_v0, %v426_v43  ;;  %v525_v41 = vadd.f32 %v493_v46, %v456_v26 }
  0x99   : > { %5918 = vst [vmem:[#allocation115_spill] sm:$0xff] %v3757_v9  ;;  %v592_v16 = vadd.f32 %v560_v52, %v523_v18  ;;  %v659_v50 = vadd.f32 %v627_v61, %v590_v10  ;;  %v3770_v40 = vmul.f32 %v3102_v33, %v766_v54  ;;  %v3773_v9 = vmul.f32 %v3061_v13, %v766_v54  ;;  %v1152_v52 = vld [vmem:[#allocation2 + $0x1a8] sm:$0xff] }
  0x9a   : > { %v494_v3 = vmul.f32 %v3672_v31, %v382_v59  ;;  %v836_v27 = vadd.f32 %v3528_v7, %v727_v34  ;;  %v3778_v14 = vmul.f32 %v3107_v11, %v766_v54  ;;  %v3781_v5 = vmul.f32 %v3743_v35, %v1151_v23  ;;  %v384_v7 = vld [vmem:[#allocation2 + $0x1c6] sm:$0xff] }
  0x9b   : > { %5919 = vst [vmem:[#allocation116_spill] sm:$0xff] %v3770_v40  ;;  %5920 = vst [vmem:[#allocation117_spill] sm:$0xff] %v3773_v9  ;;  %v628_v43 = vmul.f32 %v3710_v62, %v382_v59  ;;  %v696_v26 = vmul.f32 %v3080_v21, %v383_v6  ;;  %v459_v18 = vadd.f32 %v3690_v0, %v427_v20 }
  0x9c   : > { %5921 = vst [vmem:[#allocation118_spill] sm:$0xff] %v3778_v14  ;;  %5922 = vst [vmem:[#allocation119_spill] sm:$0xff] %v3781_v5  ;;  %v526_v10 = vadd.f32 %v494_v3, %v457_v55  ;;  %v561_v19 = vmul.f32 %v3041_v1, %v382_v59  ;;  %v3788_v46 = vmul.f32 %v3719_v53, %v767_v45  ;;  %v768_v5 = vld [vmem:[#allocation2 + $0x1af] sm:$0xff] }
  0x9d   : > { %v3791_v54 = vadd.f32 %v3562_v47, %v835_v22  ;;  %v660_v34 = vadd.f32 %v628_v43, %v591_v56  ;;  %v3794_v61 = vmul.f32 %v3762_v58, %v767_v45  ;;  %v728_v23 = vadd.f32 %v696_v26, %v659_v50  ;;  %v3815_v56 = vld [vmem:[%s5743_s1 + $0xa] ss:$0 sm:$0xff] }
  0x9e   : > { %v593_v40 = vadd.f32 %v561_v19, %v524_v39  ;;  %v3797_v20 = vmul.f32 %v3102_v33, %v767_v45  ;;  %v3800_v1 = vmul.f32 %v3061_v13, %v767_v45  ;;  %v428_v3 = vmul.f32 %v3658_v32, %v383_v6 }
  0x9f   : > { %5923 = vst [vmem:[#allocation120_spill] sm:$0xff] %v3791_v54  ;;  %v3804_v55 = vmul.f32 %v3107_v11, %v767_v45  ;;  %v3807_v47 = vmul.f32 %v3743_v35, %v1152_v52  ;;  %v837_v59 = vadd.f32 %v3556_v60, %v728_v23  ;;  %v697_v50 = vmul.f32 %v3080_v21, %v384_v7  ;;  %v1153_v21 = vld [vmem:[#allocation2 + $0x1b0] sm:$0xff] }
  0xa0   : > { %5924 = vst [vmem:[#allocation121_spill] sm:$0xff] %v3797_v20  ;;  %5925 = vst [vmem:[#allocation122_spill] sm:$0xff] %v3800_v1  ;;  %v495_v39 = vmul.f32 %v3672_v31, %v383_v6  ;;  %v562_v13 = vmul.f32 %v3815_v56, %v383_v6  ;;  %v629_v22 = vmul.f32 %v3710_v62, %v383_v6  ;;  %v385_v52 = vld [vmem:[#allocation2 + $0x1ce] sm:$0xff] }
  0xa1   : > { %5926 = vst [vmem:[#allocation123_spill] sm:$0xff] %v3804_v55  ;;  %5927 = vst [vmem:[#allocation124_spill] sm:$0xff] %v3807_v47  ;;  %v3820_v45 = vmul.f32 %v3719_v53, %v768_v5  ;;  %v3823_v43 = vadd.f32 %v3591_v42, %v836_v27  ;;  %v3826_v60 = vmul.f32 %v3762_v58, %v768_v5  ;;  %v769_v6 = vld [vmem:[#allocation2 + $0x1c7] sm:$0xff]  ;;  %v3836_v42 = vld [vmem:[%s5743_s1 + $0x10] ss:$0 sm:$0xff] }
  0xa2   : > { %v429_v26 = vmul.f32 %v3658_v32, %v384_v7  ;;  %v729_v19 = vadd.f32 %v697_v50, %v660_v34  ;;  %v460_v23 = vadd.f32 %v3690_v0, %v428_v3  ;;  %v527_v47 = vadd.f32 %v495_v39, %v458_v4 }
  0xa3   : > { %5928 = vst [vmem:[#allocation125_spill] sm:$0xff] %v3823_v43  ;;  %v594_v20 = vadd.f32 %v562_v13, %v525_v41  ;;  %v661_v1 = vadd.f32 %v629_v22, %v592_v16  ;;  %v3831_v9 = vmul.f32 %v3102_v33, %v768_v5  ;;  %v3839_v27 = vmul.f32 %v3836_v42, %v768_v5  ;;  %v3853_v41 = vld [vmem:[%s5743_s1 + $0x14] ss:$0 sm:$0xff] }
  0xa4   : > { %v496_v34 = vmul.f32 %v3672_v31, %v384_v7  ;;  %v838_v50 = vadd.f32 %v3585_v2, %v729_v19  ;;  %v3844_v4 = vmul.f32 %v3107_v11, %v768_v5  ;;  %v3847_v16 = vmul.f32 %v3743_v35, %v1153_v21  ;;  %v386_v5 = vld [vmem:[#allocation2 + $0x1e6] sm:$0xff] }
  0xa5   : > { %5929 = vst [vmem:[#allocation126_spill] sm:$0xff] %v3831_v9  ;;  %5930 = vst [vmem:[#allocation127_spill] sm:$0xff] %v3839_v27  ;;  %v630_v33 = vmul.f32 %v3710_v62, %v384_v7  ;;  %v698_v3 = vmul.f32 %v3853_v41, %v385_v52  ;;  %v3857_v39 = vadd.f32 %v3690_v0, %v429_v26  ;;  %v770_v27 = vld [vmem:[#allocation2 + $0x1cf] sm:$0xff] }
  0xa6   : > { %5931 = vst [vmem:[#allocation128_spill] sm:$0xff] %v3844_v4  ;;  %5932 = vst [vmem:[#allocation129_spill] sm:$0xff] %v3847_v16  ;;  %v3859_v13 = vadd.f32 %v496_v34, %v459_v18  ;;  %v563_v11 = vmul.f32 %v3815_v56, %v384_v7  ;;  %v3863_v2 = vmul.f32 %v3719_v53, %v769_v6  ;;  %v1154_v16 = vld [vmem:[#allocation2 + $0x1c8] sm:$0xff] }
  0xa7   : > { %v3866_v22 = vadd.f32 %v3618_v24, %v837_v59  ;;  %v662_v21 = vadd.f32 %v630_v33, %v593_v40  ;;  %v3869_v19 = vmul.f32 %v3762_v58, %v769_v6  ;;  %v730_v9 = vadd.f32 %v698_v3, %v661_v1  ;;  %v3874_v18 = vld [vmem:[%s5743_s1 + $0xb] ss:$0 sm:$0xff]  ;;  %v3886_v40 = vld [vmem:[%s5743_s1 + $0x15] ss:$0 sm:$0xff] }
  0xa8   : > { %v595_v26 = vadd.f32 %v563_v11, %v526_v10  ;;  %v3877_v7 = vmul.f32 %v3874_v18, %v769_v6  ;;  %v3880_v34 = vmul.f32 %v3836_v42, %v769_v6  ;;  %v430_v24 = vmul.f32 %v3658_v32, %v385_v52 }
  0xa9   : > { %5933 = vst [vmem:[#allocation130_spill] sm:$0xff] %v3866_v22  ;;  %v3889_v10 = vmul.f32 %v3886_v40, %v769_v6  ;;  %v631_v1 = vmul.f32 %v3710_v62, %v385_v52  ;;  %v839_v59 = vadd.f32 %v3612_v8, %v730_v9  ;;  %v699_v33 = vmul.f32 %v3853_v41, %v386_v5  ;;  %v387_v22 = vld [vmem:[#allocation2 + $0x1ee] sm:$0xff] }
  0xaa   : > { %5934 = vst [vmem:[#allocation131_spill] sm:$0xff] %v3880_v34  ;;  %v3895_v3 = vmul.f32 %v3743_v35, %v1154_v16  ;;  %v497_v11 = vmul.f32 %v3672_v31, %v385_v52  ;;  %v564_v34 = vmul.f32 %v3815_v56, %v385_v52  ;;  %v3900_v4 = vmul.f32 %v3719_v53, %v770_v27  ;;  %v1155_v8 = vld [vmem:[#allocation2 + $0x1d0] sm:$0xff]  ;;  %v771_v52 = vld [vmem:[#allocation2 + $0x1e7] sm:$0xff] }
  0xab   : > { %5935 = vst [vmem:[#allocation132_spill] sm:$0xff] %v3889_v10  ;;  %v3903_v6 = vadd.f32 %v3647_v38, %v838_v50  ;;  %v663_v10 = vadd.f32 %v631_v1, %v594_v20  ;;  %v3906_v55 = vmul.f32 %v3762_v58, %v770_v27  ;;  %v731_v9 = vadd.f32 %v699_v33, %v662_v21 }
  0xac   : > { %5936 = vst [vmem:[#allocation133_spill] sm:$0xff] %v3895_v3  ;;  %v462_v16 = vadd.f32 %v3690_v0, %v430_v24  ;;  %v529_v3 = vadd.f32 %v497_v11, %v460_v23  ;;  %v596_v43 = vadd.f32 %v564_v34, %v527_v47  ;;  %v3910_v14 = vmul.f32 %v3874_v18, %v770_v27  ;;  %v1156_v24 = vld [vmem:[#allocation2 + $0x1e8] sm:$0xff] }
  0xad   : > { %5937 = vst [vmem:[#allocation134_spill] sm:$0xff] %v3903_v6  ;;  %5938 = vst [vmem:[#allocation135_spill] sm:$0xff] %v3906_v55  ;;  %v3913_v54 = vmul.f32 %v3836_v42, %v770_v27  ;;  %v3916_v38 = vmul.f32 %v3886_v40, %v770_v27  ;;  %v840_v20 = vadd.f32 %v3641_v30, %v731_v9  ;;  %v772_v6 = vld [vmem:[#allocation2 + $0x1ef] sm:$0xff] }
  0xae   : > { %v700_v50 = vmul.f32 %v3853_v41, %v387_v22  ;;  %v3921_v21 = vmul.f32 %v3743_v35, %v1155_v8  ;;  %v431_v23 = vmul.f32 %v3658_v32, %v386_v5  ;;  %v498_v47 = vmul.f32 %v3672_v31, %v386_v5 }
  0xaf   : > { %5939 = vst [vmem:[#allocation136_spill] sm:$0xff] %v3913_v54  ;;  %5940 = vst [vmem:[#allocation137_spill] sm:$0xff] %v3916_v38  ;;  %v565_v34 = vmul.f32 %v3815_v56, %v386_v5  ;;  %v632_v1 = vmul.f32 %v3710_v62, %v386_v5  ;;  %v3928_v33 = vmul.f32 %v3719_v53, %v771_v52  ;;  %v388_v5 = vld [vmem:[#allocation2 + $0x206] sm:$0xff] }
  0xb0   : > { %5941 = vst [vmem:[#allocation138_spill] sm:$0xff] %v3921_v21  ;;  %v3931_v27 = vmul.f32 %v3762_v58, %v771_v52  ;;  %v732_v30 = vadd.f32 %v700_v50, %v663_v10  ;;  %v3934_v11 = vadd.f32 %v3684_v15, %v839_v59  ;;  %v3937_v8 = vmul.f32 %v3874_v18, %v771_v52 }
  0xb1   : > { %v3940_v9 = vmul.f32 %v3836_v42, %v771_v52  ;;  %v3943_v21 = vmul.f32 %v3886_v40, %v771_v52  ;;  %v3946_v54 = vmul.f32 %v3743_v35, %v1156_v24  ;;  %v432_v38 = vmul.f32 %v3658_v32, %v387_v22 }
  0xb2   : > { %5942 = vst [vmem:[#allocation139_spill] sm:$0xff] %v3934_v11  ;;  %5943 = vst [vmem:[#allocation140_spill] sm:$0xff] %v3937_v8  ;;  %v841_v10 = vadd.f32 %v3678_v51, %v732_v30  ;;  %v664_v15 = vadd.f32 %v632_v1, %v595_v26  ;;  %v499_v59 = vmul.f32 %v3672_v31, %v387_v22 }
  0xb3   : > { %5944 = vst [vmem:[#allocation141_spill] sm:$0xff] %v3940_v9  ;;  %5945 = vst [vmem:[#allocation142_spill] sm:$0xff] %v3943_v21  ;;  %v566_v50 = vmul.f32 %v3815_v56, %v387_v22  ;;  %v633_v11 = vmul.f32 %v3710_v62, %v387_v22  ;;  %v463_v44 = vadd.f32 %v3690_v0, %v431_v23  ;;  %v1157_v23 = vld [vmem:[#allocation2 + $0x1f0] sm:$0xff] }
  0xb4   : > { %5946 = vst [vmem:[#allocation143_spill] sm:$0xff] %v3946_v54  ;;  %v500_v52 = vmul.f32 %v3672_v31, %v388_v5  ;;  %v530_v21 = vadd.f32 %v498_v47, %v3857_v39  ;;  %v597_v24 = vadd.f32 %v565_v34, %v3859_v13  ;;  %v701_v32 = vmul.f32 %v3853_v41, %v388_v5  ;;  %v389_v54 = vld [vmem:[#allocation2 + $0x20e] sm:$0xff] }
  0xb5   : > { %v3959_v51 = vmul.f32 %v3719_v53, %v772_v6  ;;  %v3962_v26 = vmul.f32 %v3762_v58, %v772_v6  ;;  %v3965_v1 = vmul.f32 %v3874_v18, %v772_v6  ;;  %v3968_v22 = vmul.f32 %v3836_v42, %v772_v6 }
  0xb6   : > { %v567_v39 = vmul.f32 %v3815_v56, %v388_v5  ;;  %v634_v13 = vmul.f32 %v3710_v62, %v388_v5  ;;  %v733_v47 = vadd.f32 %v701_v32, %v664_v15  ;;  %v464_v34 = vadd.f32 %v3690_v0, %v432_v38  ;;  %v773_v5 = vld [vmem:[#allocation2 + $0x207] sm:$0xff] }
  0xb7   : > { %5947 = vst [vmem:[#allocation144_spill] sm:$0xff] %v3959_v51  ;;  %5948 = vst [vmem:[#allocation145_spill] sm:$0xff] %v3962_v26  ;;  %v501_v53 = vmul.f32 %v3672_v31, %v389_v54  ;;  %v531_v30 = vadd.f32 %v499_v59, %v462_v16  ;;  %v665_v57 = vadd.f32 %v633_v11, %v596_v43  ;;  %v390_v51 = vld [vmem:[#allocation2 + $0x226] sm:$0xff]  ;;  %v391_v11 = vld [vmem:[#allocation2 + $0x22e] sm:$0xff] }
  0xb8   : > { %5949 = vst [vmem:[#allocation146_spill] sm:$0xff] %v3965_v1  ;;  %5950 = vst [vmem:[#allocation147_spill] sm:$0xff] %v3968_v22  ;;  %v702_v26 = vmul.f32 %v3853_v41, %v389_v54  ;;  %v3976_v1 = vmul.f32 %v3886_v40, %v772_v6  ;;  %v532_v9 = vadd.f32 %v500_v52, %v463_v44 }
  0xb9   : > { %v599_v22 = vadd.f32 %v567_v39, %v530_v21  ;;  %v666_v55 = vadd.f32 %v634_v13, %v597_v24  ;;  %v3979_v8 = vmul.f32 %v3743_v35, %v1157_v23  ;;  %v568_v15 = vmul.f32 %v3815_v56, %v389_v54 }
  0xba   : > { %5951 = vst [vmem:[#allocation148_spill] sm:$0xff] %v3976_v1  ;;  %v598_v0 = vadd.f32 %v566_v50, %v529_v3  ;;  %v734_v38 = vadd.f32 %v702_v26, %v665_v57  ;;  %v842_v31 = vadd.f32 %v3722_v37, %v733_v47  ;;  %v569_v43 = vmul.f32 %v3815_v56, %v390_v51  ;;  %v1158_v37 = vld [vmem:[#allocation2 + $0x208] sm:$0xff] }
  0xbb   : > { %5952 = vst [vmem:[#allocation149_spill] sm:$0xff] %v3979_v8  ;;  %v636_v16 = vmul.f32 %v3710_v62, %v390_v51  ;;  %v703_v6 = vmul.f32 %v3853_v41, %v390_v51  ;;  %v3987_v44 = vadd.f32 %v3728_v25, %v840_v20  ;;  %v533_v21 = vadd.f32 %v501_v53, %v464_v34  ;;  %v4208_v8 = vld [vmem:[#allocation2 + $0x90] sm:$0xff] }
  0xbc   : > { %v600_v35 = vadd.f32 %v568_v15, %v531_v30  ;;  %v635_v59 = vmul.f32 %v3710_v62, %v389_v54  ;;  %v885_v52 = vmul.f32 %v3762_v58, %v773_v5  ;;  %v601_v3 = vadd.f32 %v569_v43, %v532_v9 }
  0xbd   : > { %5953 = vst [vmem:[#allocation150_spill] sm:$0xff] %v3987_v44  ;;  %v668_v57 = vadd.f32 %v636_v16, %v599_v22  ;;  %v735_v50 = vadd.f32 %v703_v6, %v666_v55  ;;  %v843_v32 = vadd.f32 %v3754_v17, %v734_v38  ;;  %v570_v26 = vmul.f32 %v3815_v56, %v391_v11 }
  0xbe   : > { %v667_v24 = vadd.f32 %v635_v59, %v598_v0  ;;  %v637_v51 = vmul.f32 %v3710_v62, %v391_v11  ;;  %v911_v25 = vadd.f32 %v3794_v61, %v842_v31  ;;  %v670_v23 = vadd.f32 %v2995_v48, %v601_v3  ;;  %v5958_v0 = vld [vmem:[#allocation15_spill] sm:$0xff] }
  0xbf   : > { %v844_v20 = vadd.f32 %v3788_v46, %v735_v50  ;;  %v737_v54 = vadd.f32 %v3090_v28, %v668_v57  ;;  %v952_v9 = vmul.f32 %v3874_v18, %v773_v5  ;;  %v602_v22 = vadd.f32 %v570_v26, %v533_v21  ;;  %v4008_v46 = vld [vmem:[%s5743_s1 + $0x7] ss:$0 sm:$0xff]  ;;  %v774_v28 = vld [vmem:[#allocation2 + $0x20f] sm:$0xff] }
  0xc0   : > { %v669_v55 = vadd.f32 %v637_v51, %v600_v35  ;;  %v704_v39 = vmul.f32 %v3853_v41, %v391_v11  ;;  %v4001_v17 = vadd.f32 %v3765_v63, %v841_v10  ;;  %v1019_v56 = vmul.f32 %v3836_v42, %v773_v5  ;;  %5955 = vst [vmem:[#allocation152_spill] sm:$0xff] %v4008_v46  ;;  %v775_v31 = vld [vmem:[#allocation2 + $0x227] sm:$0xff]  ;;  %v5962_v11 = vld [vmem:[#allocation141_spill] sm:$0xff] }
  0xc1   : > { %v1086_v62 = vmul.f32 %v3886_v40, %v773_v5  ;;  %v4011_v48 = vmul.f32 %v4008_v46, %v1158_v37  ;;  %v912_v61 = vadd.f32 %v3826_v60, %v843_v32  ;;  %v913_v41 = vadd.f32 %v3869_v19, %v844_v20  ;;  %v5957_v60 = vld [vmem:[#allocation35_spill] sm:$0xff]  ;;  %v5965_v57 = vld [vmem:[#allocation145_spill] sm:$0xff] }
  0xc2   : > { %5954 = vst [vmem:[#allocation151_spill] sm:$0xff] %v4001_v17  ;;  %v736_v13 = vadd.f32 %v704_v39, %v667_v24  ;;  %v671_v63 = vadd.f32 %v2999_v49, %v602_v22  ;;  %v980_v10 = vadd.f32 %v3877_v7, %v911_v25  ;;  %v738_v47 = vadd.f32 %v3094_v29, %v669_v55  ;;  %v1159_v49 = vld [vmem:[#allocation2 + $0x210] sm:$0xff]  ;;  %v5967_v25 = vld [vmem:[#allocation146_spill] sm:$0xff] }
  0xc3   : > { %5956 = vst [vmem:[#allocation153_spill] sm:$0xff] %v4011_v48  ;;  %v739_v34 = vadd.f32 %v3110_v12, %v670_v23  ;;  %v846_v53 = vadd.f32 %v3863_v2, %v737_v54  ;;  %v886_v30 = vmul.f32 %v3762_v58, %v774_v28  ;;  %v956_v19 = vadd.f32 %v5958_v0, %v5957_v60  ;;  %v5959_v58 = vld [vmem:[#allocation140_spill] sm:$0xff]  ;;  %v5966_v24 = vld [vmem:[#allocation33_spill] sm:$0xff]  ;;  %v5968_v54 = vld [vmem:[#allocation147_spill] sm:$0xff] }
  0xc4   : > { %v845_v5 = vadd.f32 %v3820_v45, %v736_v13  ;;  %v740_v15 = vadd.f32 %v3113_v36, %v671_v63  ;;  %v953_v38 = vmul.f32 %v3874_v18, %v774_v28  ;;  %v847_v7 = vadd.f32 %v3900_v4, %v738_v47  ;;  %v5960_v45 = vld [vmem:[#allocation135_spill] sm:$0xff]  ;;  %v5961_v36 = vld [vmem:[#allocation24_spill] sm:$0xff] }
  0xc5   : > { %v848_v29 = vadd.f32 %v3928_v33, %v739_v34  ;;  %v915_v12 = vadd.f32 %v3931_v27, %v846_v53  ;;  %v981_v2 = vadd.f32 %v3910_v14, %v912_v61  ;;  %v982_v43 = vadd.f32 %v5959_v58, %v913_v41  ;;  %v5963_v4 = vld [vmem:[#allocation144_spill] sm:$0xff]  ;;  %v5969_v61 = vld [vmem:[#allocation3_spill] sm:$0xff]  ;;  %v5976_v58 = vld [vmem:[#allocation18_spill] sm:$0xff] }
  0xc6   : > { %v914_v16 = vadd.f32 %v5960_v45, %v845_v5  ;;  %v1025_v6 = vadd.f32 %v5961_v36, %v956_v19  ;;  %v1049_v21 = vadd.f32 %v5962_v11, %v980_v10  ;;  %v1020_v35 = vmul.f32 %v3836_v42, %v774_v28  ;;  %v1160_v27 = vld [vmem:[#allocation2 + $0x228] sm:$0xff]  ;;  %v4110_v36 = vld [vmem:[%s5743_s1 + $0x12] ss:$0 sm:$0xff] }
  0xc7   : > { %v1087_v59 = vmul.f32 %v3886_v40, %v774_v28  ;;  %v849_v3 = vadd.f32 %v5963_v4, %v740_v15  ;;  %v4038_v33 = vmul.f32 %v4008_v46, %v1159_v49  ;;  %v776_v14 = vld [vmem:[#allocation2 + $0x22f] sm:$0xff]  ;;  %v916_v50 = vadd.f32 %v5965_v57, %v847_v7 }
  0xc8   : > { %v917_v37 = vadd.f32 %v885_v52, %v848_v29  ;;  %v1094_v32 = vadd.f32 %v5966_v24, %v1025_v6  ;;  %v954_v26 = vmul.f32 %v3874_v18, %v775_v31  ;;  %v1021_v51 = vmul.f32 %v3836_v42, %v775_v31  ;;  %v1161_v28 = vld [vmem:[#allocation2 + $0x230] sm:$0xff]  ;;  %v4053_v52 = vld [vmem:[%s5743_s1 + $0xc] ss:$0 sm:$0xff] }
  0xc9   : > { %5964 = vst [vmem:[#allocation35_spill] sm:$0xff] %v4038_v33  ;;  %v983_v20 = vadd.f32 %v5967_v25, %v914_v16  ;;  %v984_v23 = vadd.f32 %v952_v9, %v915_v12  ;;  %v1050_v22 = vadd.f32 %v5968_v54, %v981_v2  ;;  %v1051_v55 = vadd.f32 %v1019_v56, %v982_v43  ;;  %v4062_v56 = vld [vmem:[%s5743_s1 + $0x11] ss:$0 sm:$0xff]  ;;  %v1511_v47 = vld [vmem:[#allocation2 + $0x9] sm:$0xff]  ;;  %v4091_v12 = vld [vmem:[%s5743_s1 + $0x8] ss:$0 sm:$0xff] }
  0xca   : > { %v1088_v39 = vmul.f32 %v3886_v40, %v775_v31  ;;  %v1203_v41 = vadd.f32 %v5969_v61, %v1094_v32  ;;  %v4048_v13 = vadd.f32 %v1086_v62, %v1049_v21  ;;  %v4056_v63 = vmul.f32 %v4053_v52, %v1160_v27  ;;  %v4067_v62 = vld [vmem:[%s5743_s1 + $0x16] ss:$0 sm:$0xff]  ;;  %v4071_v0 = vld [vmem:[#allocation2 + $0x29] sm:$0xff]  ;;  %v4115_v6 = vld [vmem:[%s5743_s1 + $0x17] ss:$0 sm:$0xff] }
  0xcb   : > { %v955_v9 = vmul.f32 %v3874_v18, %v776_v14  ;;  %v918_v10 = vadd.f32 %v886_v30, %v849_v3  ;;  %v1022_v34 = vmul.f32 %v3836_v42, %v776_v14  ;;  %v985_v53 = vadd.f32 %v953_v38, %v916_v50  ;;  %v5972_v15 = vld [vmem:[#allocation9_spill] sm:$0xff]  ;;  %v4078_v30 = vld [vmem:[%s5743_s1 + $0x3] ss:$0 sm:$0xff]  ;;  %v4096_v2 = vld [vmem:[%s5743_s1 + $0xd] ss:$0 sm:$0xff] }
  0xcc   : > { %5970 = vst [vmem:[#allocation15_spill] sm:$0xff] %v4048_v13  ;;  %5971 = vst [vmem:[#allocation140_spill] sm:$0xff] %v4056_v63  ;;  %v986_v5 = vadd.f32 %v954_v26, %v917_v37  ;;  %v1272_v60 = vadd.f32 %v5972_v15, %v1203_v41  ;;  %v4073_v18 = vld [vmem:[#allocation2 + $0x49] sm:$0xff]  ;;  %v1052_v19 = vadd.f32 %v1020_v35, %v983_v20  ;;  %v5980_v50 = vld [vmem:[#allocation19_spill] sm:$0xff] }
  0xcd   : > { %v1089_v49 = vmul.f32 %v3886_v40, %v776_v14  ;;  %v4082_v7 = vmul.f32 %v4053_v52, %v1161_v28  ;;  %v1053_v42 = vadd.f32 %v1021_v51, %v984_v23  ;;  %v4084_v38 = vld [vmem:[#allocation2 + $0x69] sm:$0xff]  ;;  %v4098_v31 = vadd.f32 %v1087_v59, %v1050_v22  ;;  %v4131_v14 = vld [vmem:[%s5743_s1 + $0x4] ss:$0 sm:$0xff]  ;;  %v4166_v41 = vld [vmem:[%s5743_s1 + $0x13] ss:$0 sm:$0xff] }
  0xce   : > { %v4086_v29 = vld [vmem:[#allocation2 + $0x89] sm:$0xff]  ;;  %v4100_v40 = vadd.f32 %v1088_v39, %v1051_v55  ;;  %v1341_v43 = vadd.f32 %v5976_v58, %v1272_v60  ;;  %v4117_v21 = vadd.f32 %v955_v9, %v918_v10  ;;  %v1556_v4 = vmul.f32 %v4078_v30, %v1511_v47  ;;  %v5982_v32 = vld [vmem:[#allocation7_spill] sm:$0xff]  ;;  %v4171_v9 = vld [vmem:[%s5743_s1 + $0x18] ss:$0 sm:$0xff] }
  0xcf   : > { %5973 = vst [vmem:[#allocation135_spill] sm:$0xff] %v4082_v7  ;;  %5974 = vst [vmem:[#allocation24_spill] sm:$0xff] %v4098_v31  ;;  %v4103_v45 = vld [vmem:[#allocation2 + $0x68] sm:$0xff]  ;;  %v4135_v24 = vadd.f32 %v1022_v34, %v985_v53  ;;  %v4138_v26 = vadd.f32 %v5982_v32, %v986_v5  ;;  %v1625_v25 = vmul.f32 %v4091_v12, %v4071_v0  ;;  %v5986_v55 = vld [vmem:[#allocation11_spill] sm:$0xff] }
  0xd0   : > { %5975 = vst [vmem:[#allocation141_spill] sm:$0xff] %v4100_v40  ;;  %v1378_v16 = vmul.f32 %v4103_v45, %v4062_v56  ;;  %v1896_v11 = vld [vmem:[#allocation2 + $0xa] sm:$0xff]  ;;  %5977 = vst [vmem:[#allocation144_spill] sm:$0xff] %v4117_v21  ;;  %v4147_v23 = vld [vmem:[%s5743_s1 + $0x9] ss:$0 sm:$0xff]  ;;  %v4154_v22 = vadd.f32 %v1089_v49, %v1052_v19  ;;  %v4157_v39 = vadd.f32 %v5986_v55, %v1053_v42 }
  0xd1   : > { %v4119_v35 = vld [vmem:[#allocation2 + $0x88] sm:$0xff]  ;;  %5981 = vst [vmem:[#allocation33_spill] sm:$0xff] %v4135_v24  ;;  %5983 = vst [vmem:[#allocation146_spill] sm:$0xff] %v4138_v26  ;;  %v1694_v28 = vmul.f32 %v4096_v2, %v4073_v18  ;;  %v1763_v53 = vmul.f32 %v4110_v36, %v4084_v38  ;;  %v1832_v5 = vmul.f32 %v4115_v6, %v4086_v29  ;;  %v1512_v60 = vld [vmem:[#allocation2 + $0x11] sm:$0xff] }
  0xd2   : > { %5978 = vst [vmem:[#allocation145_spill] sm:$0xff] %v4119_v35  ;;  %v1447_v59 = vmul.f32 %v4119_v35, %v4067_v62  ;;  %v4124_v3 = vld [vmem:[#allocation2 + $0x2a] sm:$0xff]  ;;  %v1410_v51 = vadd.f32 %v1378_v16, %v1341_v43  ;;  %5985 = vst [vmem:[#allocation3_spill] sm:$0xff] %v4154_v22  ;;  %v1941_v15 = vmul.f32 %v4131_v14, %v1896_v11  ;;  %v5990_v42 = vld [vmem:[#allocation38_spill] sm:$0xff] }
  0xd3   : > { %v4126_v27 = vld [vmem:[#allocation2 + $0x4a] sm:$0xff]  ;;  %5987 = vst [vmem:[#allocation9_spill] sm:$0xff] %v4157_v39  ;;  %v4181_v19 = vmul.f32 %v4147_v23, %v4124_v3  ;;  %v4217_v63 = vld [vmem:[#allocation2 + $0x72] sm:$0xff]  ;;  %v1311_v46 = vmul.f32 %v4103_v45, %v4053_v52  ;;  %v1627_v45 = vmul.f32 %v4091_v12, %v4073_v18 }
  0xd4   : > { %v5979_v57 = vld [vmem:[#allocation40_spill] sm:$0xff]  ;;  %v1479_v34 = vadd.f32 %v1447_v59, %v1410_v51  ;;  %v4188_v43 = vld [vmem:[#allocation2 + $0x31] sm:$0xff]  ;;  %5995 = vst [vmem:[#allocation19_spill] sm:$0xff] %v4217_v63 }
  0xd5   : > { %v957_v37 = vadd.f32 %v5980_v50, %v5979_v57  ;;  %v4142_v20 = vld [vmem:[#allocation2 + $0x6a] sm:$0xff]  ;;  %v5992_v50 = vld [vmem:[#allocation23_spill] sm:$0xff]  ;;  %v1626_v39 = vmul.f32 %v4091_v12, %v4188_v43  ;;  %v5998_v24 = vld [vmem:[#allocation10_spill] sm:$0xff] }
  0xd6   : > { %5984 = vst [vmem:[#allocation147_spill] sm:$0xff] %v4142_v20  ;;  %v4152_v54 = vld [vmem:[%s5743_s1 + $0xe] ss:$0 sm:$0xff]  ;;  %v4190_v16 = vld [vmem:[#allocation2 + $0x51] sm:$0xff]  ;;  %v4198_v32 = vmul.f32 %v4166_v41, %v4142_v20 }
  0xd7   : > { %v4161_v61 = vld [vmem:[#allocation2 + $0x8a] sm:$0xff]  ;;  %v4185_v49 = vmul.f32 %v4152_v54, %v4126_v27 }
  0xd8   : > { %5988 = vst [vmem:[#allocation18_spill] sm:$0xff] %v4161_v61  ;;  %v5989_v10 = vld [vmem:[#allocation28_spill] sm:$0xff]  ;;  %v4192_v59 = vld [vmem:[#allocation2 + $0x71] sm:$0xff]  ;;  %v4202_v51 = vmul.f32 %v4171_v9, %v4161_v61 }
  0xd9   : > { %v1026_v47 = vadd.f32 %v5989_v10, %v957_v37  ;;  %v5991_v57 = vld [vmem:[#allocation45_spill] sm:$0xff]  ;;  %v1588_v37 = vadd.f32 %v1556_v4, %v1479_v34  ;;  %v5993_v7 = vld [vmem:[#allocation4_spill] sm:$0xff]  ;;  %v1448_v4 = vmul.f32 %v4208_v8, %v4067_v62  ;;  %v1557_v34 = vmul.f32 %v4078_v30, %v1512_v60 }
  0xda   : > { %v958_v11 = vadd.f32 %v5992_v50, %v5991_v57  ;;  %v2730_v55 = vld [vmem:[#allocation2 + $0x70] sm:$0xff]  ;;  %v5996_v48 = vld [vmem:[#allocation32_spill] sm:$0xff] }
  0xdb   : > { %v1095_v58 = vadd.f32 %v5990_v42, %v1026_v47  ;;  %v1379_v10 = vmul.f32 %v2730_v55, %v4062_v56  ;;  %v4205_v47 = vld [vmem:[#allocation2 + $0x91] sm:$0xff]  ;;  %v1657_v21 = vadd.f32 %v1625_v25, %v1588_v37  ;;  %v6000_v25 = vld [vmem:[#allocation43_spill] sm:$0xff] }
  0xdc   : > { %v1897_v42 = vld [vmem:[#allocation2 + $0x12] sm:$0xff]  ;;  %v1027_v26 = vadd.f32 %v5996_v48, %v958_v11  ;;  %v4233_v40 = vmul.f32 %v4115_v6, %v4205_v47 }
  0xdd   : > { %v1204_v33 = vadd.f32 %v5993_v7, %v1095_v58  ;;  %v4213_v57 = vld [vmem:[#allocation2 + $0x32] sm:$0xff]  ;;  %v1695_v7 = vmul.f32 %v4096_v2, %v4190_v16  ;;  %v4226_v58 = vmul.f32 %v4110_v36, %v4192_v59  ;;  %v4236_v48 = vmul.f32 %v4131_v14, %v1897_v42 }
  0xde   : > { %v4215_v50 = vld [vmem:[#allocation2 + $0x52] sm:$0xff]  ;;  %v1096_v11 = vadd.f32 %v6000_v25, %v1027_v26  ;;  %v1726_v37 = vadd.f32 %v1694_v28, %v1657_v21  ;;  %v4241_v31 = vmul.f32 %v4147_v23, %v4213_v57  ;;  %v6008_v25 = vld [vmem:[#allocation27_spill] sm:$0xff] }
  0xdf   : > { %5994 = vst [vmem:[#allocation40_spill] sm:$0xff] %v4215_v50  ;;  %v4228_v60 = vld [vmem:[#allocation2 + $0x92] sm:$0xff]  ;;  %v1273_v22 = vadd.f32 %v5998_v24, %v1204_v33  ;;  %5999 = vst [vmem:[#allocation11_spill] sm:$0xff] %v4236_v48  ;;  %v4245_v13 = vmul.f32 %v4152_v54, %v4215_v50  ;;  %v4249_v33 = vmul.f32 %v4166_v41, %v4217_v63 }
  0xe0   : > { %5997 = vst [vmem:[#allocation7_spill] sm:$0xff] %v4228_v60  ;;  %6001 = vst [vmem:[#allocation28_spill] sm:$0xff] %v4241_v31  ;;  %v6004_v24 = vld [vmem:[#allocation22_spill] sm:$0xff]  ;;  %v4254_v42 = vmul.f32 %v4171_v9, %v4228_v60  ;;  %v6006_v26 = vld [vmem:[#allocation5_spill] sm:$0xff]  ;;  %v1795_v44 = vadd.f32 %v1763_v53, %v1726_v37 }
  0xe1   : > { %6002 = vst [vmem:[#allocation38_spill] sm:$0xff] %v4245_v13  ;;  %6003 = vst [vmem:[#allocation45_spill] sm:$0xff] %v4249_v33  ;;  %v1342_v1 = vadd.f32 %v6004_v24, %v1273_v22  ;;  %v1205_v21 = vadd.f32 %v6006_v26, %v1096_v11  ;;  %v6007_v28 = vld [vmem:[#allocation50_spill] sm:$0xff]  ;;  %v1380_v13 = vmul.f32 %v4119_v35, %v4062_v56  ;;  %v4263_v31 = vld [vmem:[#allocation2 + $0xa8] sm:$0xff] }
  0xe2   : > { %6005 = vst [vmem:[#allocation23_spill] sm:$0xff] %v4254_v42  ;;  %v959_v17 = vadd.f32 %v6008_v25, %v6007_v28  ;;  %6009 = vst [vmem:[#allocation4_spill] sm:$0xff] %v4263_v31  ;;  %v1449_v22 = vmul.f32 %v4263_v31, %v4067_v62  ;;  %v4267_v24 = vld [vmem:[#allocation2 + $0xa9] sm:$0xff]  ;;  %v1558_v26 = vmul.f32 %v4078_v30, %v4071_v0 }
  0xe3   : > { %v1411_v42 = vadd.f32 %v1379_v10, %v1342_v1  ;;  %v6010_v33 = vld [vmem:[#allocation17_spill] sm:$0xff]  ;;  %v1864_v28 = vadd.f32 %v1832_v5, %v1795_v44  ;;  %v1696_v25 = vmul.f32 %v4096_v2, %v4084_v38  ;;  %v1765_v31 = vmul.f32 %v4110_v36, %v4086_v29  ;;  %v6013_v0 = vld [vmem:[#allocation48_spill] sm:$0xff] }
  0xe4   : > { %v1274_v11 = vadd.f32 %v6010_v33, %v1205_v21  ;;  %v6011_v53 = vld [vmem:[#allocation37_spill] sm:$0xff]  ;;  %v1834_v1 = vmul.f32 %v4115_v6, %v4267_v24  ;;  %v4286_v44 = vmul.f32 %v4131_v14, %v4124_v3  ;;  %v4290_v5 = vmul.f32 %v4147_v23, %v4126_v27 }
  0xe5   : > { %v1028_v37 = vadd.f32 %v6011_v53, %v959_v17  ;;  %v1480_v48 = vadd.f32 %v1448_v4, %v1411_v42  ;;  %v4281_v10 = vld [vmem:[#allocation2 + $0xaa] sm:$0xff]  ;;  %v1973_v17 = vadd.f32 %v1941_v15, %v1864_v28  ;;  %v4294_v4 = vmul.f32 %v4152_v54, %v4142_v20  ;;  %v6017_v28 = vld [vmem:[#allocation55_spill] sm:$0xff] }
  0xe6   : > { %v1343_v35 = vadd.f32 %v1311_v46, %v1274_v11  ;;  %6012 = vst [vmem:[#allocation32_spill] sm:$0xff] %v4281_v10  ;;  %v4298_v21 = vmul.f32 %v4166_v41, %v4161_v61  ;;  %v6015_v11 = vld [vmem:[#allocation6_spill] sm:$0xff]  ;;  %v4304_v3 = vmul.f32 %v4171_v9, %v4281_v10 }
  0xe7   : > { %v1097_v33 = vadd.f32 %v6013_v0, %v1028_v37  ;;  %6014 = vst [vmem:[#allocation10_spill] sm:$0xff] %v4294_v4  ;;  %v1589_v46 = vadd.f32 %v1557_v34, %v1480_v48  ;;  %v2042_v53 = vadd.f32 %v4181_v19, %v1973_v17  ;;  %v1312_v37 = vmul.f32 %v2730_v55, %v4053_v52  ;;  %v6018_v0 = vld [vmem:[#allocation31_spill] sm:$0xff]  ;;  %v4317_v17 = vld [vmem:[#allocation2 + $0xb1] sm:$0xff] }
  0xe8   : > { %v1412_v42 = vadd.f32 %v1380_v13, %v1343_v35  ;;  %6016 = vst [vmem:[#allocation43_spill] sm:$0xff] %v4304_v3  ;;  %v960_v20 = vadd.f32 %v6018_v0, %v6017_v28  ;;  %v6019_v13 = vld [vmem:[#allocation21_spill] sm:$0xff]  ;;  %v1381_v48 = vmul.f32 %v4208_v8, %v4062_v56  ;;  %v1559_v55 = vmul.f32 %v4078_v30, %v4188_v43  ;;  %v6021_v28 = vld [vmem:[#allocation42_spill] sm:$0xff] }
  0xe9   : > { %v1206_v15 = vadd.f32 %v6015_v11, %v1097_v33  ;;  %v1658_v4 = vadd.f32 %v1626_v39, %v1589_v46  ;;  %v2111_v33 = vadd.f32 %v4185_v49, %v2042_v53  ;;  %v4313_v11 = vld [vmem:[#allocation2 + $0xb0] sm:$0xff]  ;;  %v1697_v53 = vmul.f32 %v4096_v2, %v4192_v59 }
  0xea   : > { %v1481_v34 = vadd.f32 %v1449_v22, %v1412_v42  ;;  %6020 = vst [vmem:[#allocation22_spill] sm:$0xff] %v4313_v11  ;;  %v1450_v19 = vmul.f32 %v4313_v11, %v4067_v62  ;;  %v1029_v39 = vadd.f32 %v6021_v28, %v960_v20  ;;  %v1766_v0 = vmul.f32 %v4110_v36, %v4205_v47  ;;  %v6024_v28 = vld [vmem:[#allocation26_spill] sm:$0xff] }
  0xeb   : > { %v1275_v35 = vadd.f32 %v6019_v13, %v1206_v15  ;;  %v1727_v22 = vadd.f32 %v1695_v7, %v1658_v4  ;;  %v1628_v15 = vmul.f32 %v4091_v12, %v4190_v16  ;;  %v2180_v49 = vadd.f32 %v4198_v32, %v2111_v33  ;;  %v6022_v13 = vld [vmem:[#allocation53_spill] sm:$0xff] }
  0xec   : > { %v1590_v46 = vadd.f32 %v1558_v26, %v1481_v34  ;;  %v1098_v3 = vadd.f32 %v6022_v13, %v1029_v39  ;;  %v1835_v7 = vmul.f32 %v4115_v6, %v4317_v17  ;;  %v1944_v32 = vmul.f32 %v4131_v14, %v4213_v57 }
  0xed   : > { %v1344_v42 = vadd.f32 %v1312_v37, %v1275_v35  ;;  %v1796_v43 = vadd.f32 %v4226_v58, %v1727_v22  ;;  %v2249_v26 = vadd.f32 %v4202_v51, %v2180_v49  ;;  %v4338_v4 = vmul.f32 %v4147_v23, %v4215_v50  ;;  %v6023_v37 = vld [vmem:[#allocation16_spill] sm:$0xff]  ;;  %v6025_v22 = vld [vmem:[#allocation145_spill] sm:$0xff] }
  0xee   : > { %v1659_v11 = vadd.f32 %v1627_v45, %v1590_v46  ;;  %v1207_v34 = vadd.f32 %v6023_v37, %v1098_v3  ;;  %v4342_v45 = vld [vmem:[#allocation2 + $0xb2] sm:$0xff]  ;;  %v4350_v57 = vmul.f32 %v4166_v41, %v4228_v60  ;;  %v1313_v3 = vmul.f32 %v6025_v22, %v4053_v52  ;;  %v6026_v46 = vld [vmem:[#allocation11_spill] sm:$0xff]  ;;  %v4365_v50 = vld [vmem:[#allocation2 + $0xc9] sm:$0xff] }
  0xef   : > { %v1413_v20 = vadd.f32 %v1381_v48, %v1344_v42  ;;  %v1865_v35 = vadd.f32 %v4233_v40, %v1796_v43  ;;  %v4346_v48 = vmul.f32 %v4152_v54, %v4217_v63  ;;  %v2313_v51 = vmul.f32 0.70710677, %v2249_v26  ;;  %v6028_v42 = vld [vmem:[#allocation36_spill] sm:$0xff] }
  0xf0   : > { %v1728_v33 = vadd.f32 %v1696_v25, %v1659_v11  ;;  %v1276_v39 = vadd.f32 %v6024_v28, %v1207_v34  ;;  %v4360_v13 = vmul.f32 %v4171_v9, %v4342_v45  ;;  %v6030_v34 = vld [vmem:[#allocation28_spill] sm:$0xff] }
  0xf1   : > { %v1482_v58 = vadd.f32 %v1450_v19, %v1413_v20  ;;  %v1974_v40 = vadd.f32 %v6026_v46, %v1865_v35  ;;  %v6027_v19 = vld [vmem:[#allocation60_spill] sm:$0xff]  ;;  %2650 = verf.f32 %v2313_v51  ;;  %v1560_v51 = vmul.f32 %v4078_v30, %v4073_v18 }
  0xf2   : > { %v1797_v25 = vadd.f32 %v1765_v31, %v1728_v33  ;;  %v961_v49 = vadd.f32 %v6028_v42, %v6027_v19  ;;  %v1345_v43 = vadd.f32 %v1313_v3, %v1276_v39  ;;  %v6029_v20 = vld [vmem:[#allocation4_spill] sm:$0xff]  ;;  %v6031_v31 = vld [vmem:[#allocation47_spill] sm:$0xff]  ;;  %v1629_v39 = vmul.f32 %v4091_v12, %v4084_v38  ;;  %v6032_v3 = vld [vmem:[#allocation38_spill] sm:$0xff] }
  0xf3   : > { %v1591_v11 = vadd.f32 %v1559_v55, %v1482_v58  ;;  %v1382_v37 = vmul.f32 %v6029_v20, %v4062_v56  ;;  %v2043_v28 = vadd.f32 %v6030_v34, %v1974_v40  ;;  %v4368_v33 = vld [vmem:[#allocation2 + $0xc8] sm:$0xff]  ;;  %v6033_v40 = vld [vmem:[#allocation58_spill] sm:$0xff]  ;;  %v1698_v19 = vmul.f32 %v4096_v2, %v4086_v29 }
  0xf4   : > { %v1866_v60 = vadd.f32 %v1834_v1, %v1797_v25  ;;  %v1030_v55 = vadd.f32 %v6031_v31, %v961_v49  ;;  %v1451_v58 = vmul.f32 %v4368_v33, %v4067_v62  ;;  %v1767_v42 = vmul.f32 %v4110_v36, %v4267_v24  ;;  %v6034_v49 = vld [vmem:[#allocation45_spill] sm:$0xff] }
  0xf5   : > { %v1660_v63 = vadd.f32 %v1628_v15, %v1591_v11  ;;  %v1414_v35 = vadd.f32 %v1382_v37, %v1345_v43  ;;  %v2112_v46 = vadd.f32 %v6032_v3, %v2043_v28  ;;  %v1836_v18 = vmul.f32 %v4115_v6, %v4365_v50  ;;  %v6035_v28 = vld [vmem:[#allocation20_spill] sm:$0xff]  ;;  %v6038_v3 = vld [vmem:[#allocation10_spill] sm:$0xff] }
  0xf6   : > { %v1975_v1 = vadd.f32 %v4286_v44, %v1866_v60  ;;  %v1099_v25 = vadd.f32 %v6033_v40, %v1030_v55  ;;  %v1945_v44 = vmul.f32 %v4131_v14, %v4126_v27  ;;  %v2083_v55 = vmul.f32 %v4152_v54, %v4161_v61 }
  0xf7   : > { %v1729_v15 = vadd.f32 %v1697_v53, %v1660_v63  ;;  %v1483_v11 = vadd.f32 %v1451_v58, %v1414_v35  ;;  %v2181_v43 = vadd.f32 %v6034_v49, %v2112_v46  ;;  %v6036_v53 = vld [vmem:[#allocation147_spill] sm:$0xff]  ;;  %v1314_v27 = vmul.f32 %v4208_v8, %v4053_v52 }
  0xf8   : > { %v2044_v37 = vadd.f32 %v4290_v5, %v1975_v1  ;;  %v1208_v60 = vadd.f32 %v6035_v28, %v1099_v25  ;;  %v2014_v31 = vmul.f32 %v4147_v23, %v6036_v53  ;;  %v6037_v35 = vld [vmem:[#allocation23_spill] sm:$0xff]  ;;  %v6039_v5 = vld [vmem:[#allocation30_spill] sm:$0xff]  ;;  %v6041_v25 = vld [vmem:[#allocation41_spill] sm:$0xff]  ;;  %v2281_v49 = vmul.f32 0.5, %v2249_v26 }
  0xf9   : > { %v1798_v34 = vadd.f32 %v1766_v0, %v1729_v15  ;;  %v1592_v63 = vadd.f32 %v1560_v51, %v1483_v11  ;;  %v4395_v58 = vadd.f32 %v6037_v35, %v2181_v43  ;;  %v4401_v51 = vmul.f32 %v4166_v41, %v4281_v10  ;;  %v6040_v15 = vld [vmem:[#allocation65_spill] sm:$0xff]  ;;  %v6043_v35 = vld [vmem:[#allocation52_spill] sm:$0xff]  ;;  %v6044_v10 = vld [vmem:[#allocation43_spill] sm:$0xff] }
  0xfa   : > { %v2113_v46 = vadd.f32 %v6038_v3, %v2044_v37  ;;  %v1277_v0 = vadd.f32 %v6039_v5, %v1208_v60  ;;  %v962_v11 = vadd.f32 %v6041_v25, %v6040_v15  ;;  %v6042_v60 = vld [vmem:[#allocation22_spill] sm:$0xff]  ;;  %v4421_v26 = vld [vmem:[#allocation2 + $0xca] sm:$0xff] }
  0xfb   : > { %v1867_v40 = vadd.f32 %v1835_v7, %v1798_v34  ;;  %v1661_v1 = vadd.f32 %v1629_v39, %v1592_v63  ;;  %v2314_v43 = vmul.f32 0.70710677, %v4395_v58  ;;  %v2651_v34 = vpop.eup %2650  ;;  %v1383_v63 = vmul.f32 %v6042_v60, %v4062_v56  ;;  %6045 = vst [vmem:[#allocation5_spill] sm:$0xff] %v4421_v26 }
  0xfc   : > { %v2182_v37 = vadd.f32 %v4298_v21, %v2113_v46  ;;  %v1346_v39 = vadd.f32 %v1314_v27, %v1277_v0  ;;  %v1031_v3 = vadd.f32 %v6043_v35, %v962_v11  ;;  %v2377_v5 = vadd.f32 1.0, %v2651_v34 }
  0xfd   : > { %v1976_v7 = vadd.f32 %v1944_v32, %v1867_v40  ;;  %v1730_v28 = vadd.f32 %v1698_v19, %v1661_v1  ;;  %2652 = verf.f32 %v2314_v43  ;;  %v4423_v19 = vld [vmem:[#allocation2 + $0xd0] sm:$0xff]  ;;  %v6047_v40 = vld [vmem:[#allocation63_spill] sm:$0xff]  ;;  %v1561_v27 = vmul.f32 %v4078_v30, %v4190_v16 }
  0xfe   : > { %v2251_v61 = vadd.f32 %v6044_v10, %v2182_v37  ;;  %v1415_v32 = vadd.f32 %v1383_v63, %v1346_v39  ;;  %6046 = vst [vmem:[#allocation50_spill] sm:$0xff] %v4423_v19  ;;  %v1452_v46 = vmul.f32 %v4423_v19, %v4067_v62  ;;  %v1100_v10 = vadd.f32 %v6047_v40, %v1031_v3  ;;  %v6048_v43 = vld [vmem:[#allocation25_spill] sm:$0xff] }
  0xff   : > { %v2045_v15 = vadd.f32 %v4338_v4, %v1976_v7  ;;  %v1799_v21 = vadd.f32 %v1767_v42, %v1730_v28  ;;  %v2409_v0 = vmul.f32 %v2377_v5, %v2281_v49  ;;  %v4431_v42 = vld [vmem:[#allocation2 + $0xd1] sm:$0xff]  ;;  %v6049_v7 = vld [vmem:[#allocation152_spill] sm:$0xff]  ;;  %v1630_v16 = vmul.f32 %v4091_v12, %v4192_v59 }
 0x100   : > { %v2315_v4 = vmul.f32 0.70710677, %v2251_v61  ;;  %v1484_v11 = vadd.f32 %v1452_v46, %v1415_v32  ;;  %v1209_v37 = vadd.f32 %v6048_v43, %v1100_v10  ;;  %v1246_v34 = vmul.f32 %v6025_v22, %v6049_v7  ;;  %v6050_v46 = vld [vmem:[#allocation40_spill] sm:$0xff] }
 0x101   : > { %v2114_v1 = vadd.f32 %v4346_v48, %v2045_v15  ;;  %v1868_v25 = vadd.f32 %v1836_v18, %v1799_v21  ;;  %2441 = vst.msk [vmem:[%s4419_s9] sm:$0xff] %vm233_vm0, %v2409_v0  ;;  %v2221_v48 = vmul.f32 %v4171_v9, %v4421_v26  ;;  %v1315_v63 = vmul.f32 %v6029_v20, %v4053_v52  ;;  %v6052_v0 = vld [vmem:[#allocation7_spill] sm:$0xff] }
 0x102   : > { %2654 = verf.f32 %v2315_v4  ;;  %v1593_v28 = vadd.f32 %v1561_v27, %v1484_v11  ;;  %v1278_v39 = vadd.f32 %v1246_v34, %v1209_v37  ;;  %v1699_v22 = vmul.f32 %v4096_v2, %v4205_v47  ;;  %v4462_v11 = vld [vmem:[#allocation2 + $0xe8] sm:$0xff] }
 0x103   : > { %v2183_v49 = vadd.f32 %v4350_v57, %v2114_v1  ;;  %v1977_v18 = vadd.f32 %v1945_v44, %v1868_v25  ;;  %v1768_v57 = vmul.f32 %v4110_v36, %v4317_v17  ;;  %v1837_v3 = vmul.f32 %v4115_v6, %v4431_v42  ;;  %v4460_v25 = vld [vmem:[#allocation2 + $0xd2] sm:$0xff] }
 0x104   : > { %v1662_v15 = vadd.f32 %v1630_v16, %v1593_v28  ;;  %v1347_v21 = vadd.f32 %v1315_v63, %v1278_v39  ;;  %v1384_v44 = vmul.f32 %v4368_v33, %v4062_v56  ;;  %v1946_v40 = vmul.f32 %v4131_v14, %v6050_v46  ;;  %v6053_v16 = vld [vmem:[#allocation70_spill] sm:$0xff] }
 0x105   : > { %v2252_v35 = vadd.f32 %v4360_v13, %v2183_v49  ;;  %v2046_v5 = vadd.f32 %v2014_v31, %v1977_v18  ;;  %v6051_v13 = vld [vmem:[#allocation19_spill] sm:$0xff]  ;;  %v2084_v4 = vmul.f32 %v4152_v54, %v6052_v0  ;;  %v1453_v43 = vmul.f32 %v4462_v11, %v4067_v62  ;;  %v6054_v18 = vld [vmem:[#allocation46_spill] sm:$0xff] }
 0x106   : > { %v2015_v10 = vmul.f32 %v4147_v23, %v6051_v13  ;;  %v1731_v27 = vadd.f32 %v1699_v22, %v1662_v15  ;;  %v1416_v31 = vadd.f32 %v1384_v44, %v1347_v21  ;;  %v2282_v34 = vmul.f32 0.5, %v4395_v58  ;;  %v4476_v21 = vld [vmem:[#allocation2 + $0xe9] sm:$0xff] }
 0x107   : > { %v2316_v32 = vmul.f32 0.70710677, %v2252_v35  ;;  %v2115_v1 = vadd.f32 %v2083_v55, %v2046_v5  ;;  %v2653_v37 = vpop.eup %2652  ;;  %v1562_v49 = vmul.f32 %v4078_v30, %v4084_v38  ;;  %v963_v28 = vadd.f32 %v6054_v18, %v6053_v16  ;;  %v6055_v44 = vld [vmem:[#allocation57_spill] sm:$0xff] }
 0x108   : > { %v2378_v55 = vadd.f32 1.0, %v2653_v37  ;;  %v1800_v63 = vadd.f32 %v1768_v57, %v1731_v27  ;;  %v1485_v22 = vadd.f32 %v1453_v43, %v1416_v31  ;;  %v2283_v5 = vmul.f32 0.5, %v2251_v61 }
 0x109   : > { %2656 = verf.f32 %v2316_v32  ;;  %v2184_v39 = vadd.f32 %v4401_v51, %v2115_v1  ;;  %v2153_v15 = vmul.f32 %v4166_v41, %v4342_v45  ;;  %v2222_v58 = vmul.f32 %v4171_v9, %v4460_v25  ;;  %v6056_v1 = vld [vmem:[#allocation68_spill] sm:$0xff] }
 0x10a   : > { %v1032_v38 = vadd.f32 %v6055_v44, %v963_v28  ;;  %v2410_v32 = vmul.f32 %v2378_v55, %v2282_v34  ;;  %v1869_v16 = vadd.f32 %v1837_v3, %v1800_v63  ;;  %v1594_v37 = vadd.f32 %v1562_v49, %v1485_v22  ;;  %v6057_v28 = vld [vmem:[#allocation29_spill] sm:$0xff] }
 0x10b   : > { %v2253_v46 = vadd.f32 %v2221_v48, %v2184_v39  ;;  %v1631_v51 = vmul.f32 %v4091_v12, %v4086_v29  ;;  %v1700_v61 = vmul.f32 %v4096_v2, %v4267_v24  ;;  %v1769_v57 = vmul.f32 %v4110_v36, %v4365_v50 }
 0x10c   : > { %v2655_v18 = vpop.eup %2654  ;;  %v1101_v27 = vadd.f32 %v6056_v1, %v1032_v38  ;;  %2442 = vst.msk [vmem:[%s4419_s9 + $0x8] sm:$0xff] %vm233_vm0, %v2410_v32  ;;  %v1978_v48 = vadd.f32 %v1946_v40, %v1869_v16  ;;  %v1838_v3 = vmul.f32 %v4115_v6, %v4476_v21  ;;  %v1947_v49 = vmul.f32 %v4131_v14, %v6036_v53  ;;  %v4495_v38 = vld [vmem:[#allocation2 + $0xea] sm:$0xff]  ;;  %v6059_v40 = vld [vmem:[#allocation18_spill] sm:$0xff] }
 0x10d   : > { %v2379_v31 = vadd.f32 1.0, %v2655_v18  ;;  %v2317_v43 = vmul.f32 0.70710677, %v2253_v46  ;;  %v1663_v34 = vadd.f32 %v1631_v51, %v1594_v37  ;;  %v1247_v39 = vmul.f32 %v4208_v8, %v6049_v7  ;;  %6058 = vst [vmem:[#allocation27_spill] sm:$0xff] %v4495_v38  ;;  %v6060_v51 = vld [vmem:[#allocation32_spill] sm:$0xff] }
 0x10e   : > { %v1210_v55 = vadd.f32 %v6057_v28, %v1101_v27  ;;  %v2284_v22 = vmul.f32 0.5, %v2252_v35  ;;  %v2047_v44 = vadd.f32 %v2015_v10, %v1978_v48  ;;  %v2016_v16 = vmul.f32 %v4147_v23, %v6059_v40  ;;  %v6061_v10 = vld [vmem:[#allocation75_spill] sm:$0xff]  ;;  %v4513_v28 = vld [vmem:[#allocation2 + $0xf0] sm:$0xff] }
 0x10f   : > { %v2411_v63 = vmul.f32 %v2379_v31, %v2283_v5  ;;  %2658 = verf.f32 %v2317_v43  ;;  %v1732_v32 = vadd.f32 %v1700_v61, %v1663_v34  ;;  %v1316_v37 = vmul.f32 %v6042_v60, %v4053_v52  ;;  %v6062_v5 = vld [vmem:[#allocation51_spill] sm:$0xff]  ;;  %6063 = vst [vmem:[#allocation17_spill] sm:$0xff] %v4513_v28 }
 0x110   : > { %v1279_v18 = vadd.f32 %v1247_v39, %v1210_v55  ;;  %v2116_v53 = vadd.f32 %v2084_v4, %v2047_v44  ;;  %v2085_v8 = vmul.f32 %v4152_v54, %v6060_v51  ;;  %v2154_v35 = vmul.f32 %v4166_v41, %v4421_v26  ;;  %v6064_v39 = vld [vmem:[#allocation62_spill] sm:$0xff] }
 0x111   : > { %2443 = vst.msk [vmem:[%s4419_s9 + $0x10] sm:$0xff] %vm233_vm0, %v2411_v63  ;;  %v964_v1 = vadd.f32 %v6062_v5, %v6061_v10  ;;  %v1801_v27 = vadd.f32 %v1769_v57, %v1732_v32  ;;  %v2223_v31 = vmul.f32 %v4171_v9, %v4495_v38  ;;  %v1385_v48 = vmul.f32 %v4423_v19, %v4062_v56  ;;  %v4518_v57 = vld [vmem:[#allocation2 + $0xf1] sm:$0xff] }
 0x112   : > { %v1348_v43 = vadd.f32 %v1316_v37, %v1279_v18  ;;  %v2185_v4 = vadd.f32 %v2153_v15, %v2116_v53  ;;  %v1454_v55 = vmul.f32 %v4513_v28, %v4067_v62  ;;  %v1563_v32 = vmul.f32 %v4078_v30, %v4192_v59  ;;  %v6065_v5 = vld [vmem:[#allocation73_spill] sm:$0xff] }
 0x113   : > { %v2657_v61 = vpop.eup %2656  ;;  %v1033_v63 = vadd.f32 %v6064_v39, %v964_v1  ;;  %v1870_v44 = vadd.f32 %v1838_v3, %v1801_v27  ;;  %v1632_v18 = vmul.f32 %v4091_v12, %v4205_v47  ;;  %v1701_v53 = vmul.f32 %v4096_v2, %v4317_v17 }
 0x114   : > { %v2380_v34 = vadd.f32 1.0, %v2657_v61  ;;  %v1417_v10 = vadd.f32 %v1385_v48, %v1348_v43  ;;  %v2254_v15 = vadd.f32 %v2222_v58, %v2185_v4  ;;  %v2285_v28 = vmul.f32 0.5, %v2253_v46  ;;  %v6066_v43 = vld [vmem:[#allocation34_spill] sm:$0xff] }
 0x115   : > { %v1102_v61 = vadd.f32 %v6065_v5, %v1033_v63  ;;  %v1979_v19 = vadd.f32 %v1947_v49, %v1870_v44  ;;  %v1770_v3 = vmul.f32 %v4110_v36, %v4431_v42  ;;  %v1839_v59 = vmul.f32 %v4115_v6, %v4518_v57  ;;  %v4536_v4 = vld [vmem:[#allocation2 + $0xf2] sm:$0xff]  ;;  %v6067_v5 = vld [vmem:[#allocation80_spill] sm:$0xff] }
 0x116   : > { %v2412_v37 = vmul.f32 %v2380_v34, %v2284_v22  ;;  %v1486_v1 = vadd.f32 %v1454_v55, %v1417_v10  ;;  %v2318_v27 = vmul.f32 0.70710677, %v2254_v15  ;;  %v1248_v58 = vmul.f32 %v6029_v20, %v6049_v7 }
 0x117   : > { %v1211_v22 = vadd.f32 %v6066_v43, %v1102_v61  ;;  %v2048_v48 = vadd.f32 %v2016_v16, %v1979_v19  ;;  %v1948_v46 = vmul.f32 %v4131_v14, %v6051_v13  ;;  %v2017_v49 = vmul.f32 %v4147_v23, %v6052_v0  ;;  %v6068_v61 = vld [vmem:[#allocation56_spill] sm:$0xff] }
 0x118   : > { %2444 = vst.msk [vmem:[%s4419_s9 + $0x18] sm:$0xff] %vm233_vm0, %v2412_v37  ;;  %v1595_v34 = vadd.f32 %v1563_v32, %v1486_v1  ;;  %2660 = verf.f32 %v2318_v27  ;;  %v2086_v39 = vmul.f32 %v4152_v54, %v4342_v45  ;;  %v1317_v44 = vmul.f32 %v4368_v33, %v4053_v52 }
 0x119   : > { %v2659_v55 = vpop.eup %2658  ;;  %v1280_v63 = vadd.f32 %v1248_v58, %v1211_v22  ;;  %v2117_v19 = vadd.f32 %v2085_v8, %v2048_v48  ;;  %v2155_v10 = vmul.f32 %v4166_v41, %v4460_v25  ;;  %v4550_v13 = vmul.f32 %v4171_v9, %v4536_v4  ;;  %v4556_v8 = vld [vmem:[#allocation2 + $0x108] sm:$0xff] }
 0x11a   : > { %v2381_v20 = vadd.f32 1.0, %v2659_v55  ;;  %v1664_v16 = vadd.f32 %v1632_v18, %v1595_v34  ;;  %v1386_v37 = vmul.f32 %v4462_v11, %v4062_v56  ;;  %v965_v1 = vadd.f32 %v6068_v61, %v6067_v5  ;;  %v4560_v58 = vld [vmem:[#allocation2 + $0x109] sm:$0xff] }
 0x11b   : > { %v1349_v32 = vadd.f32 %v1317_v44, %v1280_v63  ;;  %v2186_v43 = vadd.f32 %v2154_v35, %v2117_v19  ;;  %v1455_v18 = vmul.f32 %v4556_v8, %v4067_v62  ;;  %v1564_v34 = vmul.f32 %v4078_v30, %v4086_v29  ;;  %v6069_v63 = vld [vmem:[#allocation67_spill] sm:$0xff] }
 0x11c   : > { %v2413_v27 = vmul.f32 %v2381_v20, %v2285_v28  ;;  %v1733_v22 = vadd.f32 %v1701_v53, %v1664_v16  ;;  %v1633_v55 = vmul.f32 %v4091_v12, %v4267_v24  ;;  %v1034_v44 = vadd.f32 %v6069_v63, %v965_v1 }
 0x11d   : > { %v1418_v48 = vadd.f32 %v1386_v37, %v1349_v32  ;;  %v2255_v35 = vadd.f32 %v2223_v31, %v2186_v43  ;;  %v1702_v53 = vmul.f32 %v4096_v2, %v4365_v50  ;;  %v1771_v20 = vmul.f32 %v4110_v36, %v4476_v21  ;;  %v4575_v32 = vld [vmem:[#allocation2 + $0x10a] sm:$0xff]  ;;  %v6071_v37 = vld [vmem:[#allocation78_spill] sm:$0xff]  ;;  %v6072_v43 = vld [vmem:[#allocation39_spill] sm:$0xff] }
 0x11e   : > { %2445 = vst.msk [vmem:[%s4419_s9 + $0x20] sm:$0xff] %vm233_vm0, %v2413_v27  ;;  %v1802_v28 = vadd.f32 %v1770_v3, %v1733_v22  ;;  %v2286_v19 = vmul.f32 0.5, %v2254_v15  ;;  %v1840_v29 = vmul.f32 %v4115_v6, %v4560_v58  ;;  %6070 = vst [vmem:[#allocation37_spill] sm:$0xff] %v4575_v32  ;;  %v1103_v5 = vadd.f32 %v6071_v37, %v1034_v44  ;;  %v6075_v37 = vld [vmem:[#allocation85_spill] sm:$0xff] }
 0x11f   : > { %v1487_v16 = vadd.f32 %v1455_v18, %v1418_v48  ;;  %v2319_v61 = vmul.f32 0.70710677, %v2255_v35  ;;  %v1949_v31 = vmul.f32 %v4131_v14, %v6059_v40  ;;  %v2018_v3 = vmul.f32 %v4147_v23, %v6060_v51 }
 0x120   : > { %v1871_v1 = vadd.f32 %v1839_v59, %v1802_v28  ;;  %v4584_v15 = vmul.f32 %v4152_v54, %v4421_v26  ;;  %v1212_v22 = vadd.f32 %v6072_v43, %v1103_v5  ;;  %v1249_v18 = vmul.f32 %v6042_v60, %v6049_v7  ;;  %v6074_v28 = vld [vmem:[#allocation50_spill] sm:$0xff]  ;;  %v6076_v5 = vld [vmem:[#allocation61_spill] sm:$0xff] }
 0x121   : > { %v1596_v27 = vadd.f32 %v1564_v34, %v1487_v16  ;;  %2662 = verf.f32 %v2319_v61  ;;  %v4591_v59 = vmul.f32 %v4166_v41, %v4495_v38  ;;  %v4595_v40 = vmul.f32 %v4171_v9, %v4575_v32  ;;  %v4603_v38 = vld [vmem:[#allocation2 + $0x110] sm:$0xff] }
 0x122   : > { %v1980_v48 = vadd.f32 %v1948_v46, %v1871_v1  ;;  %v2661_v34 = vpop.eup %2660  ;;  %v1281_v44 = vadd.f32 %v1249_v18, %v1212_v22  ;;  %v1318_v16 = vmul.f32 %v6074_v28, %v4053_v52  ;;  %v966_v43 = vadd.f32 %v6076_v5, %v6075_v37  ;;  %v6077_v46 = vld [vmem:[#allocation17_spill] sm:$0xff]  ;;  %v6078_v18 = vld [vmem:[#allocation72_spill] sm:$0xff] }
 0x123   : > { %6073 = vst [vmem:[#allocation48_spill] sm:$0xff] %v4595_v40  ;;  %v1665_v63 = vadd.f32 %v1633_v55, %v1596_v27  ;;  %v2382_v60 = vadd.f32 1.0, %v2661_v34  ;;  %v1387_v1 = vmul.f32 %v6077_v46, %v4062_v56  ;;  %v1456_v32 = vmul.f32 %v4603_v38, %v4067_v62  ;;  %v4607_v27 = vld [vmem:[#allocation2 + $0x111] sm:$0xff] }
 0x124   : > { %v2049_v61 = vadd.f32 %v2017_v49, %v1980_v48  ;;  %v1350_v55 = vadd.f32 %v1318_v16, %v1281_v44  ;;  %v1565_v22 = vmul.f32 %v4078_v30, %v4205_v47  ;;  %v1035_v37 = vadd.f32 %v6078_v18, %v966_v43  ;;  %v6082_v18 = vld [vmem:[#allocation66_spill] sm:$0xff] }
 0x125   : > { %v1734_v40 = vadd.f32 %v1702_v53, %v1665_v63  ;;  %v2414_v34 = vmul.f32 %v2382_v60, %v2286_v19  ;;  %v1634_v48 = vmul.f32 %v4091_v12, %v4317_v17  ;;  %v1703_v5 = vmul.f32 %v4096_v2, %v4431_v42  ;;  %v6079_v63 = vld [vmem:[#allocation83_spill] sm:$0xff] }
 0x126   : > { %v2118_v49 = vadd.f32 %v2086_v39, %v2049_v61  ;;  %v1419_v28 = vadd.f32 %v1387_v1, %v1350_v55  ;;  %v1772_v53 = vmul.f32 %v4110_v36, %v4518_v57  ;;  %v1104_v44 = vadd.f32 %v6079_v63, %v1035_v37  ;;  %v4625_v61 = vld [vmem:[#allocation2 + $0x112] sm:$0xff] }
 0x127   : > { %v1803_v46 = vadd.f32 %v1771_v20, %v1734_v40  ;;  %2446 = vst.msk [vmem:[%s4419_s9 + $0x28] sm:$0xff] %vm233_vm0, %v2414_v34  ;;  %v2287_v47 = vmul.f32 0.5, %v2255_v35  ;;  %v1841_v39 = vmul.f32 %v4115_v6, %v4607_v27  ;;  %v1950_v19 = vmul.f32 %v4131_v14, %v6052_v0  ;;  %v6080_v20 = vld [vmem:[#allocation44_spill] sm:$0xff] }
 0x128   : > { %v2187_v16 = vadd.f32 %v2155_v10, %v2118_v49  ;;  %v1488_v60 = vadd.f32 %v1456_v32, %v1419_v28  ;;  %v1213_v40 = vadd.f32 %v6080_v20, %v1104_v44  ;;  %v1250_v1 = vmul.f32 %v4368_v33, %v6049_v7  ;;  %v4655_v20 = vld [vmem:[#allocation2 + $0x129] sm:$0xff] }
 0x129   : > { %v1872_v43 = vadd.f32 %v1840_v29, %v1803_v46  ;;  %v2019_v10 = vmul.f32 %v4147_v23, %v4342_v45  ;;  %v4635_v35 = vmul.f32 %v4152_v54, %v4460_v25  ;;  %v1319_v0 = vmul.f32 %v4462_v11, %v4053_v52  ;;  %v6081_v46 = vld [vmem:[#allocation90_spill] sm:$0xff]  ;;  %6083 = vst [vmem:[#allocation6_spill] sm:$0xff] %v4655_v20 }
 0x12a   : > { %v2256_v55 = vadd.f32 %v4550_v13, %v2187_v16  ;;  %v1597_v32 = vadd.f32 %v1565_v22, %v1488_v60  ;;  %v1282_v28 = vadd.f32 %v1250_v1, %v1213_v40  ;;  %v967_v37 = vadd.f32 %v6082_v18, %v6081_v46  ;;  %v6084_v1 = vld [vmem:[#allocation77_spill] sm:$0xff] }
 0x12b   : > { %v1981_v29 = vadd.f32 %v1949_v31, %v1872_v43  ;;  %v2663_v34 = vpop.eup %2662  ;;  %v4643_v13 = vmul.f32 %v4166_v41, %v4536_v4  ;;  %v4647_v49 = vmul.f32 %v4171_v9, %v4625_v61  ;;  %v1388_v63 = vmul.f32 %v4556_v8, %v4062_v56  ;;  %v4651_v43 = vld [vmem:[#allocation2 + $0x128] sm:$0xff] }
 0x12c   : > { %v2320_v33 = vmul.f32 0.70710677, %v2256_v55  ;;  %v2383_v44 = vadd.f32 1.0, %v2663_v34  ;;  %v1666_v22 = vadd.f32 %v1634_v48, %v1597_v32  ;;  %v1351_v16 = vadd.f32 %v1319_v0, %v1282_v28  ;;  %v6085_v28 = vld [vmem:[#allocation88_spill] sm:$0xff] }
 0x12d   : > { %v2050_v31 = vadd.f32 %v2018_v3, %v1981_v29  ;;  %v1457_v60 = vmul.f32 %v4651_v43, %v4067_v62  ;;  %v1566_v40 = vmul.f32 %v4078_v30, %v4267_v24  ;;  %v1036_v46 = vadd.f32 %v6084_v1, %v967_v37 }
 0x12e   : > { %2664 = verf.f32 %v2320_v33  ;;  %v2415_v18 = vmul.f32 %v2383_v44, %v2287_v47  ;;  %v1735_v3 = vadd.f32 %v1703_v5, %v1666_v22  ;;  %v1420_v48 = vadd.f32 %v1388_v63, %v1351_v16  ;;  %v4673_v5 = vld [vmem:[#allocation2 + $0x12a] sm:$0xff]  ;;  %v6087_v16 = vld [vmem:[#allocation50_spill] sm:$0xff] }
 0x12f   : > { %v2119_v34 = vadd.f32 %v4584_v15, %v2050_v31  ;;  %v1635_v0 = vmul.f32 %v4091_v12, %v4365_v50  ;;  %v1704_v29 = vmul.f32 %v4096_v2, %v4476_v21  ;;  %v1773_v32 = vmul.f32 %v4110_v36, %v4560_v58  ;;  %v6086_v31 = vld [vmem:[#allocation49_spill] sm:$0xff] }
 0x130   : > { %v1105_v33 = vadd.f32 %v6085_v28, %v1036_v46  ;;  %2447 = vst.msk [vmem:[%s4419_s9 + $0x30] sm:$0xff] %vm233_vm0, %v2415_v18  ;;  %v1804_v47 = vadd.f32 %v1772_v53, %v1735_v3  ;;  %v1489_v37 = vadd.f32 %v1457_v60, %v1420_v48  ;;  %v1842_v15 = vmul.f32 %v4115_v6, %v4655_v20  ;;  %v6088_v46 = vld [vmem:[#allocation48_spill] sm:$0xff]  ;;  %v6089_v18 = vld [vmem:[#allocation27_spill] sm:$0xff]  ;;  %v6090_v3 = vld [vmem:[#allocation37_spill] sm:$0xff] }
 0x131   : > { %v2188_v24 = vadd.f32 %v4591_v59, %v2119_v34  ;;  %v1951_v63 = vmul.f32 %v4131_v14, %v6060_v51  ;;  %v2020_v44 = vmul.f32 %v4147_v23, %v4421_v26  ;;  %v1251_v1 = vmul.f32 %v6087_v16, %v6049_v7  ;;  %v6091_v28 = vld [vmem:[#allocation17_spill] sm:$0xff]  ;;  %v6093_v26 = vld [vmem:[#allocation71_spill] sm:$0xff] }
 0x132   : > { %v1214_v22 = vadd.f32 %v6086_v31, %v1105_v33  ;;  %v1873_v53 = vadd.f32 %v1841_v39, %v1804_v47  ;;  %v1598_v60 = vadd.f32 %v1566_v40, %v1489_v37  ;;  %v4687_v34 = vmul.f32 %v4152_v54, %v6089_v18  ;;  %v6092_v31 = vld [vmem:[#allocation95_spill] sm:$0xff]  ;;  %v4705_v20 = vld [vmem:[#allocation2 + $0x130] sm:$0xff] }
 0x133   : > { %v4683_v59 = vadd.f32 %v6088_v46, %v2188_v24  ;;  %v4691_v51 = vmul.f32 %v4166_v41, %v6090_v3  ;;  %v1320_v33 = vmul.f32 %v6091_v28, %v4053_v52  ;;  %v968_v7 = vadd.f32 %v6093_v26, %v6092_v31 }
 0x134   : > { %v1283_v48 = vadd.f32 %v1251_v1, %v1214_v22  ;;  %v1982_v16 = vadd.f32 %v1950_v19, %v1873_v53  ;;  %v1667_v39 = vadd.f32 %v1635_v0, %v1598_v60  ;;  %v4700_v40 = vmul.f32 %v4171_v9, %v4673_v5  ;;  %v6094_v22 = vld [vmem:[#allocation82_spill] sm:$0xff] }
 0x135   : > { %v2321_v24 = vmul.f32 0.70710677, %v4683_v59  ;;  %v2288_v47 = vmul.f32 0.5, %v2256_v55  ;;  %v1389_v46 = vmul.f32 %v4603_v38, %v4062_v56  ;;  %v1037_v1 = vadd.f32 %v6094_v22, %v968_v7  ;;  %v4709_v53 = vld [vmem:[#allocation2 + $0x131] sm:$0xff] }
 0x136   : > { %v1352_v37 = vadd.f32 %v1320_v33, %v1283_v48  ;;  %v2051_v3 = vadd.f32 %v2019_v10, %v1982_v16  ;;  %v1736_v18 = vadd.f32 %v1704_v29, %v1667_v39  ;;  %v1458_v26 = vmul.f32 %v4705_v20, %v4067_v62  ;;  %6095 = vst [vmem:[#allocation55_spill] sm:$0xff] %v4709_v53  ;;  %v6096_v48 = vld [vmem:[#allocation93_spill] sm:$0xff]  ;;  %v6097_v39 = vld [vmem:[#allocation54_spill] sm:$0xff] }
 0x137   : > { %2666 = verf.f32 %v2321_v24  ;;  %v1567_v55 = vmul.f32 %v4078_v30, %v4317_v17  ;;  %v1636_v60 = vmul.f32 %v4091_v12, %v4431_v42  ;;  %v1106_v33 = vadd.f32 %v6096_v48, %v1037_v1  ;;  %v4725_v17 = vld [vmem:[%s5743_s1 + $0x7] ss:$0 sm:$0xff]  ;;  %v4732_v1 = vld [vmem:[#allocation2 + $0x132] sm:$0xff] }
 0x138   : > { %v2665_v19 = vpop.eup %2664  ;;  %v1421_v0 = vadd.f32 %v1389_v46, %v1352_v37  ;;  %v2120_v10 = vadd.f32 %v4635_v35, %v2051_v3  ;;  %v1805_v29 = vadd.f32 %v1773_v32, %v1736_v18  ;;  %v1705_v7 = vmul.f32 %v4096_v2, %v4518_v57 }
 0x139   : > { %v2384_v31 = vadd.f32 1.0, %v2665_v19  ;;  %v1774_v16 = vmul.f32 %v4110_v36, %v4607_v27  ;;  %v1215_v37 = vadd.f32 %v6097_v39, %v1106_v33  ;;  %v1252_v46 = vmul.f32 %v4725_v17, %v4462_v11  ;;  %v6098_v33 = vld [vmem:[#allocation100_spill] sm:$0xff] }
 0x13a   : > { %v1490_v24 = vadd.f32 %v1458_v26, %v1421_v0  ;;  %v2189_v32 = vadd.f32 %v4643_v13, %v2120_v10  ;;  %v1874_v18 = vadd.f32 %v1842_v15, %v1805_v29  ;;  %v1843_v3 = vmul.f32 %v4115_v6, %v4709_v53 }
 0x13b   : > { %v2416_v35 = vmul.f32 %v2384_v31, %v2288_v47  ;;  %v1952_v26 = vmul.f32 %v4131_v14, %v4342_v45  ;;  %v1284_v19 = vadd.f32 %v1252_v46, %v1215_v37  ;;  %v1321_v0 = vmul.f32 %v4556_v8, %v4053_v52  ;;  %v6099_v31 = vld [vmem:[#allocation76_spill] sm:$0xff]  ;;  %v6101_v37 = vld [vmem:[#allocation87_spill] sm:$0xff] }
 0x13c   : > { %v1599_v22 = vadd.f32 %v1567_v55, %v1490_v24  ;;  %v2258_v11 = vadd.f32 %v4647_v49, %v2189_v32  ;;  %v1983_v47 = vadd.f32 %v1951_v63, %v1874_v18  ;;  %v2021_v13 = vmul.f32 %v4147_v23, %v4460_v25 }
 0x13d   : > { %2448 = vst.msk [vmem:[%s4419_s9 + $0x38] sm:$0xff] %vm233_vm0, %v2416_v35  ;;  %v2090_v15 = vmul.f32 %v4152_v54, %v4536_v4  ;;  %v1353_v48 = vadd.f32 %v1321_v0, %v1284_v19  ;;  %v1390_v45 = vmul.f32 %v4651_v43, %v4062_v56  ;;  %v969_v10 = vadd.f32 %v6099_v31, %v6098_v33  ;;  %v4766_v0 = vld [vmem:[#allocation2 + $0x149] sm:$0xff] }
 0x13e   : > { %v1668_v55 = vadd.f32 %v1636_v60, %v1599_v22  ;;  %v2322_v52 = vmul.f32 0.70710677, %v2258_v11  ;;  %v2052_v29 = vadd.f32 %v2020_v44, %v1983_v47  ;;  %v4751_v49 = vmul.f32 %v4166_v41, %v4625_v61  ;;  %v4757_v60 = vld [vmem:[#allocation2 + $0x148] sm:$0xff]  ;;  %v6102_v47 = vld [vmem:[#allocation98_spill] sm:$0xff] }
 0x13f   : > { %v4755_v63 = vmul.f32 %v4171_v9, %v4732_v1  ;;  %v1422_v39 = vadd.f32 %v1390_v45, %v1353_v48  ;;  %6100 = vst [vmem:[#allocation31_spill] sm:$0xff] %v4757_v60  ;;  %v1459_v56 = vmul.f32 %v4757_v60, %v4067_v62  ;;  %v1038_v46 = vadd.f32 %v6101_v37, %v969_v10  ;;  %v6103_v45 = vld [vmem:[#allocation59_spill] sm:$0xff]  ;;  %v6104_v10 = vld [vmem:[#allocation6_spill] sm:$0xff] }
 0x140   : > { %v1737_v24 = vadd.f32 %v1705_v7, %v1668_v55  ;;  %v2289_v44 = vmul.f32 0.5, %v4683_v59  ;;  %2668 = verf.f32 %v2322_v52  ;;  %v2121_v32 = vadd.f32 %v4687_v34, %v2052_v29 }
 0x141   : > { %v2667_v35 = vpop.eup %2666  ;;  %v1568_v18 = vmul.f32 %v4078_v30, %v4365_v50  ;;  %v1491_v7 = vadd.f32 %v1459_v56, %v1422_v39  ;;  %v1107_v55 = vadd.f32 %v6102_v47, %v1038_v46  ;;  %v1637_v48 = vmul.f32 %v4091_v12, %v4476_v21  ;;  %v6105_v12 = vld [vmem:[#allocation5_spill] sm:$0xff] }
 0x142   : > { %v2385_v22 = vadd.f32 1.0, %v2667_v35  ;;  %v1806_v19 = vadd.f32 %v1774_v16, %v1737_v24  ;;  %v2190_v62 = vadd.f32 %v4691_v51, %v2121_v32  ;;  %v1706_v59 = vmul.f32 %v4096_v2, %v4560_v58  ;;  %v4786_v24 = vld [vmem:[#allocation2 + $0x14a] sm:$0xff] }
 0x143   : > { %v1253_v34 = vmul.f32 %v4725_v17, %v6091_v28  ;;  %v1600_v16 = vadd.f32 %v1568_v18, %v1491_v7  ;;  %v1216_v33 = vadd.f32 %v6103_v45, %v1107_v55  ;;  %v1775_v52 = vmul.f32 %v4110_v36, %v6104_v10  ;;  %v4806_v32 = vld [vmem:[%s5743_s1 + $0x11] ss:$0 sm:$0xff]  ;;  %v6111_v45 = vld [vmem:[#allocation92_spill] sm:$0xff] }
 0x144   : > { %v2417_v30 = vmul.f32 %v2385_v22, %v2289_v44  ;;  %v1875_v50 = vadd.f32 %v1843_v3, %v1806_v19  ;;  %v2259_v31 = vadd.f32 %v4700_v40, %v2190_v62  ;;  %v1844_v51 = vmul.f32 %v4115_v6, %v4766_v0  ;;  %v4791_v40 = vld [vmem:[%s5743_s1 + $0xc] ss:$0 sm:$0xff]  ;;  %v6106_v6 = vld [vmem:[#allocation27_spill] sm:$0xff]  ;;  %v4816_v55 = vld [vmem:[#allocation2 + $0x150] sm:$0xff] }
 0x145   : > { %v1953_v29 = vmul.f32 %v4131_v14, %v6105_v12  ;;  %v1669_v28 = vadd.f32 %v1637_v48, %v1600_v16  ;;  %v1285_v3 = vadd.f32 %v1253_v34, %v1216_v33  ;;  %v1322_v36 = vmul.f32 %v4791_v40, %v4603_v38  ;;  %v6107_v14 = vld [vmem:[#allocation37_spill] sm:$0xff]  ;;  %v4837_v34 = vld [vmem:[%s5743_s1 + $0x8] ss:$0 sm:$0xff] }
 0x146   : > { %2449 = vst.msk [vmem:[%s4419_s9 + $0x40] sm:$0xff] %vm233_vm0, %v2417_v30  ;;  %v1984_v2 = vadd.f32 %v1952_v26, %v1875_v50  ;;  %v2323_v39 = vmul.f32 0.70710677, %v2259_v31  ;;  %v2022_v56 = vmul.f32 %v4147_v23, %v6106_v6  ;;  %v2091_v37 = vmul.f32 %v4152_v54, %v6107_v14  ;;  %v6108_v54 = vld [vmem:[#allocation105_spill] sm:$0xff]  ;;  %v4844_v50 = vld [vmem:[%s5743_s1 + $0xd] ss:$0 sm:$0xff] }
 0x147   : > { %v4801_v26 = vmul.f32 %v4166_v41, %v4673_v5  ;;  %v1738_v35 = vadd.f32 %v1706_v59, %v1669_v28  ;;  %v1354_v44 = vadd.f32 %v1322_v36, %v1285_v3  ;;  %v1391_v18 = vmul.f32 %v4806_v32, %v4705_v20  ;;  %v6109_v41 = vld [vmem:[#allocation81_spill] sm:$0xff]  ;;  %v4830_v59 = vld [vmem:[%s5743_s1 + $0x3] ss:$0 sm:$0xff] }
 0x148   : > { %v2053_v46 = vadd.f32 %v2021_v13, %v1984_v2  ;;  %v2290_v22 = vmul.f32 0.5, %v2258_v11  ;;  %2670 = verf.f32 %v2323_v39  ;;  %v4812_v23 = vmul.f32 %v4171_v9, %v4786_v24  ;;  %v4821_v62 = vld [vmem:[%s5743_s1 + $0x16] ss:$0 sm:$0xff]  ;;  %v4853_v28 = vld [vmem:[%s5743_s1 + $0x12] ss:$0 sm:$0xff] }
 0x149   : > { %v970_v19 = vadd.f32 %v6109_v41, %v6108_v54  ;;  %v1807_v7 = vadd.f32 %v1775_v52, %v1738_v35  ;;  %v1423_v47 = vadd.f32 %v1391_v18, %v1354_v44  ;;  %v1460_v11 = vmul.f32 %v4821_v62, %v4816_v55  ;;  %v4825_v48 = vld [vmem:[#allocation2 + $0x151] sm:$0xff] }
 0x14a   : > { %v2122_v13 = vadd.f32 %v2090_v15, %v2053_v46  ;;  %6110 = vst [vmem:[#allocation21_spill] sm:$0xff] %v4825_v48  ;;  %v2669_v9 = vpop.eup %2668  ;;  %v1569_v15 = vmul.f32 %v4830_v59, %v4431_v42  ;;  %v1638_v30 = vmul.f32 %v4837_v34, %v4518_v57  ;;  %v1707_v16 = vmul.f32 %v4844_v50, %v4607_v27  ;;  %v4860_v36 = vld [vmem:[%s5743_s1 + $0x17] ss:$0 sm:$0xff]  ;;  %v6112_v46 = vld [vmem:[#allocation103_spill] sm:$0xff] }
 0x14b   : > { %v1039_v33 = vadd.f32 %v6111_v45, %v970_v19  ;;  %v2386_v52 = vadd.f32 1.0, %v2669_v9  ;;  %v1876_v12 = vadd.f32 %v1844_v51, %v1807_v7  ;;  %v1492_v2 = vadd.f32 %v1460_v11, %v1423_v47  ;;  %v4878_v7 = vld [vmem:[%s5743_s1 + $0x9] ss:$0 sm:$0xff]  ;;  %v4890_v9 = vld [vmem:[%s5743_s1 + $0xe] ss:$0 sm:$0xff] }
 0x14c   : > { %v2191_v42 = vadd.f32 %v4751_v49, %v2122_v13  ;;  %v1776_v3 = vmul.f32 %v4853_v28, %v4709_v53  ;;  %v1845_v39 = vmul.f32 %v4860_v36, %v4825_v48  ;;  %v4867_v49 = vld [vmem:[%s5743_s1 + $0x4] ss:$0 sm:$0xff]  ;;  %v2291_v19 = vmul.f32 0.5, %v2259_v31  ;;  %v4873_v13 = vld [vmem:[#allocation2 + $0x152] sm:$0xff]  ;;  %v6113_v11 = vld [vmem:[#allocation64_spill] sm:$0xff] }
 0x14d   : > { %v1954_v51 = vmul.f32 %v4867_v49, %v4460_v25  ;;  %v1108_v35 = vadd.f32 %v6112_v46, %v1039_v33  ;;  %v2418_v44 = vmul.f32 %v2386_v52, %v2290_v22  ;;  %v1985_v54 = vadd.f32 %v1953_v29, %v1876_v12  ;;  %v4897_v45 = vld [vmem:[%s5743_s1 + $0x13] ss:$0 sm:$0xff]  ;;  %v6115_v52 = vld [vmem:[#allocation86_spill] sm:$0xff] }
 0x14e   : > { %v2260_v18 = vadd.f32 %v4755_v63, %v2191_v42  ;;  %v1601_v41 = vadd.f32 %v1569_v15, %v1492_v2  ;;  %v2023_v47 = vmul.f32 %v4878_v7, %v4536_v4  ;;  %v1254_v22 = vmul.f32 %v4725_v17, %v4556_v8  ;;  %v4908_v46 = vld [vmem:[%s5743_s1 + $0x18] ss:$0 sm:$0xff] }
 0x14f   : > { %v1217_v25 = vadd.f32 %v6113_v11, %v1108_v35  ;;  %2450 = vst.msk [vmem:[%s4419_s9 + $0x48] sm:$0xff] %vm233_vm0, %v2418_v44  ;;  %v2054_v29 = vadd.f32 %v2022_v56, %v1985_v54  ;;  %v2092_v15 = vmul.f32 %v4890_v9, %v4625_v61  ;;  %v2161_v8 = vmul.f32 %v4897_v45, %v4732_v1  ;;  %v4914_v11 = vld [vmem:[#allocation2 + $0x168] sm:$0xff] }
 0x150   : > { %v2324_v63 = vmul.f32 0.70710677, %v2260_v18  ;;  %v1670_v31 = vadd.f32 %v1638_v30, %v1601_v41  ;;  %v1323_v56 = vmul.f32 %v4791_v40, %v4651_v43  ;;  %v6114_v30 = vld [vmem:[#allocation110_spill] sm:$0xff]  ;;  %v2230_v35 = vmul.f32 %v4908_v46, %v4873_v13  ;;  %6116 = vst [vmem:[#allocation42_spill] sm:$0xff] %v4914_v11 }
 0x151   : > { %v1286_v33 = vadd.f32 %v1254_v22, %v1217_v25  ;;  %v971_v42 = vadd.f32 %v6115_v52, %v6114_v30  ;;  %v2123_v12 = vadd.f32 %v2091_v37, %v2054_v29  ;;  %v1392_v41 = vmul.f32 %v4806_v32, %v4757_v60  ;;  %v6117_v37 = vld [vmem:[#allocation97_spill] sm:$0xff] }
 0x152   : > { %2672 = verf.f32 %v2324_v63  ;;  %v1739_v2 = vadd.f32 %v1707_v16, %v1670_v31  ;;  %v2671_v44 = vpop.eup %2670  ;;  %v1461_v25 = vmul.f32 %v4914_v11, %v4821_v62  ;;  %v4920_v31 = vld [vmem:[#allocation2 + $0x169] sm:$0xff]  ;;  %v1639_v30 = vmul.f32 %v4837_v34, %v4560_v58 }
 0x153   : > { %v1355_v54 = vadd.f32 %v1323_v56, %v1286_v33  ;;  %v1040_v16 = vadd.f32 %v6117_v37, %v971_v42  ;;  %v2387_v22 = vadd.f32 1.0, %v2671_v44  ;;  %v2192_v63 = vadd.f32 %v4801_v26, %v2123_v12  ;;  %6118 = vst [vmem:[#allocation53_spill] sm:$0xff] %v4920_v31  ;;  %v6119_v11 = vld [vmem:[#allocation108_spill] sm:$0xff] }
 0x154   : > { %v1808_v29 = vadd.f32 %v1776_v3, %v1739_v2  ;;  %v1570_v33 = vmul.f32 %v4830_v59, %v4476_v21  ;;  %v1708_v52 = vmul.f32 %v4844_v50, %v6104_v10  ;;  %v1777_v3 = vmul.f32 %v4853_v28, %v4766_v0  ;;  %v6120_v2 = vld [vmem:[#allocation69_spill] sm:$0xff] }
 0x155   : > { %v1424_v56 = vadd.f32 %v1392_v41, %v1355_v54  ;;  %v1109_v60 = vadd.f32 %v6119_v11, %v1040_v16  ;;  %v2419_v42 = vmul.f32 %v2387_v22, %v2291_v19  ;;  %v2261_v44 = vadd.f32 %v4812_v23, %v2192_v63 }
 0x156   : > { %v1877_v26 = vadd.f32 %v1845_v39, %v1808_v29  ;;  %v1846_v21 = vmul.f32 %v4860_v36, %v4920_v31  ;;  %v1255_v41 = vmul.f32 %v4725_v17, %v4603_v38  ;;  %v1955_v23 = vmul.f32 %v4867_v49, %v6106_v6 }
 0x157   : > { %v1493_v12 = vadd.f32 %v1461_v25, %v1424_v56  ;;  %v1218_v54 = vadd.f32 %v6120_v2, %v1109_v60  ;;  %2451 = vst.msk [vmem:[%s4419_s9 + $0x50] sm:$0xff] %vm233_vm0, %v2419_v42  ;;  %v2325_v37 = vmul.f32 0.70710677, %v2261_v44  ;;  %v2024_v39 = vmul.f32 %v4878_v7, %v6107_v14  ;;  %v4943_v25 = vld [vmem:[#allocation2 + $0x16a] sm:$0xff]  ;;  %v6122_v56 = vld [vmem:[#allocation115_spill] sm:$0xff] }
 0x158   : > { %v1986_v11 = vadd.f32 %v1954_v51, %v1877_v26  ;;  %6121 = vst [vmem:[#allocation16_spill] sm:$0xff] %v4943_v25  ;;  %v4947_v16 = vmul.f32 %v4890_v9, %v4673_v5  ;;  %v1324_v38 = vmul.f32 %v4791_v40, %v4705_v20  ;;  %v2292_v22 = vmul.f32 0.5, %v2260_v18  ;;  %v6123_v42 = vld [vmem:[#allocation91_spill] sm:$0xff]  ;;  %v4963_v18 = vld [vmem:[#allocation2 + $0x170] sm:$0xff] }
 0x159   : > { %v1602_v19 = vadd.f32 %v1570_v33, %v1493_v12  ;;  %v1287_v60 = vadd.f32 %v1255_v41, %v1218_v54  ;;  %2674 = verf.f32 %v2325_v37  ;;  %v4953_v6 = vmul.f32 %v4897_v45, %v4786_v24  ;;  %6124 = vst [vmem:[#allocation26_spill] sm:$0xff] %v4963_v18 }
 0x15a   : > { %v2055_v51 = vadd.f32 %v2023_v47, %v1986_v11  ;;  %v1393_v33 = vmul.f32 %v4816_v55, %v4806_v32  ;;  %v972_v26 = vadd.f32 %v6123_v42, %v6122_v56  ;;  %v4961_v54 = vmul.f32 %v4908_v46, %v4943_v25 }
 0x15b   : > { %v1671_v63 = vadd.f32 %v1639_v30, %v1602_v19  ;;  %v1356_v29 = vadd.f32 %v1324_v38, %v1287_v60  ;;  %v1462_v47 = vmul.f32 %v4963_v18, %v4821_v62  ;;  %v1571_v30 = vmul.f32 %v4830_v59, %v4518_v57  ;;  %v4969_v19 = vld [vmem:[#allocation2 + $0x171] sm:$0xff] }
 0x15c   : > { %v2673_v12 = vpop.eup %2672  ;;  %v2124_v2 = vadd.f32 %v2092_v15, %v2055_v51  ;;  %v6125_v60 = vld [vmem:[#allocation102_spill] sm:$0xff]  ;;  %v1640_v51 = vmul.f32 %v4837_v34, %v4607_v27  ;;  %v1709_v56 = vmul.f32 %v4844_v50, %v4709_v53  ;;  %v1778_v42 = vmul.f32 %v4853_v28, %v4825_v48 }
 0x15d   : > { %v2388_v41 = vadd.f32 1.0, %v2673_v12  ;;  %v1740_v37 = vadd.f32 %v1708_v52, %v1671_v63  ;;  %v1425_v11 = vadd.f32 %v1393_v33, %v1356_v29  ;;  %v1041_v15 = vadd.f32 %v6125_v60, %v972_v26  ;;  %v6126_v52 = vld [vmem:[#allocation113_spill] sm:$0xff]  ;;  %v6128_v48 = vld [vmem:[#allocation74_spill] sm:$0xff] }
 0x15e   : > { %v2193_v38 = vadd.f32 %v2161_v8, %v2124_v2  ;;  %v2293_v29 = vmul.f32 0.5, %v2261_v44  ;;  %v1847_v26 = vmul.f32 %v4860_v36, %v4969_v19  ;;  %v1956_v8 = vmul.f32 %v4867_v49, %v4536_v4  ;;  %v4985_v53 = vld [vmem:[#allocation2 + $0x172] sm:$0xff] }
 0x15f   : > { %v2420_v18 = vmul.f32 %v2388_v41, %v2292_v22  ;;  %v1809_v57 = vadd.f32 %v1777_v3, %v1740_v37  ;;  %v1494_v12 = vadd.f32 %v1462_v47, %v1425_v11  ;;  %v1110_v63 = vadd.f32 %v6126_v52, %v1041_v15  ;;  %6127 = vst [vmem:[#allocation145_spill] sm:$0xff] %v4985_v53  ;;  %v6129_v41 = vld [vmem:[#allocation31_spill] sm:$0xff]  ;;  %v6130_v11 = vld [vmem:[#allocation42_spill] sm:$0xff] }
 0x160   : > { %v2262_v33 = vadd.f32 %v2230_v35, %v2193_v38  ;;  %v1256_v3 = vmul.f32 %v4725_v17, %v4651_v43  ;;  %v2025_v35 = vmul.f32 %v4878_v7, %v4625_v61  ;;  %v2094_v44 = vmul.f32 %v4890_v9, %v4732_v1  ;;  %v6131_v38 = vld [vmem:[#allocation120_spill] sm:$0xff] }
 0x161   : > { %2452 = vst.msk [vmem:[%s4419_s9 + $0x58] sm:$0xff] %vm233_vm0, %v2420_v18  ;;  %v1878_v2 = vadd.f32 %v1846_v21, %v1809_v57  ;;  %v1603_v60 = vadd.f32 %v1571_v30, %v1494_v12  ;;  %v1219_v22 = vadd.f32 %v6128_v48, %v1110_v63  ;;  %v4996_v4 = vmul.f32 %v4897_v45, %v4873_v13  ;;  %v6132_v57 = vld [vmem:[#allocation96_spill] sm:$0xff] }
 0x162   : > { %v2326_v47 = vmul.f32 0.70710677, %v2262_v33  ;;  %v1325_v48 = vmul.f32 %v4791_v40, %v6129_v41  ;;  %v5002_v43 = vmul.f32 %v4908_v46, %v4985_v53  ;;  %v1394_v15 = vmul.f32 %v6130_v11, %v4806_v32  ;;  %v6133_v53 = vld [vmem:[#allocation107_spill] sm:$0xff] }
 0x163   : > { %v1987_v21 = vadd.f32 %v1955_v23, %v1878_v2  ;;  %v1672_v18 = vadd.f32 %v1640_v51, %v1603_v60  ;;  %v1288_v30 = vadd.f32 %v1256_v3, %v1219_v22  ;;  %v2675_v37 = vpop.eup %2674  ;;  %v973_v12 = vadd.f32 %v6132_v57, %v6131_v38  ;;  %v5008_v2 = vld [vmem:[#allocation2 + $0x189] sm:$0xff] }
 0x164   : > { %2676 = verf.f32 %v2326_v47  ;;  %v2389_v52 = vadd.f32 1.0, %v2675_v37  ;;  %v5010_v60 = vld [vmem:[#allocation2 + $0x188] sm:$0xff]  ;;  %v1572_v3 = vmul.f32 %v4830_v59, %v4560_v58  ;;  %v1641_v47 = vmul.f32 %v4837_v34, %v6104_v10  ;;  %v6134_v58 = vld [vmem:[#allocation118_spill] sm:$0xff] }
 0x165   : > { %v2056_v63 = vadd.f32 %v2024_v39, %v1987_v21  ;;  %v1741_v23 = vadd.f32 %v1709_v56, %v1672_v18  ;;  %v1357_v51 = vadd.f32 %v1325_v48, %v1288_v30  ;;  %v1463_v22 = vmul.f32 %v5010_v60, %v4821_v62 }
 0x166   : > { %v1042_v38 = vadd.f32 %v6133_v53, %v973_v12  ;;  %v2421_v37 = vmul.f32 %v2389_v52, %v2293_v29  ;;  %v1710_v18 = vmul.f32 %v4844_v50, %v4766_v0  ;;  %v1779_v30 = vmul.f32 %v4853_v28, %v4920_v31 }
 0x167   : > { %v2125_v39 = vadd.f32 %v4947_v16, %v2056_v63  ;;  %v1810_v56 = vadd.f32 %v1778_v42, %v1741_v23  ;;  %v1426_v21 = vadd.f32 %v1394_v15, %v1357_v51  ;;  %v1848_v48 = vmul.f32 %v4860_v36, %v5008_v2  ;;  %v5032_v15 = vld [vmem:[#allocation2 + $0x18a] sm:$0xff]  ;;  %v6136_v63 = vld [vmem:[#allocation79_spill] sm:$0xff] }
 0x168   : > { %v1111_v57 = vadd.f32 %v6134_v58, %v1042_v38  ;;  %2453 = vst.msk [vmem:[%s4419_s9 + $0x60] sm:$0xff] %vm233_vm0, %v2421_v37  ;;  %v1957_v16 = vmul.f32 %v4867_v49, %v6107_v14  ;;  %v2294_v42 = vmul.f32 0.5, %v2262_v33  ;;  %6135 = vst [vmem:[#allocation11_spill] sm:$0xff] %v5032_v15  ;;  %v2026_v52 = vmul.f32 %v4878_v7, %v4673_v5 }
 0x169   : > { %v2194_v53 = vadd.f32 %v4953_v6, %v2125_v39  ;;  %v1879_v29 = vadd.f32 %v1847_v26, %v1810_v56  ;;  %v1495_v12 = vadd.f32 %v1463_v22, %v1426_v21  ;;  %v1257_v51 = vmul.f32 %v4725_v17, %v4705_v20  ;;  %v6137_v39 = vld [vmem:[#allocation125_spill] sm:$0xff] }
 0x16a   : > { %v1220_v23 = vadd.f32 %v6136_v63, %v1111_v57  ;;  %v2095_v26 = vmul.f32 %v4890_v9, %v4786_v24  ;;  %v5044_v14 = vmul.f32 %v4897_v45, %v4943_v25  ;;  %v1326_v22 = vmul.f32 %v4816_v55, %v4791_v40  ;;  %v6138_v56 = vld [vmem:[#allocation101_spill] sm:$0xff] }
 0x16b   : > { %v2263_v38 = vadd.f32 %v4961_v54, %v2194_v53  ;;  %v1988_v37 = vadd.f32 %v1956_v8, %v1879_v29  ;;  %v1604_v6 = vadd.f32 %v1572_v3, %v1495_v12  ;;  %v974_v21 = vadd.f32 %v6138_v56, %v6137_v39  ;;  %v6139_v53 = vld [vmem:[#allocation26_spill] sm:$0xff]  ;;  %v5056_v12 = vld [vmem:[#allocation2 + $0x190] sm:$0xff] }
 0x16c   : > { %v1289_v33 = vadd.f32 %v1257_v51, %v1220_v23  ;;  %v5052_v54 = vmul.f32 %v4908_v46, %v5032_v15  ;;  %v1395_v29 = vmul.f32 %v6139_v53, %v4806_v32  ;;  %6140 = vst [vmem:[#allocation60_spill] sm:$0xff] %v5056_v12  ;;  %v1464_v63 = vmul.f32 %v5056_v12, %v4821_v62  ;;  %v6141_v23 = vld [vmem:[#allocation112_spill] sm:$0xff]  ;;  %v6143_v15 = vld [vmem:[#allocation123_spill] sm:$0xff] }
 0x16d   : > { %v2327_v58 = vmul.f32 0.70710677, %v2263_v38  ;;  %v2057_v20 = vadd.f32 %v2025_v35, %v1988_v37  ;;  %v1673_v57 = vadd.f32 %v1641_v47, %v1604_v6  ;;  %v1043_v51 = vadd.f32 %v6141_v23, %v974_v21  ;;  %v5061_v6 = vld [vmem:[#allocation2 + $0x191] sm:$0xff] }
 0x16e   : > { %v2677_v8 = vpop.eup %2676  ;;  %v1358_v3 = vadd.f32 %v1326_v22, %v1289_v33  ;;  %v1573_v33 = vmul.f32 %v4830_v59, %v4607_v27  ;;  %v6142_v22 = vld [vmem:[#allocation55_spill] sm:$0xff]  ;;  %v1258_v27 = vmul.f32 %v6129_v41, %v4725_v17  ;;  %v1327_v41 = vmul.f32 %v6130_v11, %v4791_v40 }
 0x16f   : > { %v2390_v39 = vadd.f32 1.0, %v2677_v8  ;;  %2678 = verf.f32 %v2327_v58  ;;  %v2126_v35 = vadd.f32 %v2094_v44, %v2057_v20  ;;  %v1742_v47 = vadd.f32 %v1710_v18, %v1673_v57  ;;  %v6144_v8 = vld [vmem:[#allocation21_spill] sm:$0xff]  ;;  %v6145_v20 = vld [vmem:[#allocation84_spill] sm:$0xff] }
 0x170   : > { %v1427_v37 = vadd.f32 %v1395_v29, %v1358_v3  ;;  %v1642_v56 = vmul.f32 %v4837_v34, %v6142_v22  ;;  %v1112_v53 = vadd.f32 %v6143_v15, %v1043_v51  ;;  %v1711_v58 = vmul.f32 %v4844_v50, %v6144_v8  ;;  %v5083_v29 = vld [vmem:[#allocation2 + $0x192] sm:$0xff] }
 0x171   : > { %v2422_v25 = vmul.f32 %v2390_v39, %v2294_v42  ;;  %v2195_v12 = vadd.f32 %v4996_v4, %v2126_v35  ;;  %v1811_v21 = vadd.f32 %v1779_v30, %v1742_v47  ;;  %v1780_v18 = vmul.f32 %v4853_v28, %v4969_v19  ;;  %v6147_v35 = vld [vmem:[#allocation130_spill] sm:$0xff] }
 0x172   : > { %v1496_v44 = vadd.f32 %v1464_v63, %v1427_v37  ;;  %v1221_v57 = vadd.f32 %v6145_v20, %v1112_v53  ;;  %v1849_v4 = vmul.f32 %v4860_v36, %v5061_v6  ;;  %v1958_v30 = vmul.f32 %v4867_v49, %v4625_v61  ;;  %v6148_v47 = vld [vmem:[#allocation106_spill] sm:$0xff] }
 0x173   : > { %2454 = vst.msk [vmem:[%s4419_s9 + $0x68] sm:$0xff] %vm233_vm0, %v2422_v25  ;;  %v2264_v15 = vadd.f32 %v5002_v43, %v2195_v12  ;;  %v1880_v42 = vadd.f32 %v1848_v48, %v1811_v21  ;;  %v2027_v53 = vmul.f32 %v4878_v7, %v4732_v1  ;;  %v2096_v43 = vmul.f32 %v4890_v9, %v4873_v13  ;;  %v6146_v48 = vld [vmem:[#allocation145_spill] sm:$0xff] }
 0x174   : > { %v1605_v3 = vadd.f32 %v1573_v33, %v1496_v44  ;;  %v1290_v63 = vadd.f32 %v1258_v27, %v1221_v57  ;;  %v5093_v12 = vmul.f32 %v4897_v45, %v6146_v48  ;;  %v1396_v39 = vmul.f32 %v5010_v60, %v4806_v32  ;;  %v5103_v57 = vld [vmem:[#allocation2 + $0x1a8] sm:$0xff] }
 0x175   : > { %v2328_v25 = vmul.f32 0.70710677, %v2264_v15  ;;  %v1989_v23 = vadd.f32 %v1957_v16, %v1880_v42  ;;  %v975_v37 = vadd.f32 %v6148_v47, %v6147_v35  ;;  %v2295_v33 = vmul.f32 0.5, %v2263_v38  ;;  %v5107_v27 = vld [vmem:[#allocation2 + $0x1a9] sm:$0xff] }
 0x176   : > { %v1674_v61 = vadd.f32 %v1642_v56, %v1605_v3  ;;  %v1359_v51 = vadd.f32 %v1327_v41, %v1290_v63  ;;  %v5101_v16 = vmul.f32 %v4908_v46, %v5083_v29  ;;  %v1465_v56 = vmul.f32 %v5103_v57, %v4821_v62  ;;  %v6149_v42 = vld [vmem:[#allocation117_spill] sm:$0xff] }
 0x177   : > { %2680 = verf.f32 %v2328_v25  ;;  %v2058_v21 = vadd.f32 %v2026_v52, %v1989_v23  ;;  %v1044_v3 = vadd.f32 %v6149_v42, %v975_v37  ;;  %v1574_v52 = vmul.f32 %v4830_v59, %v6104_v10 }
 0x178   : > { %v1743_v44 = vadd.f32 %v1711_v58, %v1674_v61  ;;  %v1428_v20 = vadd.f32 %v1396_v39, %v1359_v51  ;;  %v1643_v38 = vmul.f32 %v4837_v34, %v4766_v0  ;;  %v1712_v58 = vmul.f32 %v4844_v50, %v4920_v31  ;;  %v6150_v51 = vld [vmem:[#allocation128_spill] sm:$0xff] }
 0x179   : > { %v2679_v63 = vpop.eup %2678  ;;  %v2127_v41 = vadd.f32 %v2095_v26, %v2058_v21  ;;  %v1113_v39 = vadd.f32 %v6150_v51, %v1044_v3  ;;  %v1781_v26 = vmul.f32 %v4853_v28, %v5008_v2  ;;  %v1850_v10 = vmul.f32 %v4860_v36, %v5107_v27  ;;  %v6157_v51 = vld [vmem:[#allocation111_spill] sm:$0xff] }
 0x17a   : > { %v2391_v25 = vadd.f32 1.0, %v2679_v63  ;;  %v1812_v23 = vadd.f32 %v1780_v18, %v1743_v44  ;;  %v1497_v61 = vadd.f32 %v1465_v56, %v1428_v20  ;;  %v1259_v47 = vmul.f32 %v4816_v55, %v4725_v17  ;;  %v6151_v63 = vld [vmem:[#allocation89_spill] sm:$0xff]  ;;  %v6152_v20 = vld [vmem:[#allocation16_spill] sm:$0xff] }
 0x17b   : > { %v2196_v35 = vadd.f32 %v5044_v14, %v2127_v41  ;;  %v1222_v31 = vadd.f32 %v6151_v63, %v1113_v39  ;;  %v1959_v44 = vmul.f32 %v4867_v49, %v4673_v5  ;;  %v2028_v14 = vmul.f32 %v4878_v7, %v4786_v24  ;;  %v6154_v41 = vld [vmem:[#allocation26_spill] sm:$0xff] }
 0x17c   : > { %v2423_v37 = vmul.f32 %v2391_v25, %v2295_v33  ;;  %v1881_v21 = vadd.f32 %v1849_v4, %v1812_v23  ;;  %v1606_v42 = vadd.f32 %v1574_v52, %v1497_v61  ;;  %v2097_v56 = vmul.f32 %v4890_v9, %v6152_v20  ;;  %v5134_v33 = vld [vmem:[#allocation2 + $0x1aa] sm:$0xff]  ;;  %v6155_v23 = vld [vmem:[#allocation11_spill] sm:$0xff]  ;;  %v6156_v61 = vld [vmem:[#allocation134_spill] sm:$0xff] }
 0x17d   : > { %v2265_v18 = vadd.f32 %v5052_v54, %v2196_v35  ;;  %6153 = vst [vmem:[#allocation36_spill] sm:$0xff] %v5134_v33  ;;  %v1291_v4 = vadd.f32 %v1259_v47, %v1222_v31  ;;  %v1328_v52 = vmul.f32 %v6154_v41, %v4791_v40  ;;  %v2296_v54 = vmul.f32 0.5, %v2264_v15  ;;  %v5146_v47 = vld [vmem:[#allocation2 + $0x1b0] sm:$0xff] }
 0x17e   : > { %2455 = vst.msk [vmem:[%s4419_s9 + $0x70] sm:$0xff] %vm233_vm0, %v2423_v37  ;;  %v1990_v3 = vadd.f32 %v1958_v30, %v1881_v21  ;;  %v1675_v55 = vadd.f32 %v1643_v38, %v1606_v42  ;;  %v2166_v5 = vmul.f32 %v4897_v45, %v6155_v23  ;;  %v976_v39 = vadd.f32 %v6157_v51, %v6156_v61  ;;  %v6158_v30 = vld [vmem:[#allocation60_spill] sm:$0xff]  ;;  %v6160_v21 = vld [vmem:[#allocation122_spill] sm:$0xff] }
 0x17f   : > { %v2329_v25 = vmul.f32 0.70710677, %v2265_v18  ;;  %v1360_v20 = vadd.f32 %v1328_v52, %v1291_v4  ;;  %v1397_v38 = vmul.f32 %v6158_v30, %v4806_v32  ;;  %v2235_v31 = vmul.f32 %v4908_v46, %v5134_v33  ;;  %6159 = vst [vmem:[#allocation4_spill] sm:$0xff] %v5146_v47 }
 0x180   : > { %v2059_v35 = vadd.f32 %v2027_v53, %v1990_v3  ;;  %v1744_v63 = vadd.f32 %v1712_v58, %v1675_v55  ;;  %v1466_v15 = vmul.f32 %v5146_v47, %v4821_v62  ;;  %v1045_v42 = vadd.f32 %v6160_v21, %v976_v39  ;;  %v5151_v3 = vld [vmem:[#allocation2 + $0x1b1] sm:$0xff] }
 0x181   : > { %v2681_v37 = vpop.eup %2680  ;;  %2682 = verf.f32 %v2329_v25  ;;  %v1429_v58 = vadd.f32 %v1397_v38, %v1360_v20  ;;  %v1575_v55 = vmul.f32 %v4830_v59, %v6142_v22  ;;  %v1644_v4 = vmul.f32 %v4837_v34, %v6144_v8  ;;  %v6161_v25 = vld [vmem:[#allocation132_spill] sm:$0xff]  ;;  %v6162_v22 = vld [vmem:[#allocation94_spill] sm:$0xff] }
 0x182   : > { %v2392_v23 = vadd.f32 1.0, %v2681_v37  ;;  %v2128_v61 = vadd.f32 %v2096_v43, %v2059_v35  ;;  %v1813_v53 = vadd.f32 %v1781_v26, %v1744_v63  ;;  %v1713_v52 = vmul.f32 %v4844_v50, %v4969_v19 }
 0x183   : > { %v1114_v51 = vadd.f32 %v6161_v25, %v1045_v42  ;;  %v1498_v35 = vadd.f32 %v1466_v15, %v1429_v58  ;;  %v1782_v26 = vmul.f32 %v4853_v28, %v5061_v6  ;;  %v1851_v20 = vmul.f32 %v4860_v36, %v5151_v3  ;;  %v6164_v25 = vld [vmem:[#allocation116_spill] sm:$0xff] }
 0x184   : > { %v2424_v47 = vmul.f32 %v2392_v23, %v2296_v54  ;;  %v2197_v39 = vadd.f32 %v5093_v12, %v2128_v61  ;;  %v1882_v43 = vadd.f32 %v1850_v10, %v1813_v53  ;;  %v1260_v38 = vmul.f32 %v6130_v11, %v4725_v17  ;;  %v5173_v10 = vld [vmem:[#allocation2 + $0x1b2] sm:$0xff] }
 0x185   : > { %v1223_v63 = vadd.f32 %v6162_v22, %v1114_v51  ;;  %v1607_v23 = vadd.f32 %v1575_v55, %v1498_v35  ;;  %v1960_v12 = vmul.f32 %v4867_v49, %v4732_v1  ;;  %v2029_v15 = vmul.f32 %v4878_v7, %v4873_v13  ;;  %v6163_v55 = vld [vmem:[#allocation139_spill] sm:$0xff] }
 0x186   : > { %2456 = vst.msk [vmem:[%s4419_s9 + $0x78] sm:$0xff] %vm233_vm0, %v2424_v47  ;;  %v2266_v37 = vadd.f32 %v5101_v16, %v2197_v39  ;;  %v1991_v54 = vadd.f32 %v1959_v44, %v1882_v43  ;;  %v2098_v21 = vmul.f32 %v4890_v9, %v6146_v48  ;;  %v1329_v11 = vmul.f32 %v5010_v60, %v4791_v40 }
 0x187   : > { %v1292_v42 = vadd.f32 %v1260_v38, %v1223_v63  ;;  %v1676_v16 = vadd.f32 %v1644_v4, %v1607_v23  ;;  %v2167_v44 = vmul.f32 %v4897_v45, %v5083_v29  ;;  %v2297_v53 = vmul.f32 0.5, %v2265_v18  ;;  %v5189_v4 = vld [vmem:[#allocation2 + $0x1c8] sm:$0xff] }
 0x188   : > { %v2330_v47 = vmul.f32 0.70710677, %v2266_v37  ;;  %v2060_v61 = vadd.f32 %v2028_v14, %v1991_v54  ;;  %v1398_v58 = vmul.f32 %v5103_v57, %v4806_v32  ;;  %v977_v51 = vadd.f32 %v6164_v25, %v6163_v55  ;;  %6165 = vst [vmem:[#allocation28_spill] sm:$0xff] %v5189_v4  ;;  %v5193_v63 = vld [vmem:[#allocation2 + $0x1c9] sm:$0xff]  ;;  %v6166_v54 = vld [vmem:[#allocation127_spill] sm:$0xff] }
 0x189   : > { %v1361_v1 = vadd.f32 %v1329_v11, %v1292_v42  ;;  %v1745_v43 = vadd.f32 %v1713_v52, %v1676_v16  ;;  %v2236_v35 = vmul.f32 %v4908_v46, %v5173_v10  ;;  %v1467_v18 = vmul.f32 %v5189_v4, %v4821_v62  ;;  %v6167_v11 = vld [vmem:[#allocation53_spill] sm:$0xff] }
 0x18a   : > { %2684 = verf.f32 %v2330_v47  ;;  %v2129_v39 = vadd.f32 %v2097_v56, %v2060_v61  ;;  %v1576_v38 = vmul.f32 %v4830_v59, %v4766_v0  ;;  %v1046_v23 = vadd.f32 %v6166_v54, %v977_v51  ;;  %v5214_v54 = vld [vmem:[#allocation2 + $0x1ca] sm:$0xff] }
 0x18b   : > { %v2683_v22 = vpop.eup %2682  ;;  %v1430_v14 = vadd.f32 %v1398_v58, %v1361_v1  ;;  %v1814_v52 = vadd.f32 %v1782_v26, %v1745_v43  ;;  %v1645_v47 = vmul.f32 %v4837_v34, %v6167_v11  ;;  %v1714_v16 = vmul.f32 %v4844_v50, %v5008_v2  ;;  %v6168_v58 = vld [vmem:[#allocation137_spill] sm:$0xff]  ;;  %6170 = vst [vmem:[#allocation47_spill] sm:$0xff] %v5214_v54 }
 0x18c   : > { %v2393_v42 = vadd.f32 1.0, %v2683_v22  ;;  %v2198_v56 = vadd.f32 %v2166_v5, %v2129_v39  ;;  %v1783_v1 = vmul.f32 %v4853_v28, %v5107_v27  ;;  %v1115_v55 = vadd.f32 %v6168_v58, %v1046_v23  ;;  %v6169_v39 = vld [vmem:[#allocation99_spill] sm:$0xff] }
 0x18d   : > { %v1499_v61 = vadd.f32 %v1467_v18, %v1430_v14  ;;  %v1883_v4 = vadd.f32 %v1851_v20, %v1814_v52  ;;  %v1852_v51 = vmul.f32 %v4860_v36, %v5193_v63  ;;  %v1961_v26 = vmul.f32 %v4867_v49, %v4786_v24  ;;  %v6174_v52 = vld [vmem:[#allocation121_spill] sm:$0xff] }
 0x18e   : > { %v2425_v25 = vmul.f32 %v2393_v42, %v2297_v53  ;;  %v2267_v0 = vadd.f32 %v2235_v31, %v2198_v56  ;;  %v1224_v43 = vadd.f32 %v6169_v39, %v1115_v55  ;;  %v1261_v22 = vmul.f32 %v6154_v41, %v4725_v17  ;;  %v6171_v31 = vld [vmem:[#allocation16_spill] sm:$0xff]  ;;  %v6172_v53 = vld [vmem:[#allocation11_spill] sm:$0xff] }
 0x18f   : > { %v1608_v5 = vadd.f32 %v1576_v38, %v1499_v61  ;;  %v1992_v18 = vadd.f32 %v1960_v12, %v1883_v4  ;;  %v2030_v20 = vmul.f32 %v4878_v7, %v6171_v31  ;;  %v2099_v38 = vmul.f32 %v4890_v9, %v6172_v53  ;;  %v6173_v4 = vld [vmem:[#allocation150_spill] sm:$0xff] }
 0x190   : > { %2457 = vst.msk [vmem:[%s4419_s9 + $0x80] sm:$0xff] %vm233_vm0, %v2425_v25  ;;  %v2331_v14 = vmul.f32 0.70710677, %v2267_v0  ;;  %v5222_v24 = vmul.f32 %v4897_v45, %v5134_v33  ;;  %v1293_v42 = vadd.f32 %v1261_v22, %v1224_v43  ;;  %v1330_v41 = vmul.f32 %v6158_v30, %v4791_v40  ;;  %v6175_v25 = vld [vmem:[#allocation4_spill] sm:$0xff]  ;;  %v5234_v22 = vld [vmem:[#allocation2 + $0x1d0] sm:$0xff] }
 0x191   : > { %v1677_v23 = vadd.f32 %v1645_v47, %v1608_v5  ;;  %v2298_v56 = vmul.f32 0.5, %v2266_v37  ;;  %v2061_v12 = vadd.f32 %v2029_v15, %v1992_v18  ;;  %v978_v61 = vadd.f32 %v6174_v52, %v6173_v4  ;;  %6176 = vst [vmem:[#allocation38_spill] sm:$0xff] %v5234_v22  ;;  %v5238_v15 = vld [vmem:[#allocation2 + $0x1d1] sm:$0xff] }
 0x192   : > { %2686 = verf.f32 %v2331_v14  ;;  %v5230_v55 = vmul.f32 %v4908_v46, %v5214_v54  ;;  %v1362_v47 = vadd.f32 %v1330_v41, %v1293_v42  ;;  %v1399_v5 = vmul.f32 %v6175_v25, %v4806_v32  ;;  %v6177_v14 = vld [vmem:[#allocation131_spill] sm:$0xff]  ;;  %v6178_v54 = vld [vmem:[#allocation142_spill] sm:$0xff] }
 0x193   : > { %v1746_v58 = vadd.f32 %v1714_v16, %v1677_v23  ;;  %v2130_v43 = vadd.f32 %v2098_v21, %v2061_v12  ;;  %v1468_v37 = vmul.f32 %v5234_v22, %v4821_v62  ;;  %v1577_v16 = vmul.f32 %v4830_v59, %v6144_v8 }
 0x194   : > { %v2685_v39 = vpop.eup %2684  ;;  %v1047_v18 = vadd.f32 %v6177_v14, %v978_v61  ;;  %v1431_v41 = vadd.f32 %v1399_v5, %v1362_v47  ;;  %v1646_v4 = vmul.f32 %v4837_v34, %v4969_v19  ;;  %v1715_v12 = vmul.f32 %v4844_v50, %v5061_v6  ;;  %v6179_v47 = vld [vmem:[#allocation104_spill] sm:$0xff] }
 0x195   : > { %v2394_v23 = vadd.f32 1.0, %v2685_v39  ;;  %v1815_v42 = vadd.f32 %v1783_v1, %v1746_v58  ;;  %v2199_v21 = vadd.f32 %v2167_v44, %v2130_v43  ;;  %v1784_v52 = vmul.f32 %v4853_v28, %v5151_v3 }
 0x196   : > { %v1116_v22 = vadd.f32 %v6178_v54, %v1047_v18  ;;  %v1500_v33 = vadd.f32 %v1468_v37, %v1431_v41  ;;  %v1853_v61 = vmul.f32 %v4860_v36, %v5238_v15  ;;  %v1962_v58 = vmul.f32 %v4867_v49, %v4873_v13 }
 0x197   : > { %v2426_v25 = vmul.f32 %v2394_v23, %v2298_v56  ;;  %v1884_v8 = vadd.f32 %v1852_v51, %v1815_v42  ;;  %v2268_v1 = vadd.f32 %v2236_v35, %v2199_v21  ;;  %v1262_v5 = vmul.f32 %v5010_v60, %v4725_v17  ;;  %v5259_v56 = vld [vmem:[#allocation2 + $0x1d2] sm:$0xff]  ;;  %v6182_v42 = vld [vmem:[#allocation28_spill] sm:$0xff] }
 0x198   : > { %v1225_v44 = vadd.f32 %v6179_v47, %v1116_v22  ;;  %v2299_v39 = vmul.f32 0.5, %v2267_v0  ;;  %v1609_v54 = vadd.f32 %v1577_v16, %v1500_v33  ;;  %v2031_v51 = vmul.f32 %v4878_v7, %v6146_v48  ;;  %v6181_v33 = vld [vmem:[#allocation126_spill] sm:$0xff]  ;;  %v6183_v47 = vld [vmem:[#allocation136_spill] sm:$0xff] }
 0x199   : > { %2458 = vst.msk [vmem:[%s4419_s9 + $0x88] sm:$0xff] %vm233_vm0, %v2426_v25  ;;  %v1993_v43 = vadd.f32 %v1961_v26, %v1884_v8  ;;  %v2332_v37 = vmul.f32 0.70710677, %v2268_v1  ;;  %v2100_v35 = vmul.f32 %v4890_v9, %v5083_v29  ;;  %v1331_v22 = vmul.f32 %v5103_v57, %v4791_v40  ;;  %v6180_v26 = vld [vmem:[#allocation151_spill] sm:$0xff] }
 0x19a   : > { %v1294_v13 = vadd.f32 %v1262_v5, %v1225_v44  ;;  %v1678_v60 = vadd.f32 %v1646_v4, %v1609_v54  ;;  %v2169_v0 = vmul.f32 %v4897_v45, %v5173_v10  ;;  %v979_v25 = vadd.f32 %v6181_v33, %v6180_v26  ;;  %v5277_v4 = vld [vmem:[#allocation2 + $0x1e9] sm:$0xff] }
 0x19b   : > { %v2062_v14 = vadd.f32 %v2030_v20, %v1993_v43  ;;  %2688 = verf.f32 %v2332_v37  ;;  %v5273_v18 = vmul.f32 %v4908_v46, %v5259_v56  ;;  %v1400_v41 = vmul.f32 %v6182_v42, %v4806_v32  ;;  %v5280_v43 = vld [vmem:[#allocation2 + $0x1e8] sm:$0xff] }
 0x19c   : > { %v2687_v16 = vpop.eup %2686  ;;  %v1363_v23 = vadd.f32 %v1331_v22, %v1294_v13  ;;  %v1747_v20 = vadd.f32 %v1715_v12, %v1678_v60  ;;  %v1048_v44 = vadd.f32 %v6183_v47, %v979_v25  ;;  %v1469_v54 = vmul.f32 %v5280_v43, %v4821_v62 }
 0x19d   : > { %v2395_v21 = vadd.f32 1.0, %v2687_v16  ;;  %v2131_v8 = vadd.f32 %v2099_v38, %v2062_v14  ;;  %v1578_v37 = vmul.f32 %v4830_v59, %v6167_v11  ;;  %v1647_v13 = vmul.f32 %v4837_v34, %v5008_v2  ;;  %v6184_v14 = vld [vmem:[#allocation148_spill] sm:$0xff] }
 0x19e   : > { %v1432_v5 = vadd.f32 %v1400_v41, %v1363_v23  ;;  %v1816_v12 = vadd.f32 %v1784_v52, %v1747_v20  ;;  %v1117_v60 = vadd.f32 %v6184_v14, %v1048_v44  ;;  %v1716_v33 = vmul.f32 %v4844_v50, %v5107_v27  ;;  %v6185_v23 = vld [vmem:[#allocation109_spill] sm:$0xff]  ;;  %v6186_v20 = vld [vmem:[#allocation36_spill] sm:$0xff]  ;;  %v6190_v14 = vld [vmem:[#allocation114_spill] sm:$0xff] }
 0x19f   : > { %v2427_v22 = vmul.f32 %v2395_v21, %v2299_v39  ;;  %v2200_v38 = vadd.f32 %v5222_v24, %v2131_v8  ;;  %v1785_v25 = vmul.f32 %v4853_v28, %v5193_v63  ;;  %v1854_v16 = vmul.f32 %v4860_v36, %v5277_v4 }
 0x1a0   : > { %v1501_v26 = vadd.f32 %v1469_v54, %v1432_v5  ;;  %v1885_v39 = vadd.f32 %v1853_v61, %v1816_v12  ;;  %v1226_v24 = vadd.f32 %v6185_v23, %v1117_v60  ;;  %v1263_v52 = vmul.f32 %v6158_v30, %v4725_v17  ;;  %v6188_v30 = vld [vmem:[#allocation38_spill] sm:$0xff]  ;;  %v6189_v12 = vld [vmem:[#allocation15_spill] sm:$0xff] }
 0x1a1   : > { %2459 = vst.msk [vmem:[%s4419_s9 + $0x90] sm:$0xff] %vm233_vm0, %v2427_v22  ;;  %v2269_v11 = vadd.f32 %v5230_v55, %v2200_v38  ;;  %v1963_v21 = vmul.f32 %v4867_v49, %v6171_v31  ;;  %v2032_v8 = vmul.f32 %v4878_v7, %v6172_v53  ;;  %v2101_v47 = vmul.f32 %v4890_v9, %v6186_v20  ;;  %v6187_v55 = vld [vmem:[#allocation4_spill] sm:$0xff]  ;;  %v5332_v20 = vld [vmem:[#allocation2 + $0x1f1] sm:$0xff] }
 0x1a2   : > { %v1610_v41 = vadd.f32 %v1578_v37, %v1501_v26  ;;  %v1994_v5 = vadd.f32 %v1962_v58, %v1885_v39  ;;  %v1295_v54 = vadd.f32 %v1263_v52, %v1226_v24  ;;  %v1332_v61 = vmul.f32 %v6187_v55, %v4791_v40  ;;  %v5314_v26 = vld [vmem:[#allocation2 + $0x1ea] sm:$0xff]  ;;  %v6191_v52 = vld [vmem:[#allocation47_spill] sm:$0xff] }
 0x1a3   : > { %v2333_v44 = vmul.f32 0.70710677, %v2269_v11  ;;  %v2300_v22 = vmul.f32 0.5, %v2268_v1  ;;  %v1401_v37 = vmul.f32 %v6188_v30, %v4806_v32  ;;  %v1227_v31 = vadd.f32 %v6190_v14, %v6189_v12 }
 0x1a4   : > { %v1679_v38 = vadd.f32 %v1647_v13, %v1610_v41  ;;  %v2063_v60 = vadd.f32 %v2031_v51, %v1994_v5  ;;  %v1364_v23 = vadd.f32 %v1332_v61, %v1295_v54  ;;  %v1264_v58 = vmul.f32 %v5103_v57, %v4725_v17  ;;  %v5320_v13 = vld [vmem:[#allocation2 + $0x1f0] sm:$0xff] }
 0x1a5   : > { %2690 = verf.f32 %v2333_v44  ;;  %v2689_v39 = vpop.eup %2688  ;;  %v2170_v1 = vmul.f32 %v4897_v45, %v6191_v52  ;;  %v1470_v41 = vmul.f32 %v5320_v13, %v4821_v62  ;;  %v1333_v44 = vmul.f32 %v6182_v42, %v4791_v40 }
 0x1a6   : > { %v1748_v24 = vadd.f32 %v1716_v33, %v1679_v38  ;;  %v2396_v51 = vadd.f32 1.0, %v2689_v39  ;;  %v2132_v5 = vadd.f32 %v2100_v35, %v2063_v60  ;;  %v1433_v54 = vadd.f32 %v1401_v37, %v1364_v23  ;;  %v5345_v60 = vld [vmem:[#allocation2 + $0x208] sm:$0xff] }
 0x1a7   : > { %v1296_v61 = vadd.f32 %v1264_v58, %v1227_v31  ;;  %v2239_v17 = vmul.f32 %v4908_v46, %v5314_v26  ;;  %v1579_v57 = vmul.f32 %v4830_v59, %v4969_v19  ;;  %v1402_v33 = vmul.f32 %v5280_v43, %v4806_v32 }
 0x1a8   : > { %v1817_v12 = vadd.f32 %v1785_v25, %v1748_v24  ;;  %v2428_v38 = vmul.f32 %v2396_v51, %v2300_v22  ;;  %v2201_v14 = vadd.f32 %v2169_v0, %v2132_v5  ;;  %v1502_v52 = vadd.f32 %v1470_v41, %v1433_v54 }
 0x1a9   : > { %v1365_v39 = vadd.f32 %v1333_v44, %v1296_v61  ;;  %v1648_v37 = vmul.f32 %v4837_v34, %v5061_v6  ;;  %v1717_v25 = vmul.f32 %v4844_v50, %v5151_v3  ;;  %v1786_v31 = vmul.f32 %v4853_v28, %v5238_v15  ;;  %v6192_v61 = vld [vmem:[#allocation24_spill] sm:$0xff] }
 0x1aa   : > { %v1886_v35 = vadd.f32 %v1854_v16, %v1817_v12  ;;  %2460 = vst.msk [vmem:[%s4419_s9 + $0x98] sm:$0xff] %vm233_vm0, %v2428_v38  ;;  %v5343_v19 = vadd.f32 %v5273_v18, %v2201_v14  ;;  %v1611_v0 = vadd.f32 %v1579_v57, %v1502_v52  ;;  %v1471_v16 = vmul.f32 %v5345_v60, %v4821_v62  ;;  %v5363_v57 = vld [vmem:[%s5743_s1 + $0x7] ss:$0 sm:$0xff] }
 0x1ab   : > { %v1434_v22 = vadd.f32 %v1402_v33, %v1365_v39  ;;  %v1855_v58 = vmul.f32 %v4860_v36, %v5332_v20  ;;  %v1964_v24 = vmul.f32 %v4867_v49, %v6146_v48  ;;  %v2033_v41 = vmul.f32 %v4878_v7, %v5083_v29 }
 0x1ac   : > { %v1995_v23 = vadd.f32 %v1963_v21, %v1886_v35  ;;  %v2334_v18 = vmul.f32 0.70710677, %v5343_v19  ;;  %v1680_v44 = vadd.f32 %v1648_v37, %v1611_v0  ;;  %v1580_v51 = vmul.f32 %v4830_v59, %v5008_v2  ;;  %v6193_v21 = vld [vmem:[#allocation119_spill] sm:$0xff]  ;;  %v5371_v0 = vld [vmem:[#allocation2 + $0x1f2] sm:$0xff] }
 0x1ad   : > { %v1503_v52 = vadd.f32 %v1471_v16, %v1434_v22  ;;  %v2301_v5 = vmul.f32 0.5, %v2269_v11  ;;  %v1228_v12 = vadd.f32 %v6193_v21, %v6192_v61  ;;  %v1265_v48 = vmul.f32 %v5363_v57, %v6187_v55  ;;  %v5391_v21 = vld [vmem:[#allocation2 + $0x210] sm:$0xff] }
 0x1ae   : > { %v2064_v54 = vadd.f32 %v2032_v8, %v1995_v23  ;;  %2692 = verf.f32 %v2334_v18  ;;  %v1749_v38 = vadd.f32 %v1717_v25, %v1680_v44  ;;  %v1649_v2 = vmul.f32 %v4837_v34, %v5107_v27  ;;  %v5377_v18 = vld [vmem:[#allocation2 + $0x209] sm:$0xff] }
 0x1af   : > { %v2691_v33 = vpop.eup %2690  ;;  %v1612_v14 = vadd.f32 %v1580_v51, %v1503_v52  ;;  %v1297_v39 = vadd.f32 %v1265_v48, %v1228_v12  ;;  %v1334_v35 = vmul.f32 %v6188_v30, %v4791_v40  ;;  %v2102_v55 = vmul.f32 %v4890_v9, %v5173_v10 }
 0x1b0   : > { %v2397_v11 = vadd.f32 1.0, %v2691_v33  ;;  %v2133_v8 = vadd.f32 %v2101_v47, %v2064_v54  ;;  %v1818_v37 = vadd.f32 %v1786_v31, %v1749_v38  ;;  %v1718_v25 = vmul.f32 %v4844_v50, %v5193_v63 }
 0x1b1   : > { %v1681_v22 = vadd.f32 %v1649_v2, %v1612_v14  ;;  %v1366_v47 = vadd.f32 %v1334_v35, %v1297_v39  ;;  %v1403_v44 = vmul.f32 %v5320_v13, %v4806_v32  ;;  %v2171_v31 = vmul.f32 %v4897_v45, %v5259_v56  ;;  %v6194_v14 = vld [vmem:[#allocation36_spill] sm:$0xff] }
 0x1b2   : > { %v2429_v16 = vmul.f32 %v2397_v11, %v2301_v5  ;;  %v2202_v23 = vadd.f32 %v2170_v1, %v2133_v8  ;;  %v1887_v52 = vadd.f32 %v1855_v58, %v1818_v37  ;;  %v1787_v54 = vmul.f32 %v4853_v28, %v5277_v4  ;;  %v6195_v37 = vld [vmem:[#allocation141_spill] sm:$0xff] }
 0x1b3   : > { %v1750_v51 = vadd.f32 %v1718_v25, %v1681_v22  ;;  %v2240_v1 = vmul.f32 %v4908_v46, %v5371_v0  ;;  %v1435_v5 = vadd.f32 %v1403_v44, %v1366_v47  ;;  %v1472_v58 = vmul.f32 %v5391_v21, %v4821_v62 }
 0x1b4   : > { %2461 = vst.msk [vmem:[%s4419_s9 + $0xa0] sm:$0xff] %vm233_vm0, %v2429_v16  ;;  %v5387_v61 = vadd.f32 %v2239_v17, %v2202_v23  ;;  %v1996_v12 = vadd.f32 %v1964_v24, %v1887_v52  ;;  %v1856_v33 = vmul.f32 %v4860_v36, %v5377_v18  ;;  %v1965_v38 = vmul.f32 %v4867_v49, %v6172_v53  ;;  %v6196_v24 = vld [vmem:[#allocation124_spill] sm:$0xff]  ;;  %v6197_v16 = vld [vmem:[#allocation47_spill] sm:$0xff] }
 0x1b5   : > { %v1819_v48 = vadd.f32 %v1787_v54, %v1750_v51  ;;  %v2034_v2 = vmul.f32 %v4878_v7, %v6194_v14  ;;  %v1504_v11 = vadd.f32 %v1472_v58, %v1435_v5  ;;  %v1581_v8 = vmul.f32 %v4830_v59, %v5061_v6 }
 0x1b6   : > { %v2335_v17 = vmul.f32 0.70710677, %v5387_v61  ;;  %v2065_v39 = vadd.f32 %v2033_v41, %v1996_v12  ;;  %v1229_v22 = vadd.f32 %v6196_v24, %v6195_v37  ;;  %v1266_v25 = vmul.f32 %v5363_v57, %v6182_v42  ;;  %v5417_v12 = vld [vmem:[#allocation2 + $0x20a] sm:$0xff] }
 0x1b7   : > { %v1888_v35 = vadd.f32 %v1856_v33, %v1819_v48  ;;  %v2103_v53 = vmul.f32 %v4890_v9, %v6197_v16  ;;  %v1613_v23 = vadd.f32 %v1581_v8, %v1504_v11  ;;  %v1650_v47 = vmul.f32 %v4837_v34, %v5151_v3  ;;  %v5419_v34 = vld [vmem:[#allocation2 + $0x211] sm:$0xff]  ;;  %v5429_v8 = vld [vmem:[#allocation2 + $0x228] sm:$0xff] }
 0x1b8   : > { %2694 = verf.f32 %v2335_v17  ;;  %v2693_v44 = vpop.eup %2692  ;;  %v2134_v52 = vadd.f32 %v2102_v55, %v2065_v39  ;;  %v1298_v59 = vadd.f32 %v1266_v25, %v1229_v22  ;;  %v1335_v6 = vmul.f32 %v5280_v43, %v4791_v40  ;;  %v6199_v25 = vld [vmem:[#allocation129_spill] sm:$0xff] }
 0x1b9   : > { %v1997_v51 = vadd.f32 %v1965_v38, %v1888_v35  ;;  %v2302_v41 = vmul.f32 0.5, %v5343_v19  ;;  %v2398_v54 = vadd.f32 1.0, %v2693_v44  ;;  %v1682_v5 = vadd.f32 %v1650_v47, %v1613_v23  ;;  %v5460_v47 = vld [vmem:[%s5743_s1 + $0x8] ss:$0 sm:$0xff] }
 0x1ba   : > { %v1719_v42 = vmul.f32 %v4844_v50, %v5238_v15  ;;  %v2203_v58 = vadd.f32 %v2171_v31, %v2134_v52  ;;  %v1367_v55 = vadd.f32 %v1335_v6, %v1298_v59  ;;  %v1404_v33 = vmul.f32 %v5345_v60, %v4806_v32 }
 0x1bb   : > { %v2066_v48 = vadd.f32 %v2034_v2, %v1997_v51  ;;  %v2430_v38 = vmul.f32 %v2398_v54, %v2302_v41  ;;  %v2172_v40 = vmul.f32 %v4897_v45, %v5314_v26  ;;  %v1788_v17 = vmul.f32 %v4853_v28, %v5332_v20 }
 0x1bc   : > { %v1751_v19 = vadd.f32 %v1719_v42, %v1682_v5  ;;  %v5427_v50 = vadd.f32 %v2240_v1, %v2203_v58  ;;  %v1436_v11 = vadd.f32 %v1404_v33, %v1367_v55  ;;  %v1473_v2 = vmul.f32 %v5429_v8, %v4821_v62  ;;  %v5445_v62 = vld [vmem:[%s5743_s1 + $0x3] ss:$0 sm:$0xff]  ;;  %v5476_v5 = vld [vmem:[%s5743_s1 + $0xd] ss:$0 sm:$0xff]  ;;  %v5480_v42 = vld [vmem:[#allocation2 + $0x212] sm:$0xff] }
 0x1bd   : > { %v2135_v31 = vadd.f32 %v2103_v53, %v2066_v48  ;;  %2462 = vst.msk [vmem:[%s4419_s9 + $0xa8] sm:$0xff] %vm233_vm0, %v2430_v38  ;;  %v2241_v32 = vmul.f32 %v4908_v46, %v5417_v12  ;;  %v1857_v45 = vmul.f32 %v4860_v36, %v5419_v34  ;;  %v1966_v28 = vmul.f32 %v4867_v49, %v5083_v29  ;;  %v6198_v36 = vld [vmem:[#allocation3_spill] sm:$0xff]  ;;  %v5484_v55 = vld [vmem:[#allocation2 + $0x229] sm:$0xff]  ;;  %v5489_v38 = vld [vmem:[%s5743_s1 + $0x11] ss:$0 sm:$0xff] }
 0x1be   : > { %v1820_v39 = vadd.f32 %v1788_v17, %v1751_v19  ;;  %v2336_v1 = vmul.f32 0.70710677, %v5427_v50  ;;  %v1505_v37 = vadd.f32 %v1473_v2, %v1436_v11  ;;  %v1582_v24 = vmul.f32 %v5445_v62, %v5107_v27  ;;  %v5503_v2 = vld [vmem:[%s5743_s1 + $0x13] ss:$0 sm:$0xff] }
 0x1bf   : > { %v2204_v35 = vadd.f32 %v2172_v40, %v2135_v31  ;;  %v2035_v22 = vmul.f32 %v4878_v7, %v5173_v10  ;;  %v1230_v53 = vadd.f32 %v6199_v25, %v6198_v36  ;;  %v1267_v49 = vmul.f32 %v5363_v57, %v6188_v30  ;;  %v5468_v30 = vld [vmem:[%s5743_s1 + $0xc] ss:$0 sm:$0xff]  ;;  %v5496_v31 = vld [vmem:[%s5743_s1 + $0x12] ss:$0 sm:$0xff]  ;;  %v5530_v25 = vld [vmem:[%s5743_s1 + $0x17] ss:$0 sm:$0xff] }
 0x1c0   : > { %v1889_v46 = vadd.f32 %v1857_v45, %v1820_v39  ;;  %2696 = verf.f32 %v2336_v1  ;;  %v1614_v23 = vadd.f32 %v1582_v24, %v1505_v37  ;;  %v1651_v27 = vmul.f32 %v5460_v47, %v5193_v63  ;;  %v5507_v45 = vld [vmem:[#allocation2 + $0x230] sm:$0xff]  ;;  %v6201_v37 = vld [vmem:[#allocation12_spill] sm:$0xff] }
 0x1c1   : > { %v5455_v29 = vadd.f32 %v2241_v32, %v2204_v35  ;;  %v2303_v7 = vmul.f32 0.5, %v5387_v61  ;;  %v1299_v51 = vadd.f32 %v1267_v49, %v1230_v53  ;;  %v1336_v59 = vmul.f32 %v5468_v30, %v5320_v13  ;;  %v6200_v35 = vld [vmem:[#allocation33_spill] sm:$0xff] }
 0x1c2   : > { %v2695_v44 = vpop.eup %2694  ;;  %v1998_v52 = vadd.f32 %v1966_v28, %v1889_v46  ;;  %v1683_v54 = vadd.f32 %v1651_v27, %v1614_v23  ;;  %v1720_v61 = vmul.f32 %v5476_v5, %v5277_v4  ;;  %v2104_v48 = vmul.f32 %v4890_v9, %v5259_v56  ;;  %v5512_v28 = vld [vmem:[%s5743_s1 + $0x16] ss:$0 sm:$0xff]  ;;  %v5523_v46 = vld [vmem:[%s5743_s1 + $0x18] ss:$0 sm:$0xff]  ;;  %v5537_v23 = vld [vmem:[%s5743_s1 + $0x4] ss:$0 sm:$0xff] }
 0x1c3   : > { %v2399_v6 = vadd.f32 1.0, %v2695_v44  ;;  %v2337_v41 = vmul.f32 0.70710677, %v5455_v29  ;;  %v1368_v33 = vadd.f32 %v1336_v59, %v1299_v51  ;;  %v1405_v40 = vmul.f32 %v5489_v38, %v5391_v21  ;;  %v5546_v51 = vld [vmem:[%s5743_s1 + $0x9] ss:$0 sm:$0xff] }
 0x1c4   : > { %v2067_v58 = vadd.f32 %v2035_v22, %v1998_v52  ;;  %v1752_v17 = vadd.f32 %v1720_v61, %v1683_v54  ;;  %v1789_v9 = vmul.f32 %v5496_v31, %v5377_v18  ;;  %v2173_v32 = vmul.f32 %v5503_v2, %v5371_v0 }
 0x1c5   : > { %v2431_v19 = vmul.f32 %v2399_v6, %v2303_v7  ;;  %2698 = verf.f32 %v2337_v41  ;;  %v1437_v39 = vadd.f32 %v1405_v40, %v1368_v33  ;;  %v1474_v1 = vmul.f32 %v5512_v28, %v5507_v45  ;;  %v6202_v6 = vld [vmem:[#allocation9_spill] sm:$0xff] }
 0x1c6   : > { %v2136_v11 = vadd.f32 %v2104_v48, %v2067_v58  ;;  %v1123_v24 = vadd.f32 %v6201_v37, %v6200_v35  ;;  %v2242_v22 = vmul.f32 %v5523_v46, %v5480_v42  ;;  %v1821_v36 = vadd.f32 %v1789_v9, %v1752_v17  ;;  %v6203_v41 = vld [vmem:[#allocation133_spill] sm:$0xff]  ;;  %v5573_v37 = vld [vmem:[#allocation2 + $0x248] sm:$0xff] }
 0x1c7   : > { %2463 = vst.msk [vmem:[%s4419_s9 + $0xb0] sm:$0xff] %vm233_vm0, %v2431_v19  ;;  %v1858_v53 = vmul.f32 %v5530_v25, %v5484_v55  ;;  %v1967_v27 = vmul.f32 %v5537_v23, %v6194_v14  ;;  %v1506_v44 = vadd.f32 %v1474_v1, %v1437_v39  ;;  %v1583_v7 = vmul.f32 %v5445_v62, %v5151_v3  ;;  %v5559_v3 = vld [vmem:[%s5743_s1 + $0xe] ss:$0 sm:$0xff] }
 0x1c8   : > { %v2205_v49 = vadd.f32 %v2173_v32, %v2136_v11  ;;  %v2036_v59 = vmul.f32 %v5546_v51, %v6197_v16  ;;  %v1231_v54 = vadd.f32 %v6203_v41, %v6202_v6  ;;  %v1268_v61 = vmul.f32 %v5363_v57, %v5280_v43  ;;  %v5569_v39 = vld [vmem:[#allocation2 + $0x22a] sm:$0xff] }
 0x1c9   : > { %v1890_v52 = vadd.f32 %v1858_v53, %v1821_v36  ;;  %v2105_v58 = vmul.f32 %v5559_v3, %v5314_v26  ;;  %v1615_v48 = vadd.f32 %v1583_v7, %v1506_v44  ;;  %v1652_v33 = vmul.f32 %v5460_v47, %v5238_v15  ;;  %v5577_v36 = vld [vmem:[#allocation2 + $0x231] sm:$0xff] }
 0x1ca   : > { %v5554_v14 = vadd.f32 %v2242_v22, %v2205_v49  ;;  %v2697_v40 = vpop.eup %2696  ;;  %v2304_v19 = vmul.f32 0.5, %v5427_v50  ;;  %v1300_v9 = vadd.f32 %v1268_v61, %v1231_v54  ;;  %v1337_v43 = vmul.f32 %v5468_v30, %v5345_v60 }
 0x1cb   : > { %v1999_v17 = vadd.f32 %v1967_v27, %v1890_v52  ;;  %v2400_v11 = vadd.f32 1.0, %v2697_v40  ;;  %v1684_v1 = vadd.f32 %v1652_v33, %v1615_v48  ;;  %v1721_v35 = vmul.f32 %v5476_v5, %v5332_v20 }
 0x1cc   : > { %v2338_v32 = vmul.f32 0.70710677, %v5554_v14  ;;  %v2174_v50 = vmul.f32 %v5503_v2, %v5417_v12  ;;  %v1369_v53 = vadd.f32 %v1337_v43, %v1300_v9  ;;  %v1406_v60 = vmul.f32 %v5489_v38, %v5429_v8 }
 0x1cd   : > { %v2068_v22 = vadd.f32 %v2036_v59, %v1999_v17  ;;  %v2432_v49 = vmul.f32 %v2400_v11, %v2304_v19  ;;  %v1753_v27 = vadd.f32 %v1721_v35, %v1684_v1  ;;  %v1790_v44 = vmul.f32 %v5496_v31, %v5419_v34  ;;  %v6204_v19 = vld [vmem:[#allocation138_spill] sm:$0xff]  ;;  %v6206_v1 = vld [vmem:[#allocation8_spill] sm:$0xff] }
 0x1ce   : > { %2700 = verf.f32 %v2338_v32  ;;  %v2243_v59 = vmul.f32 %v5523_v46, %v5569_v39  ;;  %v1438_v6 = vadd.f32 %v1406_v60, %v1369_v53  ;;  %v1475_v41 = vmul.f32 %v5512_v28, %v5573_v37  ;;  %v6205_v32 = vld [vmem:[#allocation144_spill] sm:$0xff] }
 0x1cf   : > { %v2699_v7 = vpop.eup %2698  ;;  %v2137_v52 = vadd.f32 %v2105_v58, %v2068_v22  ;;  %2464 = vst.msk [vmem:[%s4419_s9 + $0xb8] sm:$0xff] %vm233_vm0, %v2432_v49  ;;  %v2305_v54 = vmul.f32 0.5, %v5455_v29  ;;  %v1822_v61 = vadd.f32 %v1790_v44, %v1753_v27  ;;  %v1859_v48 = vmul.f32 %v5530_v25, %v5577_v36 }
 0x1d0   : > { %v2401_v8 = vadd.f32 1.0, %v2699_v7  ;;  %v1507_v40 = vadd.f32 %v1475_v41, %v1438_v6  ;;  %v1584_v58 = vmul.f32 %v5445_v62, %v5193_v63  ;;  %v1232_v17 = vadd.f32 %v6204_v19, %v1123_v24  ;;  %v5620_v41 = vld [vmem:[#allocation2 + $0x249] sm:$0xff] }
 0x1d1   : > { %v2206_v33 = vadd.f32 %v2174_v50, %v2137_v52  ;;  %v1891_v43 = vadd.f32 %v1859_v48, %v1822_v61  ;;  %v1968_v11 = vmul.f32 %v5537_v23, %v5173_v10  ;;  %v1269_v29 = vmul.f32 %v5363_v57, %v5320_v13  ;;  %v6207_v13 = vld [vmem:[#allocation146_spill] sm:$0xff]  ;;  %v6208_v57 = vld [vmem:[#allocation13_spill] sm:$0xff] }
 0x1d2   : > { %v2433_v9 = vmul.f32 %v2401_v8, %v2305_v54  ;;  %v1056_v35 = vadd.f32 %v6206_v1, %v6205_v32  ;;  %v1616_v50 = vadd.f32 %v1584_v58, %v1507_v40  ;;  %v1653_v53 = vmul.f32 %v5460_v47, %v5277_v4  ;;  %v5616_v52 = vld [vmem:[#allocation2 + $0x250] sm:$0xff] }
 0x1d3   : > { %v5601_v22 = vadd.f32 %v2243_v59, %v2206_v33  ;;  %v2000_v63 = vadd.f32 %v1968_v11, %v1891_v43  ;;  %v2037_v24 = vmul.f32 %v5546_v51, %v5259_v56  ;;  %v1301_v60 = vadd.f32 %v1269_v29, %v1232_v17  ;;  %v6209_v11 = vld [vmem:[#allocation143_spill] sm:$0xff] }
 0x1d4   : > { %2465 = vst.msk [vmem:[%s4419_s9 + $0xc0] sm:$0xff] %vm233_vm0, %v2433_v9  ;;  %v1338_v10 = vmul.f32 %v5468_v30, %v5391_v21  ;;  %v1124_v49 = vadd.f32 %v6208_v57, %v6207_v13  ;;  %v1685_v44 = vadd.f32 %v1653_v53, %v1616_v50  ;;  %v1722_v7 = vmul.f32 %v5476_v5, %v5377_v18  ;;  %v5624_v30 = vld [vmem:[#allocation2 + $0x232] sm:$0xff] }
 0x1d5   : > { %v2339_v27 = vmul.f32 0.70710677, %v5601_v22  ;;  %v2069_v59 = vadd.f32 %v2037_v24, %v2000_v63  ;;  %v2106_v6 = vmul.f32 %v5559_v3, %v5371_v0  ;;  %v1407_v21 = vmul.f32 %v5507_v45, %v5489_v38  ;;  %v6211_v13 = vld [vmem:[#allocation14_spill] sm:$0xff] }
 0x1d6   : > { %v1370_v54 = vadd.f32 %v1338_v10, %v1301_v60  ;;  %v2175_v8 = vmul.f32 %v5503_v2, %v5480_v42  ;;  %v1754_v61 = vadd.f32 %v1722_v7, %v1685_v44  ;;  %v1791_v48 = vmul.f32 %v5496_v31, %v5484_v55  ;;  %v6210_v60 = vld [vmem:[#allocation153_spill] sm:$0xff]  ;;  %v1164_v7 = vld [vmem:[#allocation2 + $0x268] sm:$0xff] }
 0x1d7   : > { %2702 = verf.f32 %v2339_v27  ;;  %v2306_v40 = vmul.f32 0.5, %v5554_v14  ;;  %v2138_v58 = vadd.f32 %v2106_v6, %v2069_v59  ;;  %v1476_v17 = vmul.f32 %v5512_v28, %v5616_v52  ;;  %v5648_v59 = vld [vmem:[#allocation2 + $0x24a] sm:$0xff] }
 0x1d8   : > { %v2701_v33 = vpop.eup %2700  ;;  %v1439_v19 = vadd.f32 %v1407_v21, %v1370_v54  ;;  %v1823_v45 = vadd.f32 %v1791_v48, %v1754_v61  ;;  %v1860_v43 = vmul.f32 %v5530_v25, %v5620_v41  ;;  %v1233_v29 = vadd.f32 %v6209_v11, %v1124_v49  ;;  %v6212_v54 = vld [vmem:[#allocation140_spill] sm:$0xff] }
 0x1d9   : > { %v2402_v9 = vadd.f32 1.0, %v2701_v33  ;;  %v2207_v32 = vadd.f32 %v2175_v8, %v2138_v58  ;;  %v2244_v1 = vmul.f32 %v5523_v46, %v5624_v30  ;;  %v1585_v14 = vmul.f32 %v5445_v62, %v5238_v15  ;;  %v5661_v58 = vld [vmem:[#allocation2 + $0x251] sm:$0xff] }
 0x1da   : > { %v1508_v50 = vadd.f32 %v1476_v17, %v1439_v19  ;;  %v1892_v63 = vadd.f32 %v1860_v43, %v1823_v45  ;;  %v1969_v24 = vmul.f32 %v5537_v23, %v6197_v16  ;;  %v1302_v10 = vadd.f32 %v6210_v60, %v1233_v29 }
 0x1db   : > { %v2434_v53 = vmul.f32 %v2402_v9, %v2306_v40  ;;  %v1125_v57 = vadd.f32 %v6211_v13, %v1056_v35  ;;  %v2276_v27 = vadd.f32 %v2244_v1, %v2207_v32  ;;  %v1654_v49 = vmul.f32 %v5460_v47, %v5332_v20  ;;  %v6213_v1 = vld [vmem:[#allocation149_spill] sm:$0xff] }
 0x1dc   : > { %v1617_v44 = vadd.f32 %v1585_v14, %v1508_v50  ;;  %v2001_v15 = vadd.f32 %v1969_v24, %v1892_v63  ;;  %v2038_v6 = vmul.f32 %v5546_v51, %v5314_v26  ;;  %v1371_v16 = vadd.f32 %v6212_v54, %v1302_v10  ;;  %v1549_v54 = vld [vmem:[#allocation2 + $0x269] sm:$0xff] }
 0x1dd   : > { %2466 = vst.msk [vmem:[%s4419_s9 + $0xc8] sm:$0xff] %vm233_vm0, %v2434_v53  ;;  %v1408_v21 = vmul.f32 %v5489_v38, %v5573_v37  ;;  %v2340_v35 = vmul.f32 0.70710677, %v2276_v27  ;;  %v2107_v8 = vmul.f32 %v5559_v3, %v5417_v12  ;;  %v1723_v48 = vmul.f32 %v5476_v5, %v5419_v34 }
 0x1de   : > { %v1686_v61 = vadd.f32 %v1654_v49, %v1617_v44  ;;  %v2070_v33 = vadd.f32 %v2038_v6, %v2001_v15  ;;  %v2176_v40 = vmul.f32 %v5503_v2, %v5569_v39  ;;  %v1477_v17 = vmul.f32 %v5512_v28, %v1164_v7  ;;  %v6214_v44 = vld [vmem:[#allocation35_spill] sm:$0xff] }
 0x1df   : > { %v1440_v19 = vadd.f32 %v1408_v21, %v1371_v16  ;;  %2704 = verf.f32 %v2340_v35  ;;  %v2245_v37 = vmul.f32 %v5523_v46, %v5648_v59  ;;  %v1792_v45 = vmul.f32 %v5496_v31, %v5577_v36  ;;  %v6215_v21 = vld [vmem:[#allocation135_spill] sm:$0xff] }
 0x1e0   : > { %v1755_v9 = vadd.f32 %v1723_v48, %v1686_v61  ;;  %v2139_v11 = vadd.f32 %v2107_v8, %v2070_v33  ;;  %v1586_v32 = vmul.f32 %v5445_v62, %v5277_v4  ;;  %v1234_v50 = vadd.f32 %v6213_v1, %v1125_v57  ;;  %v1165_v57 = vld [vmem:[#allocation2 + $0x270] sm:$0xff] }
 0x1e1   : > { %v2703_v43 = vpop.eup %2702  ;;  %v1509_v29 = vadd.f32 %v1477_v17, %v1440_v19  ;;  %v2307_v14 = vmul.f32 0.5, %v5601_v22  ;;  %v1861_v24 = vmul.f32 %v5530_v25, %v5661_v58  ;;  %v1655_v13 = vmul.f32 %v5460_v47, %v5377_v18 }
 0x1e2   : > { %v2403_v53 = vadd.f32 1.0, %v2703_v43  ;;  %v1824_v63 = vadd.f32 %v1792_v45, %v1755_v9  ;;  %v2208_v60 = vadd.f32 %v2176_v40, %v2139_v11  ;;  %v1303_v49 = vadd.f32 %v6214_v44, %v1234_v50 }
 0x1e3   : > { %v1618_v10 = vadd.f32 %v1586_v32, %v1509_v29  ;;  %v1970_v4 = vmul.f32 %v5537_v23, %v5259_v56  ;;  %v1724_v22 = vmul.f32 %v5476_v5, %v5484_v55  ;;  %v1409_v8 = vmul.f32 %v5489_v38, %v5616_v52  ;;  %v1933_v52 = vld [vmem:[#allocation2 + $0x252] sm:$0xff] }
 0x1e4   : > { %v2435_v7 = vmul.f32 %v2403_v53, %v2307_v14  ;;  %v1893_v15 = vadd.f32 %v1861_v24, %v1824_v63  ;;  %v2277_v6 = vadd.f32 %v2245_v37, %v2208_v60  ;;  %v1372_v35 = vadd.f32 %v6215_v21, %v1303_v49 }
 0x1e5   : > { %v1687_v16 = vadd.f32 %v1655_v13, %v1618_v10  ;;  %v2039_v61 = vmul.f32 %v5546_v51, %v5371_v0  ;;  %v1793_v56 = vmul.f32 %v5496_v31, %v5620_v41  ;;  %v1478_v40 = vmul.f32 %v5512_v28, %v1165_v57 }
 0x1e6   : > { %2467 = vst.msk [vmem:[%s4419_s9 + $0xd0] sm:$0xff] %vm233_vm0, %v2435_v7  ;;  %v2002_v18 = vadd.f32 %v1970_v4, %v1893_v15  ;;  %v2341_v48 = vmul.f32 0.70710677, %v2277_v6  ;;  %v1441_v33 = vadd.f32 %v1409_v8, %v1372_v35  ;;  %v2108_v17 = vmul.f32 %v5559_v3, %v5480_v42 }
 0x1e7   : > { %v1756_v55 = vadd.f32 %v1724_v22, %v1687_v16  ;;  %v1862_v38 = vmul.f32 %v5530_v25, %v1549_v54  ;;  %v1587_v45 = vmul.f32 %v5445_v62, %v5332_v20  ;;  %v2308_v41 = vmul.f32 0.5, %v2276_v27 }
 0x1e8   : > { %v2071_v19 = vadd.f32 %v2039_v61, %v2002_v18  ;;  %2706 = verf.f32 %v2341_v48  ;;  %v1510_v9 = vadd.f32 %v1478_v40, %v1441_v33  ;;  %v2177_v28 = vmul.f32 %v5503_v2, %v5624_v30  ;;  %v1935_v61 = vld [vmem:[#allocation2 + $0x272] sm:$0xff] }
 0x1e9   : > { %v1825_v37 = vadd.f32 %v1793_v56, %v1756_v55  ;;  %v2705_v43 = vpop.eup %2704  ;;  %v1971_v29 = vmul.f32 %v5537_v23, %v5314_v26  ;;  %v1656_v14 = vmul.f32 %v5460_v47, %v5419_v34  ;;  %v2246_v63 = vmul.f32 %v5523_v46, %v1933_v52  ;;  %v1550_v26 = vld [vmem:[#allocation2 + $0x271] sm:$0xff] }
 0x1ea   : > { %v2140_v11 = vadd.f32 %v2108_v17, %v2071_v19  ;;  %v2404_v32 = vadd.f32 1.0, %v2705_v43  ;;  %v1619_v50 = vadd.f32 %v1587_v45, %v1510_v9  ;;  %v2040_v20 = vmul.f32 %v5546_v51, %v5417_v12  ;;  %v1934_v12 = vld [vmem:[#allocation2 + $0x26a] sm:$0xff] }
 0x1eb   : > { %v1894_v1 = vadd.f32 %v1862_v38, %v1825_v37  ;;  %v1725_v60 = vmul.f32 %v5476_v5, %v5577_v36  ;;  %v2109_v34 = vmul.f32 %v5559_v3, %v5569_v39  ;;  %v1794_v44 = vmul.f32 %v5496_v31, %v5661_v58 }
 0x1ec   : > { %v2209_v53 = vadd.f32 %v2177_v28, %v2140_v11  ;;  %v2436_v62 = vmul.f32 %v2404_v32, %v2308_v41  ;;  %v1688_v24 = vadd.f32 %v1656_v14, %v1619_v50  ;;  %v2178_v15 = vmul.f32 %v5503_v2, %v5648_v59 }
 0x1ed   : > { %v2003_v27 = vadd.f32 %v1971_v29, %v1894_v1  ;;  %v1863_v5 = vmul.f32 %v5530_v25, %v1550_v26  ;;  %v2247_v57 = vmul.f32 %v5523_v46, %v1934_v12  ;;  %v1972_v54 = vmul.f32 %v5537_v23, %v5371_v0 }
 0x1ee   : > { %v2278_v10 = vadd.f32 %v2246_v63, %v2209_v53  ;;  %2468 = vst.msk [vmem:[%s4419_s9 + $0xd8] sm:$0xff] %vm233_vm0, %v2436_v62  ;;  %v1757_v47 = vadd.f32 %v1725_v60, %v1688_v24  ;;  %v2309_v31 = vmul.f32 0.5, %v2277_v6  ;;  %v2041_v59 = vmul.f32 %v5546_v51, %v5480_v42 }
 0x1ef   : > { %v2072_v13 = vadd.f32 %v2040_v20, %v2003_v27  ;;  %v2110_v18 = vmul.f32 %v5559_v3, %v5624_v30  ;;  %v2179_v0 = vmul.f32 %v5503_v2, %v1933_v52  ;;  %v2248_v6 = vmul.f32 %v5523_v46, %v1935_v61 }
 0x1f0   : > { %v2342_v49 = vmul.f32 0.70710677, %v2278_v10  ;;  %v1826_v4 = vadd.f32 %v1794_v44, %v1757_v47  ;;  %v2310_v42 = vmul.f32 0.5, %v2278_v10 }
 0x1f1   : > { %v2141_v7 = vadd.f32 %v2109_v34, %v2072_v13 }
 0x1f2   : > { %2708 = verf.f32 %v2342_v49  ;;  %v2707_v36 = vpop.eup %2706  ;;  %v1895_v39 = vadd.f32 %v1863_v5, %v1826_v4 }
 0x1f3   : > { %v2210_v22 = vadd.f32 %v2178_v15, %v2141_v7  ;;  %v2405_v58 = vadd.f32 1.0, %v2707_v36 }
 0x1f4   : > { %v2004_v21 = vadd.f32 %v1972_v54, %v1895_v39 }
 0x1f5   : > { %v2279_v16 = vadd.f32 %v2247_v57, %v2210_v22  ;;  %v2437_v35 = vmul.f32 %v2405_v58, %v2309_v31 }
 0x1f6   : > { %v2073_v25 = vadd.f32 %v2041_v59, %v2004_v21 }
 0x1f7   : > { %v2343_v8 = vmul.f32 0.70710677, %v2279_v16  ;;  %2469 = vst.msk [vmem:[%s4419_s9 + $0xe0] sm:$0xff] %vm233_vm0, %v2437_v35  ;;  %v2311_v30 = vmul.f32 0.5, %v2279_v16 }
 0x1f8   : > { %v2142_v56 = vadd.f32 %v2110_v18, %v2073_v25 }
 0x1f9   : > { %2710 = verf.f32 %v2343_v8 }
 0x1fa   : > { %v2211_v23 = vadd.f32 %v2179_v0, %v2142_v56 }
 0x1fc   : > { %v2709_v48 = vpop.eup %2708  ;;  %v2280_v55 = vadd.f32 %v2248_v6, %v2211_v23 }
 0x1fd   : > { %v2406_v51 = vadd.f32 1.0, %v2709_v48 }
 0x1fe   : > { %v2344_v40 = vmul.f32 0.70710677, %v2280_v55  ;;  %v2312_v38 = vmul.f32 0.5, %v2280_v55 }
 0x1ff   : > { %v2438_v33 = vmul.f32 %v2406_v51, %v2310_v42 }
 0x200   : > { %2712 = verf.f32 %v2344_v40 }
 0x201   : > { %2470 = vst.msk [vmem:[%s4419_s9 + $0xe8] sm:$0xff] %vm233_vm0, %v2438_v33 }
 0x203   : > { %v2711_v3 = vpop.eup %2710 }
 0x204   : > { %v2407_v19 = vadd.f32 1.0, %v2711_v3 }
 0x206   : > { %v2439_v17 = vmul.f32 %v2407_v19, %v2311_v30 }
 0x208   : > { %2471 = vst.msk [vmem:[%s4419_s9 + $0xf0] sm:$0xff] %vm233_vm0, %v2439_v17 }
 0x20a   : > { %v2713_v2 = vpop.eup %2712 }
 0x20b   : > { %v2408_v52 = vadd.f32 1.0, %v2713_v2 }
 0x20d   : > { %v2440_v46 = vmul.f32 %v2408_v52, %v2312_v38 }
 0x20f   : > { %2472 = vst.msk [vmem:[%s4419_s9 + $0xf8] sm:$0xff] %vm233_vm0, %v2440_v46 }
 0x210 PF: > { %s13_s14 = sadd.s32 1, %s2808_s14   ;;  %s6216_s12 = smov %s2804_s13 }
 0x211   : > { %p10_p5 = scmp.ge.s32.totalorder %s13_s14, 4   ;;  %s6217_s13 = smov %s6219_s15 }
 0x213   :  { %12 = sbr.rel (!%p10_p5) target bundleno = 2 (0x2), region = 70 }

</bundles_post_ra>
